<compile_context>
chip_gen: v5e
topology: v5e:2x2
jax: 0.10.0
libtpu: 0.0.40
codegen_flags: <defaults>
</compile_context>

<pallas_src>
import functools
import math

import jax
import jax.numpy as jnp
from jax.experimental import pallas as pl
from jax.experimental.pallas import tpu as pltpu

F32 = jnp.float32


# --------------------------------------------------------------------------
# Fused multi-head self-attention + mean-pool kernel (Bt batch items / step)
# --------------------------------------------------------------------------

def _mha_mean_kernel(x_ref, w_qkv_ref, b_qkv_ref, wo_ref, bz_ref, z_ref,
                     *, n_head, head_dim, bt, seq_len, embed):
    # x_ref: (Bt*L, E) slab -- Bt batch items flattened so the QKV projection
    # runs with MXU-native M.
    x = x_ref[...]

    # Single fused QKV projection: one N = 3E matmul.
    # (1/sqrt(d) pre-folded into the Q columns; bk dropped; bv folded into bz)
    qkv = (jnp.dot(x, w_qkv_ref[...], preferred_element_type=F32)
           + b_qkv_ref[...])                                       # (Bt*L, 3E)
    qkv = qkv.reshape(bt, seq_len, 3 * embed)

    wo = wo_ref[...]                                               # (E, E)
    z = jnp.zeros((bt, embed), F32)

    for h in range(n_head):                                        # static unroll
        lo = h * head_dim
        qh = qkv[:, :, lo:lo + head_dim]                           # (Bt, L, d)
        kh = qkv[:, :, embed + lo:embed + lo + head_dim]           # (Bt, L, d)
        vh = qkv[:, :, 2 * embed + lo:2 * embed + lo + head_dim]   # (Bt, L, d)

        # scores + numerically stable softmax, batched over the Bt items
        s = jnp.einsum("bqd,bkd->bqk", qh, kh,
                       preferred_element_type=F32)                 # (Bt, L, L)
        s = s - jnp.max(s, axis=-1, keepdims=True)
        p = jnp.exp(s)
        p = p * pl.reciprocal(jnp.sum(p, axis=-1, keepdims=True), approx=True)

        # Fold the sequence mean ahead of the value matmul (mean is linear,
        # only the pooled output is returned): average over query rows first.
        pbar = jnp.mean(p, axis=1)                                 # (Bt, L)
        ctx = jnp.sum(pbar[:, :, None] * vh, axis=1)               # (Bt, d)

        # out-proj contribution of this head (accumulate; no lane concat)
        z = z + jnp.dot(ctx, wo[lo:lo + head_dim, :],
                        preferred_element_type=F32)                # (Bt, E)

    z_ref[...] = z + bz_ref[...]                                   # dense store


# --------------------------------------------------------------------------
# Wrapper
# --------------------------------------------------------------------------

def _pick_batch_tile(batch, seq_len, target=256):
    """Largest divisor bt of batch with bt*L <= target rows and bt*L % 8 == 0,
    preferring >= 2 grid steps (so both v7x TensorCores stay busy)."""
    cands = [bt for bt in range(1, batch + 1)
             if batch % bt == 0 and bt * seq_len <= target
             and (bt * seq_len) % 8 == 0]
    if not cands:
        return batch                     # single full-extent block (always legal)
    multi = [bt for bt in cands if batch // bt >= 2]
    return max(multi) if multi else max(cands)


def wae_attention_head_forward(h, params, *, n_head):
    """h: (B, C=64*s, H, W) NCHW float; returns (B, C)."""
    B, C, H, W = h.shape
    assert C % n_head == 0, (C, n_head)
    L = H * W
    d = C // n_head
    bt = _pick_batch_tile(B, L)
    M = bt * L

    # NCHW -> (B*L, C), matching h.permute(0, 2, 3, 1).reshape(B, H*W, C).
    x = jnp.transpose(h, (0, 2, 3, 1)).reshape(B * L, C).astype(F32)

    w_in = params["w_in"].astype(F32)                              # (3E, E)
    b_in = params["b_in"].astype(F32)                              # (3E,)
    w_out = params["w_out"].astype(F32)                            # (E, E)
    b_out = params["b_out"].astype(F32)                            # (E,)

    scale = 1.0 / math.sqrt(d)
    wq_t = w_in[:C].T * scale            # fold 1/sqrt(d) into the Q weights
    wk_t = w_in[C:2 * C].T
    wv_t = w_in[2 * C:].T
    w_qkv = jnp.concatenate([wq_t, wk_t, wv_t], axis=1)            # (E, 3E)

    bq = b_in[:C] * scale
    # bk is constant per query row -> cancels in softmax (dropped).
    # bv commutes with the attention weights (rows sum to 1) -> folded
    # through Wo into a single output bias bz together with b_out.
    b_qkv = jnp.concatenate([bq, jnp.zeros((2 * C,), F32)]).reshape(1, 3 * C)
    wo_t = w_out.T                                                 # (E, E)
    bz = (b_in[2 * C:] @ wo_t + b_out).reshape(1, C)               # (1, E)

    z = pl.pallas_call(
        functools.partial(_mha_mean_kernel, n_head=n_head, head_dim=d,
                          bt=bt, seq_len=L, embed=C),
        out_shape=jax.ShapeDtypeStruct((B, C), F32),
        grid=(B // bt,),
        in_specs=[
            pl.BlockSpec((M, C), lambda i: (i, 0)),        # x  (Bt*L rows / step)
            pl.BlockSpec((C, 3 * C), lambda i: (0, 0)),    # W_qkv (resident)
            pl.BlockSpec((1, 3 * C), lambda i: (0, 0)),    # b_qkv
            pl.BlockSpec((C, C), lambda i: (0, 0)),        # Wo
            pl.BlockSpec((1, C), lambda i: (0, 0)),        # bz
        ],
        out_specs=pl.BlockSpec((bt, C), lambda i: (i, 0)), # dense (Bt, E) store
        compiler_params=pltpu.CompilerParams(
            dimension_semantics=("parallel",)),
    )(x, w_qkv, b_qkv, wo_t, bz)

    return z


# --------------------------------------------------------------------------
# Pure-JAX reference (mirrors torch.nn.MultiheadAttention forward, q=k=v)
# --------------------------------------------------------------------------

def reference_forward(h, params, n_head):
    B, C, H, W = h.shape
    L = H * W
    d = C // n_head
    x = jnp.transpose(h, (0, 2, 3, 1)).reshape(B, L, C).astype(F32)

    qkv = x @ params["w_in"].astype(F32).T + params["b_in"].astype(F32)
    q, k, v = jnp.split(qkv, 3, axis=-1)

    def split_heads(t):
        return t.reshape(B, L, n_head, d).transpose(0, 2, 1, 3)    # (B, nh, L, d)

    q, k, v = map(split_heads, (q, k, v))
    s = jnp.einsum("bhld,bhmd->bhlm", q, k) / math.sqrt(d)
    p = jax.nn.softmax(s, axis=-1)
    ctx = jnp.einsum("bhlm,bhmd->bhld", p, v)
    ctx = ctx.transpose(0, 2, 1, 3).reshape(B, L, C)
    out = ctx @ params["w_out"].astype(F32).T + params["b_out"].astype(F32)
    return out.mean(axis=1)


# --------------------------------------------------------------------------
# Main
# --------------------------------------------------------------------------

if __name__ == "__main__":
    B = 16         # batch (tiled Bt=8 per grid step -> 2 steps, M=128 rows)
    S = 1          # WAENet width multiplier -> embed_dim = 64 * S
    H = W = 4      # spatial size of the encoder feature map (L = 16)
    N_HEAD = 4
    E = 64 * S

    key = jax.random.PRNGKey(0)
    k1, k2, k3, k4, kx = jax.random.split(key, 5)
    params = dict(
        w_in=(1.0 / math.sqrt(E)) * jax.random.normal(k1, (3 * E, E), F32),
        b_in=0.01 * jax.random.normal(k2, (3 * E,), F32),
        w_out=(1.0 / math.sqrt(E)) * jax.random.normal(k3, (E, E), F32),
        b_out=0.01 * jax.random.normal(k4, (E,), F32),
    )
    h = jax.random.normal(kx, (B, E, H, W), dtype=F32)

    fwd = jax.jit(functools.partial(wae_attention_head_forward, n_head=N_HEAD))
    z = jax.block_until_ready(fwd(h, params))

    z_ref = reference_forward(h, params, N_HEAD)

    assert z.shape == (B, E), z.shape
    assert bool(jnp.all(jnp.isfinite(z)))
    err = float(jnp.max(jnp.abs(z - z_ref)))
    # tolerance loosened slightly for the approx-reciprocal softmax denominator
    assert bool(jnp.allclose(z, z_ref, atol=2e-3, rtol=2e-3)), err
    print("KERNEL_OK")
</pallas_src>

<mosaic_0001>
module attributes {stable_mosaic.version = 11 : i64} {
  func.func @_mha_mean_kernel(%arg0: i32, %arg1: memref<128x64xf32, #tpu.memory_space<vmem>>, %arg2: memref<64x192xf32, #tpu.memory_space<vmem>>, %arg3: memref<1x192xf32, #tpu.memory_space<vmem>>, %arg4: memref<64x64xf32, #tpu.memory_space<vmem>>, %arg5: memref<1x64xf32, #tpu.memory_space<vmem>>, %arg6: memref<8x64xf32, #tpu.memory_space<vmem>>) attributes {dimension_semantics = [#tpu.dimension_semantics<parallel>], iteration_bounds = array<i64: 2>, scalar_prefetch = 0 : i64, scratch_operands = 0 : i64, tpu.core_type = #tpu.core_type<tc>, window_params = [{transform_indices = @transform_0, window_bounds = array<i64: 128, 64>}, {pipeline_mode = #tpu.pipeline_mode<synchronous>, transform_indices = @transform_1, window_bounds = array<i64: 64, 192>}, {pipeline_mode = #tpu.pipeline_mode<synchronous>, transform_indices = @transform_2, window_bounds = array<i64: 1, 192>}, {pipeline_mode = #tpu.pipeline_mode<synchronous>, transform_indices = @transform_3, window_bounds = array<i64: 64, 64>}, {pipeline_mode = #tpu.pipeline_mode<synchronous>, transform_indices = @transform_4, window_bounds = array<i64: 1, 64>}, {transform_indices = @transform_5, window_bounds = array<i64: 8, 64>}]} {
    %c0 = arith.constant 0 : index
    %c0_0 = arith.constant 0 : index
    %0 = vector.load %arg1[%c0, %c0_0] : memref<128x64xf32, #tpu.memory_space<vmem>>, vector<128x64xf32>
    %c0_1 = arith.constant 0 : index
    %c0_2 = arith.constant 0 : index
    %1 = vector.load %arg2[%c0_1, %c0_2] : memref<64x192xf32, #tpu.memory_space<vmem>>, vector<64x192xf32>
    %cst = arith.constant dense<0.000000e+00> : vector<128x192xf32>
    %2 = tpu.matmul %0, %1, %cst {dimension_numbers = #tpu.dot_dimension_numbers<[1], [0], [0], [1], [0, 0, 1, 1], [], []>} : vector<128x64xf32>, vector<64x192xf32>, vector<128x192xf32> -> vector<128x192xf32>
    %c0_3 = arith.constant 0 : index
    %c0_4 = arith.constant 0 : index
    %3 = vector.load %arg3[%c0_3, %c0_4] : memref<1x192xf32, #tpu.memory_space<vmem>>, vector<1x192xf32>
    %4 = vector.broadcast %3 : vector<1x192xf32> to vector<128x192xf32>
    %5 = arith.addf %2, %4 : vector<128x192xf32>
    %6 = vector.shape_cast %5 : vector<128x192xf32> to vector<8x16x192xf32>
    %c0_5 = arith.constant 0 : index
    %c0_6 = arith.constant 0 : index
    %7 = vector.load %arg4[%c0_5, %c0_6] : memref<64x64xf32, #tpu.memory_space<vmem>>, vector<64x64xf32>
    %cst_7 = arith.constant 0.000000e+00 : f32
    %8 = vector.broadcast %cst_7 : f32 to vector<8x64xf32>
    %9 = vector.extract_strided_slice %6 {offsets = [0, 0, 0], sizes = [8, 16, 16], strides = [1, 1, 1]} : vector<8x16x192xf32> to vector<8x16x16xf32>
    %10 = vector.extract_strided_slice %6 {offsets = [0, 0, 64], sizes = [8, 16, 16], strides = [1, 1, 1]} : vector<8x16x192xf32> to vector<8x16x16xf32>
    %11 = vector.extract_strided_slice %6 {offsets = [0, 0, 128], sizes = [8, 16, 16], strides = [1, 1, 1]} : vector<8x16x192xf32> to vector<8x16x16xf32>
    "tpu.trace_start"() <{level = 10 : i32, message = "bqd,bkd->bqk"}> : () -> ()
    %cst_8 = arith.constant dense<0.000000e+00> : vector<8x16x16xf32>
    %12 = tpu.matmul %9, %10, %cst_8 {dimension_numbers = #tpu.dot_dimension_numbers<[2], [2], [1], [1], [0, 0, 0, 1, 1, 1], [0], [0]>} : vector<8x16x16xf32>, vector<8x16x16xf32>, vector<8x16x16xf32> -> vector<8x16x16xf32>
    "tpu.trace_stop"() : () -> ()
    %cst_9 = arith.constant dense<0xFF800000> : vector<8x16xf32>
    %13 = vector.multi_reduction <maximumf>, %12, %cst_9 [2] : vector<8x16x16xf32> to vector<8x16xf32>
    %14 = vector.shape_cast %13 : vector<8x16xf32> to vector<8x16x1xf32>
    %15 = vector.broadcast %14 : vector<8x16x1xf32> to vector<8x16x16xf32>
    %16 = arith.subf %12, %15 : vector<8x16x16xf32>
    %17 = math.exp %16 : vector<8x16x16xf32>
    %cst_10 = arith.constant dense<0.000000e+00> : vector<8x16xf32>
    %18 = vector.multi_reduction <add>, %17, %cst_10 [2] : vector<8x16x16xf32> to vector<8x16xf32>
    %19 = vector.shape_cast %18 : vector<8x16xf32> to vector<8x16x1xf32>
    %20 = tpu.reciprocal %19 {approx = true} : vector<8x16x1xf32> -> vector<8x16x1xf32>
    %21 = vector.broadcast %20 : vector<8x16x1xf32> to vector<8x16x16xf32>
    %22 = arith.mulf %17, %21 : vector<8x16x16xf32>
    %cst_11 = arith.constant dense<0.000000e+00> : vector<8x16xf32>
    %23 = vector.multi_reduction <add>, %22, %cst_11 [1] : vector<8x16x16xf32> to vector<8x16xf32>
    %cst_12 = arith.constant 1.600000e+01 : f32
    %24 = vector.broadcast %cst_12 : f32 to vector<8x16xf32>
    %25 = arith.divf %23, %24 : vector<8x16xf32>
    %26 = vector.shape_cast %25 : vector<8x16xf32> to vector<8x16x1xf32>
    %27 = vector.broadcast %26 : vector<8x16x1xf32> to vector<8x16x16xf32>
    %28 = arith.mulf %27, %11 : vector<8x16x16xf32>
    %cst_13 = arith.constant dense<0.000000e+00> : vector<8x16xf32>
    %29 = vector.multi_reduction <add>, %28, %cst_13 [1] : vector<8x16x16xf32> to vector<8x16xf32>
    %30 = vector.extract_strided_slice %7 {offsets = [0, 0], sizes = [16, 64], strides = [1, 1]} : vector<64x64xf32> to vector<16x64xf32>
    %cst_14 = arith.constant dense<0.000000e+00> : vector<8x64xf32>
    %31 = tpu.matmul %29, %30, %cst_14 {dimension_numbers = #tpu.dot_dimension_numbers<[1], [0], [0], [1], [0, 0, 1, 1], [], []>} : vector<8x16xf32>, vector<16x64xf32>, vector<8x64xf32> -> vector<8x64xf32>
    %32 = arith.addf %8, %31 : vector<8x64xf32>
    %33 = vector.extract_strided_slice %6 {offsets = [0, 0, 16], sizes = [8, 16, 16], strides = [1, 1, 1]} : vector<8x16x192xf32> to vector<8x16x16xf32>
    %34 = vector.extract_strided_slice %6 {offsets = [0, 0, 80], sizes = [8, 16, 16], strides = [1, 1, 1]} : vector<8x16x192xf32> to vector<8x16x16xf32>
    %35 = vector.extract_strided_slice %6 {offsets = [0, 0, 144], sizes = [8, 16, 16], strides = [1, 1, 1]} : vector<8x16x192xf32> to vector<8x16x16xf32>
    "tpu.trace_start"() <{level = 10 : i32, message = "bqd,bkd->bqk"}> : () -> ()
    %cst_15 = arith.constant dense<0.000000e+00> : vector<8x16x16xf32>
    %36 = tpu.matmul %33, %34, %cst_15 {dimension_numbers = #tpu.dot_dimension_numbers<[2], [2], [1], [1], [0, 0, 0, 1, 1, 1], [0], [0]>} : vector<8x16x16xf32>, vector<8x16x16xf32>, vector<8x16x16xf32> -> vector<8x16x16xf32>
    "tpu.trace_stop"() : () -> ()
    %cst_16 = arith.constant dense<0xFF800000> : vector<8x16xf32>
    %37 = vector.multi_reduction <maximumf>, %36, %cst_16 [2] : vector<8x16x16xf32> to vector<8x16xf32>
    %38 = vector.shape_cast %37 : vector<8x16xf32> to vector<8x16x1xf32>
    %39 = vector.broadcast %38 : vector<8x16x1xf32> to vector<8x16x16xf32>
    %40 = arith.subf %36, %39 : vector<8x16x16xf32>
    %41 = math.exp %40 : vector<8x16x16xf32>
    %cst_17 = arith.constant dense<0.000000e+00> : vector<8x16xf32>
    %42 = vector.multi_reduction <add>, %41, %cst_17 [2] : vector<8x16x16xf32> to vector<8x16xf32>
    %43 = vector.shape_cast %42 : vector<8x16xf32> to vector<8x16x1xf32>
    %44 = tpu.reciprocal %43 {approx = true} : vector<8x16x1xf32> -> vector<8x16x1xf32>
    %45 = vector.broadcast %44 : vector<8x16x1xf32> to vector<8x16x16xf32>
    %46 = arith.mulf %41, %45 : vector<8x16x16xf32>
    %cst_18 = arith.constant dense<0.000000e+00> : vector<8x16xf32>
    %47 = vector.multi_reduction <add>, %46, %cst_18 [1] : vector<8x16x16xf32> to vector<8x16xf32>
    %cst_19 = arith.constant 1.600000e+01 : f32
    %48 = vector.broadcast %cst_19 : f32 to vector<8x16xf32>
    %49 = arith.divf %47, %48 : vector<8x16xf32>
    %50 = vector.shape_cast %49 : vector<8x16xf32> to vector<8x16x1xf32>
    %51 = vector.broadcast %50 : vector<8x16x1xf32> to vector<8x16x16xf32>
    %52 = arith.mulf %51, %35 : vector<8x16x16xf32>
    %cst_20 = arith.constant dense<0.000000e+00> : vector<8x16xf32>
    %53 = vector.multi_reduction <add>, %52, %cst_20 [1] : vector<8x16x16xf32> to vector<8x16xf32>
    %54 = vector.extract_strided_slice %7 {offsets = [16, 0], sizes = [16, 64], strides = [1, 1]} : vector<64x64xf32> to vector<16x64xf32>
    %cst_21 = arith.constant dense<0.000000e+00> : vector<8x64xf32>
    %55 = tpu.matmul %53, %54, %cst_21 {dimension_numbers = #tpu.dot_dimension_numbers<[1], [0], [0], [1], [0, 0, 1, 1], [], []>} : vector<8x16xf32>, vector<16x64xf32>, vector<8x64xf32> -> vector<8x64xf32>
    %56 = arith.addf %32, %55 : vector<8x64xf32>
    %57 = vector.extract_strided_slice %6 {offsets = [0, 0, 32], sizes = [8, 16, 16], strides = [1, 1, 1]} : vector<8x16x192xf32> to vector<8x16x16xf32>
    %58 = vector.extract_strided_slice %6 {offsets = [0, 0, 96], sizes = [8, 16, 16], strides = [1, 1, 1]} : vector<8x16x192xf32> to vector<8x16x16xf32>
    %59 = vector.extract_strided_slice %6 {offsets = [0, 0, 160], sizes = [8, 16, 16], strides = [1, 1, 1]} : vector<8x16x192xf32> to vector<8x16x16xf32>
    "tpu.trace_start"() <{level = 10 : i32, message = "bqd,bkd->bqk"}> : () -> ()
    %cst_22 = arith.constant dense<0.000000e+00> : vector<8x16x16xf32>
    %60 = tpu.matmul %57, %58, %cst_22 {dimension_numbers = #tpu.dot_dimension_numbers<[2], [2], [1], [1], [0, 0, 0, 1, 1, 1], [0], [0]>} : vector<8x16x16xf32>, vector<8x16x16xf32>, vector<8x16x16xf32> -> vector<8x16x16xf32>
    "tpu.trace_stop"() : () -> ()
    %cst_23 = arith.constant dense<0xFF800000> : vector<8x16xf32>
    %61 = vector.multi_reduction <maximumf>, %60, %cst_23 [2] : vector<8x16x16xf32> to vector<8x16xf32>
    %62 = vector.shape_cast %61 : vector<8x16xf32> to vector<8x16x1xf32>
    %63 = vector.broadcast %62 : vector<8x16x1xf32> to vector<8x16x16xf32>
    %64 = arith.subf %60, %63 : vector<8x16x16xf32>
    %65 = math.exp %64 : vector<8x16x16xf32>
    %cst_24 = arith.constant dense<0.000000e+00> : vector<8x16xf32>
    %66 = vector.multi_reduction <add>, %65, %cst_24 [2] : vector<8x16x16xf32> to vector<8x16xf32>
    %67 = vector.shape_cast %66 : vector<8x16xf32> to vector<8x16x1xf32>
    %68 = tpu.reciprocal %67 {approx = true} : vector<8x16x1xf32> -> vector<8x16x1xf32>
    %69 = vector.broadcast %68 : vector<8x16x1xf32> to vector<8x16x16xf32>
    %70 = arith.mulf %65, %69 : vector<8x16x16xf32>
    %cst_25 = arith.constant dense<0.000000e+00> : vector<8x16xf32>
    %71 = vector.multi_reduction <add>, %70, %cst_25 [1] : vector<8x16x16xf32> to vector<8x16xf32>
    %cst_26 = arith.constant 1.600000e+01 : f32
    %72 = vector.broadcast %cst_26 : f32 to vector<8x16xf32>
    %73 = arith.divf %71, %72 : vector<8x16xf32>
    %74 = vector.shape_cast %73 : vector<8x16xf32> to vector<8x16x1xf32>
    %75 = vector.broadcast %74 : vector<8x16x1xf32> to vector<8x16x16xf32>
    %76 = arith.mulf %75, %59 : vector<8x16x16xf32>
    %cst_27 = arith.constant dense<0.000000e+00> : vector<8x16xf32>
    %77 = vector.multi_reduction <add>, %76, %cst_27 [1] : vector<8x16x16xf32> to vector<8x16xf32>
    %78 = vector.extract_strided_slice %7 {offsets = [32, 0], sizes = [16, 64], strides = [1, 1]} : vector<64x64xf32> to vector<16x64xf32>
    %cst_28 = arith.constant dense<0.000000e+00> : vector<8x64xf32>
    %79 = tpu.matmul %77, %78, %cst_28 {dimension_numbers = #tpu.dot_dimension_numbers<[1], [0], [0], [1], [0, 0, 1, 1], [], []>} : vector<8x16xf32>, vector<16x64xf32>, vector<8x64xf32> -> vector<8x64xf32>
    %80 = arith.addf %56, %79 : vector<8x64xf32>
    %81 = vector.extract_strided_slice %6 {offsets = [0, 0, 48], sizes = [8, 16, 16], strides = [1, 1, 1]} : vector<8x16x192xf32> to vector<8x16x16xf32>
    %82 = vector.extract_strided_slice %6 {offsets = [0, 0, 112], sizes = [8, 16, 16], strides = [1, 1, 1]} : vector<8x16x192xf32> to vector<8x16x16xf32>
    %83 = vector.extract_strided_slice %6 {offsets = [0, 0, 176], sizes = [8, 16, 16], strides = [1, 1, 1]} : vector<8x16x192xf32> to vector<8x16x16xf32>
    "tpu.trace_start"() <{level = 10 : i32, message = "bqd,bkd->bqk"}> : () -> ()
    %cst_29 = arith.constant dense<0.000000e+00> : vector<8x16x16xf32>
    %84 = tpu.matmul %81, %82, %cst_29 {dimension_numbers = #tpu.dot_dimension_numbers<[2], [2], [1], [1], [0, 0, 0, 1, 1, 1], [0], [0]>} : vector<8x16x16xf32>, vector<8x16x16xf32>, vector<8x16x16xf32> -> vector<8x16x16xf32>
    "tpu.trace_stop"() : () -> ()
    %cst_30 = arith.constant dense<0xFF800000> : vector<8x16xf32>
    %85 = vector.multi_reduction <maximumf>, %84, %cst_30 [2] : vector<8x16x16xf32> to vector<8x16xf32>
    %86 = vector.shape_cast %85 : vector<8x16xf32> to vector<8x16x1xf32>
    %87 = vector.broadcast %86 : vector<8x16x1xf32> to vector<8x16x16xf32>
    %88 = arith.subf %84, %87 : vector<8x16x16xf32>
    %89 = math.exp %88 : vector<8x16x16xf32>
    %cst_31 = arith.constant dense<0.000000e+00> : vector<8x16xf32>
    %90 = vector.multi_reduction <add>, %89, %cst_31 [2] : vector<8x16x16xf32> to vector<8x16xf32>
    %91 = vector.shape_cast %90 : vector<8x16xf32> to vector<8x16x1xf32>
    %92 = tpu.reciprocal %91 {approx = true} : vector<8x16x1xf32> -> vector<8x16x1xf32>
    %93 = vector.broadcast %92 : vector<8x16x1xf32> to vector<8x16x16xf32>
    %94 = arith.mulf %89, %93 : vector<8x16x16xf32>
    %cst_32 = arith.constant dense<0.000000e+00> : vector<8x16xf32>
    %95 = vector.multi_reduction <add>, %94, %cst_32 [1] : vector<8x16x16xf32> to vector<8x16xf32>
    %cst_33 = arith.constant 1.600000e+01 : f32
    %96 = vector.broadcast %cst_33 : f32 to vector<8x16xf32>
    %97 = arith.divf %95, %96 : vector<8x16xf32>
    %98 = vector.shape_cast %97 : vector<8x16xf32> to vector<8x16x1xf32>
    %99 = vector.broadcast %98 : vector<8x16x1xf32> to vector<8x16x16xf32>
    %100 = arith.mulf %99, %83 : vector<8x16x16xf32>
    %cst_34 = arith.constant dense<0.000000e+00> : vector<8x16xf32>
    %101 = vector.multi_reduction <add>, %100, %cst_34 [1] : vector<8x16x16xf32> to vector<8x16xf32>
    %102 = vector.extract_strided_slice %7 {offsets = [48, 0], sizes = [16, 64], strides = [1, 1]} : vector<64x64xf32> to vector<16x64xf32>
    %cst_35 = arith.constant dense<0.000000e+00> : vector<8x64xf32>
    %103 = tpu.matmul %101, %102, %cst_35 {dimension_numbers = #tpu.dot_dimension_numbers<[1], [0], [0], [1], [0, 0, 1, 1], [], []>} : vector<8x16xf32>, vector<16x64xf32>, vector<8x64xf32> -> vector<8x64xf32>
    %104 = arith.addf %80, %103 : vector<8x64xf32>
    %c0_36 = arith.constant 0 : index
    %c0_37 = arith.constant 0 : index
    %105 = vector.load %arg5[%c0_36, %c0_37] : memref<1x64xf32, #tpu.memory_space<vmem>>, vector<1x64xf32>
    %106 = vector.broadcast %105 : vector<1x64xf32> to vector<8x64xf32>
    %107 = arith.addf %104, %106 : vector<8x64xf32>
    %c0_38 = arith.constant 0 : index
    %c0_39 = arith.constant 0 : index
    %108 = vector.load %arg6[%c0_38, %c0_39] : memref<8x64xf32, #tpu.memory_space<vmem>>, vector<8x64xf32>
    tpu.vector_store %arg6[%c0_38, %c0_39], %107 {strides = array<i32>} : memref<8x64xf32, #tpu.memory_space<vmem>>, vector<8x64xf32>,
    return
  }
  func.func @transform_0(%arg0: i32) -> (i32, i32) {
    %c0_i32 = arith.constant 0 : i32
    %c0_i32_0 = arith.constant 0 : i32
    return %arg0, %c0_i32 : i32, i32
  }
  func.func @transform_1(%arg0: i32) -> (i32, i32) {
    %c0_i32 = arith.constant 0 : i32
    %c0_i32_0 = arith.constant 0 : i32
    %c0_i32_1 = arith.constant 0 : i32
    return %c0_i32, %c0_i32_0 : i32, i32
  }
  func.func @transform_2(%arg0: i32) -> (i32, i32) {
    %c0_i32 = arith.constant 0 : i32
    %c0_i32_0 = arith.constant 0 : i32
    %c0_i32_1 = arith.constant 0 : i32
    return %c0_i32, %c0_i32_0 : i32, i32
  }
  func.func @transform_3(%arg0: i32) -> (i32, i32) {
    %c0_i32 = arith.constant 0 : i32
    %c0_i32_0 = arith.constant 0 : i32
    %c0_i32_1 = arith.constant 0 : i32
    return %c0_i32, %c0_i32_0 : i32, i32
  }
  func.func @transform_4(%arg0: i32) -> (i32, i32) {
    %c0_i32 = arith.constant 0 : i32
    %c0_i32_0 = arith.constant 0 : i32
    %c0_i32_1 = arith.constant 0 : i32
    return %c0_i32, %c0_i32_0 : i32, i32
  }
  func.func @transform_5(%arg0: i32) -> (i32, i32) {
    %c0_i32 = arith.constant 0 : i32
    %c0_i32_0 = arith.constant 0 : i32
    return %arg0, %c0_i32 : i32, i32
  }
}

</mosaic_0001>

<bundles_post_ra>
// kernel: wae_attention_head_forward.1
= control target key start
LH: loop header
LB: loop body
LE: loop exit
PB: predicated region body
PF: predicated region fallthrough
CT: control target
= control target key end

     0   :  { %10 = vsyncpa [#allocation3], 0  ;;  %s6117_s0 = inlined_call_operand.vmem [shape: f32[256,64], index: 0, kind: input, shape index: {}]   ;;  %s6118_s1 = inlined_call_operand.vmem [shape: f32[64,192], index: 1, kind: input, shape index: {}]   ;;  %s6119_s2 = inlined_call_operand.vmem [shape: f32[1,192], index: 2, kind: input, shape index: {}]   ;;  %s6120_s3 = inlined_call_operand.vmem [shape: f32[64,64], index: 3, kind: input, shape index: {}]   ;;  %s6121_s4 = inlined_call_operand.vmem [shape: f32[1,64], index: 4, kind: input, shape index: {}]   ;;  %s6122_s5 = inlined_call_operand.hbm [shape: f32[16,64], index: 5, kind: output, shape index: {}]  }
   0x1   :  { %12 = vsyncpa [#allocation3 + $0x1], 0  ;;  %s4321_s18 = smov 0   ;;  %s4323_s19 = smov 0  }
   0x2   :  { %s4325_s20 = smov 0   ;;  %s4327_s21 = smov 0  }
   0x3 LB: > { %s4342_s22 = sadd.s32 4294967295, %s4281_s21   ;;  %s3697_s23 = sadd.s32 4294967294, %s4281_s21   ;;  %s4281_s21 = sphi %s4327_s21, %s6205_s21   ;;  %s4277_s20 = sphi %s4325_s20, %s6204_s20   ;;  %s4273_s19 = sphi %s4323_s19, %s6203_s19   ;;  %s4269_s18 = sphi %s4321_s18, %s6202_s18  }
   0x4   : > { %s4346_s24 = sadd.s32 1, %s4281_s21   ;;  %s135_s25 = sadd.s32 1, %s4277_s20 }
   0x5   : > { %s132_s26 = ssub.s32 %s4281_s21, %s4346_s24  ;;  %p145_p0 = scmp.ne.s32.totalorder %s4277_s20, %s4273_s19 }
   0x6   : > { %p133_p1 = scmp.eq.s32.totalorder %s132_s26, 0  ;;  %p146_p2 = scmp.eq.s32.totalorder %s4342_s22, 1 }
   0x7   : > { %p151_p3 = scmp.ne.s32.totalorder %s4273_s19, %s4269_s18  ;;  %p152_p4 = scmp.eq.s32.totalorder %s3697_s23, 1 }
   0x8   : > { %s4357_s27 = scalar_select %p133_p1, %s4277_s20, %s135_s25  }
   0x9   : > { %p4359_p5 = por %p146_p2, %p145_p0  ;;  %p4363_p6 = por %p152_p4, %p151_p3 }
   0xa   : > { %p3700_p7 = scmp.ge.s32.totalorder %s4281_s21, 1  ;;  %p191_p8 = scmp.lt.s32.totalorder %s4281_s21, 3 }
   0xc   : > { %p192_p9 = pnand %p3700_p7, %p191_p8 }
   0xe   : > { %195 = sbr.rel (%p192_p9) target bundleno = 3076 (0xc04), region = 40 }
  0x13   : > { %v255_v0 = vld [vmem:[%s6118_s1 + $0x70] sm:$0xff]  ;;  %v253_v1 = vld [vmem:[%s6118_s1 + $0x60] sm:$0xff]  ;;  %s3702_s9 = sshll.u32 %s4342_s22, 4  ;;  %vm263_vm0 = vcmask 523264   ;;  %s4283_s12 = smov 112   ;;  %vm456_vm1 = vcmask 130048  }
  0x14   : > { %320 = vmatpush.msra.mxu0 %v255_v0  ;;  %p220_p10 = scmp.lt.s32.totalorder %s3702_s9, 31  ;;  %v251_v2 = vld [vmem:[%s6118_s1 + $0x50] sm:$0xff]  ;;  %v249_v3 = vld [vmem:[%s6118_s1 + $0x40] sm:$0xff]  ;;  %s4284_s13 = smov 48   ;;  %vm1874_vm3 = vcmask 261248   ;;  %vm1955_vm4 = vcmask 1041409  }
  0x15   : > { %v247_v4 = vld [vmem:[%s6118_s1 + $0x30] sm:$0xff]  ;;  %v245_v5 = vld [vmem:[%s6118_s1 + $0x20] sm:$0xff]  ;;  %s4285_s14 = smov 64   ;;  %s4288_s17 = smov 96   ;;  %vm1957_vm5 = vcmask 1042434   ;;  %vm1959_vm6 = vcmask 1043459  }
  0x16   : > { %321 = vmatpush.msra.mxu0 %v253_v1  ;;  %s6207_s9 = smov (!%p220_p10, %s3702_s9), 31  ;;  %v243_v6 = vld [vmem:[%s6118_s1 + $0x10] sm:$0xff]  ;;  %v241_v7 = vld [vmem:[%s6118_s1] sm:$0xff]  ;;  %vm1961_vm7 = vcmask 1044484   ;;  %vm1963_vm8 = vcmask 1045509   ;;  %vm1965_vm9 = vcmask 1046534  }
  0x17   : > { %s3703_s16 = sshll.u32 %s6207_s9, 3  ;;  %v257_v24 = vld [vmem:[%s6119_s2] sm:$0x3]  ;;  %vm1967_vm10 = vcmask 1047559   ;;  %vm2710_vm11 = vcmask 392448   ;;  %vm3503_vm12 = vcmask 523648  }
  0x18   : > { %322 = vmatpush.msra.mxu0 %v251_v2  ;;  %s4394_s7 = scalar_lea.vmem %s6117_s0, %s3703_s16  ;;  %v4452_v25 = vperm.slane %v257_v24, 0  ;;  %s216_s6 = sand.u32 1, %s4273_s19  }
  0x19   : > { %v4400_v8 = vld [vmem:[%s4394_s7] sm:$0xff]  ;;  %v4405_v9 = vld [vmem:[%s4394_s7 + $0x8] sm:$0xff]  ;;  %v4410_v10 = vld [vmem:[%s4394_s7 + $0x10] sm:$0xff]  ;;  %s3701_s8 = sshll.u32 %s216_s6, 3  ;;  %s3869_s9 = sshll.u32 %s4342_s22, 3 }
  0x1a   : > { %323 = vmatpush.msra.mxu0 %v249_v3  ;;  %v4415_v11 = vld [vmem:[%s4394_s7 + $0x18] sm:$0xff]  ;;  %v4420_v12 = vld [vmem:[%s4394_s7 + $0x20] sm:$0xff]  ;;  %v4425_v13 = vld [vmem:[%s4394_s7 + $0x28] sm:$0xff]  ;;  %s218_s16 = scalar_lea.vmem [#allocation2], %s3701_s8  ;;  %s3623_s22 = scalar_lea.sflag [#allocation3], %s216_s6 }
  0x1b   : > { %v231_v14 = vld [vmem:[%s4394_s7 + $0x30] sm:$0xff]  ;;  %v232_v15 = vld [vmem:[%s4394_s7 + $0x38] sm:$0xff]  ;;  %v233_v16 = vld [vmem:[%s4394_s7 + $0x40] sm:$0xff]  ;;  %s4239_s30 = scalar_lea.hbm %s6122_s5, 16 }
  0x1c   : > { %324 = vmatpush.msra.mxu0 %v247_v4  ;;  %v234_v17 = vld [vmem:[%s4394_s7 + $0x48] sm:$0xff]  ;;  %v235_v18 = vld [vmem:[%s4394_s7 + $0x50] sm:$0xff]  ;;  %v236_v19 = vld [vmem:[%s4394_s7 + $0x58] sm:$0xff] }
  0x1d   : > { %v237_v20 = vld [vmem:[%s4394_s7 + $0x60] sm:$0xff]  ;;  %v238_v21 = vld [vmem:[%s4394_s7 + $0x68] sm:$0xff]  ;;  %v239_v22 = vld [vmem:[%s4394_s7 + $0x70] sm:$0xff] }
  0x1e   : > { %325 = vmatpush.msra.mxu0 %v245_v5  ;;  %v240_v23 = vld [vmem:[%s4394_s7 + $0x78] sm:$0xff] }
  0x20   : > { %326 = vmatpush.msra.mxu0 %v243_v6 }
  0x22   : > { %327 = vmatpush.msra.mxu0 %v241_v7 }
  0x23   : > { %3704 = vmatmul.msk.f32.vlgmr.msra.gmra.mxu0 %vm263_vm0, %v4400_v8 }
  0x2b   : > { %3705 = vmatmul.msk.f32.gmra.mxu0 %vm263_vm0, %v4405_v9 }
  0x33   : > { %3706 = vmatmul.msk.f32.gmra.mxu0 %vm263_vm0, %v4410_v10 }
  0x3b   : > { %3707 = vmatmul.msk.f32.gmra.mxu0 %vm263_vm0, %v4415_v11 }
  0x43   : > { %3708 = vmatmul.msk.f32.gmra.mxu0 %vm263_vm0, %v4420_v12 }
  0x4b   : > { %3709 = vmatmul.msk.f32.gmra.mxu0 %vm263_vm0, %v4425_v13 }
  0x53   : > { %3710 = vmatmul.msk.f32.gmra.mxu0 %vm263_vm0, %v231_v14 }
  0x5b   : > { %3711 = vmatmul.msk.f32.gmra.mxu0 %vm263_vm0, %v232_v15 }
  0x63   : > { %3712 = vmatmul.msk.f32.gmra.mxu0 %vm263_vm0, %v233_v16 }
  0x6b   : > { %3713 = vmatmul.msk.f32.gmra.mxu0 %vm263_vm0, %v234_v17 }
  0x73   : > { %3714 = vmatmul.msk.f32.gmra.mxu0 %vm263_vm0, %v235_v18 }
  0x7b   : > { %3715 = vmatmul.msk.f32.gmra.mxu0 %vm263_vm0, %v236_v19 }
  0x83   : > { %3716 = vmatmul.msk.f32.gmra.mxu0 %vm263_vm0, %v237_v20 }
  0x8b   : > { %3717 = vmatmul.msk.f32.gmra.mxu0 %vm263_vm0, %v238_v21 }
  0x93   : > { %3718 = vmatmul.msk.f32.gmra.mxu0 %vm263_vm0, %v239_v22 }
  0x9b   : > { %3719 = vmatmul.msk.f32.gmra.mxu0 %vm263_vm0, %v240_v23 }
  0xa0   : > { %v329_v26 = vpop.f32.mrf.mxu0 }
  0xa1   : > { %v4455_v27 = vadd.f32 %v329_v26, %v4452_v25 }
  0xa3   : > { %1194 = vrot.lane.b32.xlu2 %v4455_v27, %s4283_s12  ;;  %1198 = vrot.lane.b32.xlu0 %v4455_v27, %s4284_s13 }
  0xa4   : > { %452 = vrot.lane.b32.xlu1 %v4455_v27, %s4285_s14 }
  0xa8   : > { %v332_v28 = vpop.f32.mrf.mxu0 }
  0xa9   : > { %v4464_v29 = vadd.f32 %v332_v28, %v4452_v25 }
  0xab   : > { %454 = vrot.lane.b32.xlu0 %v4464_v29, %s4285_s14 }
  0xac   : > { %1200 = vrot.lane.b32.xlu1 %v4464_v29, %s4284_s13 }
  0xb0   : > { %v335_v30 = vpop.f32.mrf.mxu0 }
  0xb1   : > { %v4471_v31 = vadd.f32 %v335_v30, %v4452_v25 }
  0xb3   : > { %1233 = vrot.lane.b32.xlu0 %v4471_v31, %s4283_s12 }
  0xb4   : > { %1196 = vrot.lane.b32.xlu1 %v4464_v29, %s4283_s12 }
  0xb8   : > { %v338_v32 = vpop.f32.mrf.mxu0 }
  0xb9   : > { %v4478_v33 = vadd.f32 %v338_v32, %v4452_v25 }
  0xbb   : > { %1239 = vrot.lane.b32.xlu2 %v4478_v33, %s4284_s13  ;;  %492 = vrot.lane.b32.xlu0 %v4478_v33, %s4285_s14 }
  0xbc   : > { %490 = vrot.lane.b32.xlu1 %v4471_v31, %s4285_s14 }
  0xc0   : > { %v341_v34 = vpop.f32.mrf.mxu0 }
  0xc1   : > { %v4487_v35 = vadd.f32 %v341_v34, %v4452_v25 }
  0xc3   : > { %6163 = vst [vmem:[#allocation5_spill] sm:$0xff] %v4487_v35  ;;  %1235 = vrot.lane.b32.xlu2 %v4478_v33, %s4283_s12  ;;  %527 = vrot.lane.b32.xlu0 %v4487_v35, %s4285_s14 }
  0xc4   : > { %1237 = vrot.lane.b32.xlu1 %v4471_v31, %s4284_s13 }
  0xc8   : > { %v344_v36 = vpop.f32.mrf.mxu0 }
  0xc9   : > { %v4496_v37 = vadd.f32 %v344_v36, %v4452_v25 }
  0xcb   : > { %6164 = vst [vmem:[#allocation6_spill] sm:$0xff] %v4496_v37  ;;  %1276 = vrot.lane.b32.xlu2 %v4487_v35, %s4284_s13  ;;  %1278 = vrot.lane.b32.xlu0 %v4496_v37, %s4284_s13 }
  0xcc   : > { %1272 = vrot.lane.b32.xlu1 %v4487_v35, %s4283_s12 }
  0xd0   : > { %v347_v38 = vpop.f32.mrf.mxu0 }
  0xd1   : > { %v4505_v39 = vadd.f32 %v347_v38, %v4452_v25 }
  0xd3   : > { %6165 = vst [vmem:[#allocation7_spill] sm:$0xff] %v4505_v39  ;;  %529 = vrot.lane.b32.xlu2 %v4496_v37, %s4285_s14  ;;  %1274 = vrot.lane.b32.xlu0 %v4496_v37, %s4283_s12 }
  0xd4   : > { %564 = vrot.lane.b32.xlu1 %v4505_v39, %s4285_s14 }
  0xd8   : > { %v350_v40 = vpop.f32.mrf.mxu0 }
  0xd9   : > { %v4514_v41 = vadd.f32 %v350_v40, %v4452_v25 }
  0xdb   : > { %1311 = vrot.lane.b32.xlu2 %v4505_v39, %s4283_s12  ;;  %1315 = vrot.lane.b32.xlu0 %v4505_v39, %s4284_s13 }
  0xdc   : > { %1317 = vrot.lane.b32.xlu1 %v4514_v41, %s4284_s13 }
  0xe0   : > { %v353_v42 = vpop.f32.mrf.mxu0 }
  0xe1   : > { %v4530_v45 = vadd.f32 %v353_v42, %v4452_v25 }
  0xe3   : > { %566 = vrot.lane.b32.xlu2 %v4514_v41, %s4285_s14  ;;  %6167 = vst [vmem:[#allocation9_spill] sm:$0xff] %v4530_v45 }
  0xe4   : > { %1313 = vrot.lane.b32.xlu1 %v4514_v41, %s4283_s12 }
  0xe8   : > { %v356_v43 = vpop.f32.mrf.mxu0 }
  0xe9   : > { %v4527_v44 = vadd.f32 %v356_v43, %v4452_v25 }
  0xeb   : > { %6166 = vst [vmem:[#allocation8_spill] sm:$0xff] %v4527_v44  ;;  %603 = vrot.lane.b32.xlu2 %v4527_v44, %s4285_s14 }
  0xec   : > { %601 = vrot.lane.b32.xlu1 %v4530_v45, %s4285_s14 }
  0xf0   : > { %v359_v46 = vpop.f32.mrf.mxu0 }
  0xf1   : > { %v4541_v48 = vadd.f32 %v359_v46, %v4452_v25 }
  0xf3   : > { %1356 = vrot.lane.b32.xlu2 %v4527_v44, %s4284_s13 }
  0xf4   : > { %1354 = vrot.lane.b32.xlu1 %v4530_v45, %s4284_s13 }
  0xf8   : > { %v362_v47 = vpop.f32.mrf.mxu0 }
  0xf9   : > { %v4544_v49 = vadd.f32 %v362_v47, %v4452_v25 }
  0xfb   : > { %6168 = vst [vmem:[#allocation10_spill] sm:$0xff] %v4544_v49  ;;  %638 = vrot.lane.b32.xlu2 %v4541_v48, %s4285_s14  ;;  %640 = vrot.lane.b32.xlu0 %v4544_v49, %s4285_s14 }
  0xfc   : > { %1389 = vrot.lane.b32.xlu1 %v4541_v48, %s4283_s12 }
  0xfd   : > { %v4566_v54 = vpop.permute.xlu2 %1194 }
 0x100   : > { %v365_v50 = vpop.f32.mrf.mxu0 }
 0x101   : > { %v4553_v51 = vadd.f32 %v365_v50, %v4452_v25 }
 0x103   : > { %6169 = vst [vmem:[#allocation11_spill] sm:$0xff] %v4553_v51  ;;  %675 = vrot.lane.b32.xlu2 %v4553_v51, %s4285_s14 }
 0x108   : > { %v368_v52 = vpop.f32.mrf.mxu0 }
 0x109   : > { %v4558_v53 = vadd.f32 %v368_v52, %v4452_v25 }
 0x10b   : > { %1393 = vrot.lane.b32.xlu2 %v4541_v48, %s4284_s13  ;;  %677 = vrot.lane.b32.xlu0 %v4558_v53, %s4285_s14 }
 0x10c   : > { %1434 = vrot.lane.b32.xlu1 %v4558_v53, %s4284_s13 }
 0x110   : > { %v371_v55 = vpop.f32.mrf.mxu0 }
 0x111   : > { %v4569_v56 = vadd.f32 %v371_v55, %v4452_v25 }
 0x113   : > { %6170 = vst [vmem:[#allocation12_spill] sm:$0xff] %v4569_v56  ;;  %1352 = vrot.lane.b32.xlu2 %v4527_v44, %s4283_s12  ;;  %712 = vrot.lane.b32.xlu0 %v4569_v56, %s4285_s14 }
 0x114   : > { %1430 = vrot.lane.b32.xlu1 %v4558_v53, %s4283_s12 }
 0x115   : > { %v4577_v57 = vpop.permute.xlu2 %1239  ;;  %v4579_v58 = vpop.permute.xlu0 %1198 }
 0x116   : > { %v453_v59 = vpop.permute.xlu1 %452 }
 0x118   : > { %v374_v60 = vpop.f32.mrf.mxu0 }
 0x119   : > { %v4591_v0 = vadd.f32 %v374_v60, %v4452_v25 }
 0x11b   : > { %1428 = vrot.lane.b32.xlu2 %v4553_v51, %s4283_s12  ;;  %1395 = vrot.lane.b32.xlu0 %v4544_v49, %s4284_s13 }
 0x11c   : > { %1471 = vrot.lane.b32.xlu1 %v4569_v56, %s4284_s13 }
 0x11d   : > { %v4587_v61 = vpop.permute.xlu2 %1235  ;;  %v455_v62 = vpop.permute.xlu0 %454 }
 0x11e   : > { %v1201_v63 = vpop.permute.xlu1 %1200  ;;  %3736 = vmatpush.xpose.msk.msra.mxu2 %vm456_vm1, %v455_v62 }
 0x122   : > { %3737 = vmatpush.xpose.msk.msra.mxu2 %vm456_vm1, %v453_v59 }
 0x123   : > { %1473 = vrot.lane.b32.xlu2 %v4591_v0, %s4284_s13  ;;  %1350 = vrot.lane.b32.xlu0 %v4530_v45, %s4283_s12 }
 0x124   : > { %714 = vrot.lane.b32.xlu1 %v4591_v0, %s4285_s14  ;;  %s4290_s14 = smov 80  }
 0x125   : > { %v1277_v1 = vpop.permute.xlu2 %1276  ;;  %v4600_v2 = vpop.permute.xlu0 %1233  ;;  %3738 = vmatmul.msk.f32.vlgmr.msra.gmra.mxu2 %vm456_vm1, %v4455_v27 }
 0x126   : > { %v4604_v3 = vpop.permute.xlu1 %1196 }
 0x12b   : > { %1469 = vrot.lane.b32.xlu2 %v4591_v0, %s4283_s12  ;;  %1391 = vrot.lane.b32.xlu0 %v4544_v49, %s4283_s12 }
 0x12d   : > { %v530_v4 = vpop.permute.xlu2 %529  ;;  %v493_v5 = vpop.permute.xlu0 %492  ;;  %3739 = vmatmul.msk.f32.gmra.mxu2 %vm456_vm1, %v4464_v29 }
 0x12e   : > { %v491_v6 = vpop.permute.xlu1 %490  ;;  %3740 = vmatpush.xpose.msk.msra.mxu3 %vm456_vm1, %v493_v5  ;;  %3744 = vmatpush.xpose.msk.msrb.mxu2 %vm456_vm1, %v530_v4 }
 0x132   : > { %3741 = vmatpush.xpose.msk.msra.mxu3 %vm456_vm1, %v491_v6 }
 0x133   : > { %1432 = vrot.lane.b32.xlu0 %v4553_v51, %s4284_s13  ;;  %s3633_s13 = scalar_lea.hbm %s6122_s5, %s3869_s9 }
 0x134   : > { %s3637_s23 = sshll.u32 %s3633_s13, 4  ;;  %s3638_s23 = int_to_ptr.hbm [resolvable:$true] %s3637_s23 }
 0x135   : > { %v4617_v7 = vpop.permute.xlu2 %1311  ;;  %v528_v14 = vpop.permute.xlu0 %527  ;;  %3742 = vmatmul.msk.f32.vlgmr.msra.gmra.mxu3 %vm456_vm1, %v4471_v31 }
 0x136   : > { %v1238_v15 = vpop.permute.xlu1 %1237  ;;  %3745 = vmatpush.xpose.msk.msrb.mxu2 %vm456_vm1, %v528_v14 }
 0x139   : > { %3746 = vmatmul.msk.f32.vlgmr.msrb.gmra.mxu2 %vm456_vm1, %v4487_v35 }
 0x13b   : > { %1467 = vrot.lane.b32.xlu0 %v4569_v56, %s4283_s12 }
 0x13d   : > { %v567_v16 = vpop.permute.xlu2 %566  ;;  %3743 = vmatmul.msk.f32.gmra.mxu3 %vm456_vm1, %v4478_v33  ;;  %v1279_v21 = vpop.permute.xlu0 %1278 }
 0x13e   : > { %v1273_v17 = vpop.permute.xlu1 %1272  ;;  %3748 = vmatpush.xpose.msk.msrb.mxu3 %vm456_vm1, %v567_v16 }
 0x141   : > { %3747 = vmatmul.msk.f32.gmra.mxu2 %vm456_vm1, %v4496_v37 }
 0x145   : > { %v604_v18 = vpop.permute.xlu2 %603  ;;  %v1275_v23 = vpop.permute.xlu0 %1274 }
 0x146   : > { %v565_v19 = vpop.permute.xlu1 %564  ;;  %3752 = vmatpush.xpose.msk.msra.mxu2 %vm456_vm1, %v604_v18 }
 0x147   : > { %3749 = vmatpush.xpose.msk.msrb.mxu3 %vm456_vm1, %v565_v19 }
 0x14a   : > { %3750 = vmatmul.msk.f32.vlgmr.msrb.gmra.mxu3 %vm456_vm1, %v4505_v39 }
 0x14d   : > { %v1316_v25 = vpop.permute.xlu0 %1315  ;;  %v1357_v26 = vpop.permute.xlu2 %1356 }
 0x14e   : > { %v1318_v20 = vpop.permute.xlu1 %1317 }
 0x152   : > { %3751 = vmatmul.msk.f32.gmra.mxu3 %vm456_vm1, %v4514_v41 }
 0x155   : > { %v639_v32 = vpop.permute.xlu2 %638 }
 0x156   : > { %v4637_v22 = vpop.permute.xlu1 %1313 }
 0x15d   : > { %v676_v40 = vpop.permute.xlu2 %675 }
 0x15e   : > { %v602_v24 = vpop.permute.xlu1 %601 }
 0x15f   : > { %3753 = vmatpush.xpose.msk.msra.mxu2 %vm456_vm1, %v602_v24 }
 0x162   : > { %3754 = vmatmul.msk.f32.vlgmr.msra.gmra.mxu2 %vm456_vm1, %v4530_v45 }
 0x166   : > { %v1355_v28 = vpop.permute.xlu1 %1354 }
 0x16a   : > { %3755 = vmatmul.msk.f32.gmra.mxu2 %vm456_vm1, %v4527_v44 }
 0x16d   : > { %v641_v30 = vpop.permute.xlu0 %640 }
 0x16e   : > { %3756 = vmatpush.xpose.msk.msra.mxu3 %vm456_vm1, %v641_v30  ;;  %v4648_v34 = vpop.permute.xlu1 %1389 }
 0x172   : > { %3757 = vmatpush.xpose.msk.msra.mxu3 %vm456_vm1, %v639_v32 }
 0x175   : > { %3758 = vmatmul.msk.f32.vlgmr.msra.gmra.mxu3 %vm456_vm1, %v4541_v48 }
 0x17d   : > { %v678_v36 = vpop.permute.xlu0 %677  ;;  %3759 = vmatmul.msk.f32.gmra.mxu3 %vm456_vm1, %v4544_v49 }
 0x17e   : > { %v1435_v38 = vpop.permute.xlu1 %1434  ;;  %3760 = vmatpush.xpose.msk.msrb.mxu2 %vm456_vm1, %v678_v36 }
 0x182   : > { %3761 = vmatpush.xpose.msk.msrb.mxu2 %vm456_vm1, %v676_v40 }
 0x185   : > { %v713_v42 = vpop.permute.xlu0 %712  ;;  %3762 = vmatmul.msk.f32.vlgmr.msrb.gmra.mxu2 %vm456_vm1, %v4553_v51 }
 0x186   : > { %3768 = vmatpush.xpose.msk.msra.mxu2 %vm456_vm1, %v1201_v63  ;;  %v1431_v43 = vpop.permute.xlu1 %1430 }
 0x18a   : > { %3769 = vmatpush.xpose.msk.msra.mxu2 %vm456_vm1, %v4579_v58 }
 0x18d   : > { %v1396_v46 = vpop.permute.xlu0 %1395  ;;  %3763 = vmatmul.msk.f32.gmra.mxu2 %vm456_vm1, %v4558_v53 }
 0x18e   : > { %3776 = vmatpush.xpose.msk.msrb.mxu2 %vm456_vm1, %v1279_v21  ;;  %v1472_v47 = vpop.permute.xlu1 %1471 }
 0x192   : > { %3777 = vmatpush.xpose.msk.msrb.mxu2 %vm456_vm1, %v1277_v1 }
 0x195   : > { %v1351_v50 = vpop.permute.xlu0 %1350  ;;  %3770 = vmatmul.msk.f32.vlgmr.msra.gmra.mxu2 %vm456_vm1, %v4566_v54  ;;  %v1394_v54 = vpop.permute.xlu2 %1393 }
 0x196   : > { %3784 = vmatpush.xpose.msk.msra.mxu2 %vm456_vm1, %v1357_v26  ;;  %v715_v52 = vpop.permute.xlu1 %714 }
 0x197   : > { %3764 = vmatpush.xpose.msk.msrb.mxu3 %vm456_vm1, %v715_v52 }
 0x19a   : > { %3785 = vmatpush.xpose.msk.msra.mxu2 %vm456_vm1, %v1355_v28 }
 0x19b   : > { %3765 = vmatpush.xpose.msk.msrb.mxu3 %vm456_vm1, %v713_v42 }
 0x19d   : > { %3771 = vmatmul.msk.f32.gmra.mxu2 %vm456_vm1, %v4604_v3  ;;  %v1392_v55 = vpop.permute.xlu0 %1391  ;;  %v1353_v60 = vpop.permute.xlu2 %1352 }
 0x19e   : > { %3766 = vmatmul.msk.f32.vlgmr.msrb.gmra.mxu3 %vm456_vm1, %v4569_v56 }
 0x19f   : > { %3772 = vmatpush.xpose.msk.msra.mxu3 %vm456_vm1, %v4577_v57 }
 0x1a3   : > { %3773 = vmatpush.xpose.msk.msra.mxu3 %vm456_vm1, %v1238_v15 }
 0x1a5   : > { %3778 = vmatmul.msk.f32.vlgmr.msrb.gmra.mxu2 %vm456_vm1, %v1273_v17  ;;  %v1433_v58 = vpop.permute.xlu0 %1432  ;;  %v1429_v1 = vpop.permute.xlu2 %1428 }
 0x1a6   : > { %3767 = vmatmul.msk.f32.gmra.mxu3 %vm456_vm1, %v4591_v0  ;;  %3792 = vmatpush.xpose.msk.msrb.mxu2 %vm456_vm1, %v1435_v38 }
 0x1a7   : > { %3780 = vmatpush.xpose.msk.msrb.mxu3 %vm456_vm1, %v1318_v20 }
 0x1a8   : > { %v4682_v57 = vpop.f32.mrf.mxu2 }
 0x1a9   : > { %v747_v59 = vsel %vm456_vm1, %v4682_v57, -inf }
 0x1aa   : > { %3793 = vmatpush.xpose.msk.msrb.mxu2 %vm456_vm1, %v1433_v58  ;;  %748 = vmax.xlane.f32.xlu0 %v747_v59 }
 0x1ab   : > { %3781 = vmatpush.xpose.msk.msrb.mxu3 %vm456_vm1, %v1316_v25 }
 0x1ad   : > { %3779 = vmatmul.msk.f32.gmra.mxu2 %vm456_vm1, %v1275_v23  ;;  %v1474_v6 = vpop.permute.xlu2 %1473  ;;  %v1468_v20 = vpop.permute.xlu0 %1467 }
 0x1ae   : > { %3774 = vmatmul.msk.f32.vlgmr.msra.gmra.mxu3 %vm456_vm1, %v4600_v2 }
 0x1af   : > { %3788 = vmatpush.xpose.msk.msra.mxu3 %vm456_vm1, %v1396_v46 }
 0x1b0   : > { %v4691_v62 = vpop.f32.mrf.mxu2 }
 0x1b1   : > { %v750_v63 = vsel %vm456_vm1, %v4691_v62, -inf }
 0x1b2   : > { %751 = vmax.xlane.f32.xlu1 %v750_v63 }
 0x1b3   : > { %3789 = vmatpush.xpose.msk.msra.mxu3 %vm456_vm1, %v1394_v54 }
 0x1b5   : > { %3786 = vmatmul.msk.f32.vlgmr.msra.gmra.mxu2 %vm456_vm1, %v1351_v50  ;;  %v1470_v21 = vpop.permute.xlu2 %1469 }
 0x1b6   : > { %3775 = vmatmul.msk.f32.gmra.mxu3 %vm456_vm1, %v4587_v61 }
 0x1b8   : > { %v4699_v3 = vpop.f32.mrf.mxu3 }
 0x1b9   : > { %v753_v2 = vsel %vm456_vm1, %v4699_v3, -inf }
 0x1ba   : > { %754 = vmax.xlane.f32.xlu2 %v753_v2 }
 0x1bc   : > { %v4703_v4 = vpop.f32.mrf.mxu2 }
 0x1bd   : > { %3787 = vmatmul.msk.f32.gmra.mxu2 %vm456_vm1, %v1353_v60  ;;  %v759_v5 = vsel %vm456_vm1, %v4703_v4, -inf }
 0x1be   : > { %3782 = vmatmul.msk.f32.vlgmr.msrb.gmra.mxu3 %vm456_vm1, %v4617_v7  ;;  %760 = vmax.xlane.f32.xlu1 %v759_v5 }
 0x1bf   : > { %3796 = vmatpush.xpose.msk.msrb.mxu3 %vm456_vm1, %v1474_v6 }
 0x1c0   : > { %v4711_v61 = vpop.f32.mrf.mxu3 }
 0x1c1   : > { %v756_v14 = vsel %vm456_vm1, %v4711_v61, -inf }
 0x1c2   : > { %757 = vmax.xlane.f32.xlu0 %v756_v14 }
 0x1c3   : > { %3797 = vmatpush.xpose.msk.msrb.mxu3 %vm456_vm1, %v1472_v47 }
 0x1c4   : > { %v4716_v15 = vpop.f32.mrf.mxu2 }
 0x1c5   : > { %3794 = vmatmul.msk.f32.vlgmr.msrb.gmra.mxu2 %vm456_vm1, %v1429_v1  ;;  %v762_v16 = vsel %vm456_vm1, %v4716_v15, -inf }
 0x1c6   : > { %3783 = vmatmul.msk.f32.gmra.mxu3 %vm456_vm1, %v4637_v22  ;;  %763 = vmax.xlane.f32.xlu2 %v762_v16 }
 0x1cd   : > { %v4723_v7 = vpop.f32.mrf.mxu3  ;;  %3795 = vmatmul.msk.f32.gmra.mxu2 %vm456_vm1, %v1431_v43 }
 0x1ce   : > { %3790 = vmatmul.msk.f32.vlgmr.msra.gmra.mxu3 %vm456_vm1, %v4648_v34  ;;  %v765_v17 = vsel %vm456_vm1, %v4723_v7, -inf }
 0x1cf   : > { %766 = vmax.xlane.f32.xlu0 %v765_v17 }
 0x1d5   : > { %v4730_v18 = vpop.f32.mrf.mxu3 }
 0x1d6   : > { %3791 = vmatmul.msk.f32.gmra.mxu3 %vm456_vm1, %v1392_v55  ;;  %v768_v19 = vsel %vm456_vm1, %v4730_v18, -inf }
 0x1d7   : > { %769 = vmax.xlane.f32.xlu1 %v768_v19 }
 0x1de   : > { %3798 = vmatmul.msk.f32.vlgmr.msrb.gmra.mxu3 %vm456_vm1, %v1468_v20 }
 0x1e5   : > { %v4736_v22 = vpop.f32.mrf.mxu2 }
 0x1e6   : > { %3799 = vmatmul.msk.f32.gmra.mxu3 %vm456_vm1, %v1470_v21  ;;  %v771_v23 = vsel %vm456_vm1, %v4736_v22, -inf }
 0x1e7   : > { %772 = vmax.xlane.f32.xlu2 %v771_v23 }
 0x1ed   : > { %v4741_v24 = vpop.f32.mrf.mxu2 }
 0x1ee   : > { %v774_v25 = vsel %vm456_vm1, %v4741_v24, -inf }
 0x1ef   : > { %775 = vmax.xlane.f32.xlu0 %v774_v25 }
 0x1f8   : > { %v4745_v26 = vpop.f32.mrf.mxu3 }
 0x1f9   : > { %v777_v28 = vsel %vm456_vm1, %v4745_v26, -inf }
 0x1fa   : > { %778 = vmax.xlane.f32.xlu1 %v777_v28 }
 0x200   : > { %v4749_v30 = vpop.f32.mrf.mxu3 }
 0x201   : > { %v780_v32 = vsel %vm456_vm1, %v4749_v30, -inf }
 0x202   : > { %781 = vmax.xlane.f32.xlu2 %v780_v32 }
 0x208   : > { %v4753_v34 = vpop.f32.mrf.mxu2 }
 0x209   : > { %v783_v36 = vsel %vm456_vm1, %v4753_v34, -inf }
 0x20a   : > { %784 = vmax.xlane.f32.xlu0 %v783_v36 }
 0x210   : > { %v4757_v38 = vpop.f32.mrf.mxu2 }
 0x211   : > { %v786_v40 = vsel %vm456_vm1, %v4757_v38, -inf }
 0x212   : > { %787 = vmax.xlane.f32.xlu1 %v786_v40 }
 0x218   : > { %v4761_v42 = vpop.f32.mrf.mxu2 }
 0x219   : > { %v1506_v43 = vsel %vm456_vm1, %v4761_v42, -inf }
 0x21a   : > { %1507 = vmax.xlane.f32.xlu0 %v1506_v43 }
 0x21d   : > { %v749_v55 = vpop.xlane.xlu0 %748 }
 0x21e   : > { %v795_v58 = vsub.f32 %v4682_v57, %v749_v55 }
 0x220   : > { %v4765_v46 = vpop.f32.mrf.mxu2  ;;  %v811_v2 = vmul.f32 1.442695, %v795_v58 }
 0x221   : > { %v4767_v47 = vpop.f32.mrf.mxu3  ;;  %v1509_v50 = vsel %vm456_vm1, %v4765_v46, -inf }
 0x222   : > { %1510 = vmax.xlane.f32.xlu1 %v1509_v50  ;;  %v789_v52 = vsel %vm456_vm1, %v4767_v47, -inf  ;;  %3950 = vpow2.f32 %v811_v2 }
 0x223   : > { %790 = vmax.xlane.f32.xlu2 %v789_v52 }
 0x225   : > { %v752_v54 = vpop.xlane.xlu1 %751 }
 0x226   : > { %v796_v60 = vsub.f32 %v4691_v62, %v752_v54 }
 0x228   : > { %v4774_v59 = vpop.f32.mrf.mxu2  ;;  %v813_v5 = vmul.f32 1.442695, %v796_v60  ;;  %v4792_v21 = vpop.eup %3950 }
 0x229   : > { %v4777_v63 = vpop.f32.mrf.mxu3  ;;  %v1518_v19 = vsel %vm456_vm1, %v4774_v59, -inf  ;;  %v843_v32 = vsel %vm456_vm1, %v4792_v21, 0.0 }
 0x22a   : > { %v792_v1 = vsel %vm456_vm1, %v4777_v63, -inf  ;;  %3952 = vpow2.f32 %v813_v5 }
 0x22b   : > { %793 = vmax.xlane.f32.xlu0 %v792_v1 }
 0x22d   : > { %v755_v6 = vpop.xlane.xlu2 %754 }
 0x22e   : > { %v797_v14 = vsub.f32 %v4699_v3, %v755_v6 }
 0x230   : > { %v4782_v16 = vpop.f32.mrf.mxu2  ;;  %v815_v20 = vmul.f32 1.442695, %v797_v14  ;;  %v4794_v3 = vpop.eup %3952 }
 0x231   : > { %v4784_v57 = vpop.f32.mrf.mxu3  ;;  %v1521_v62 = vsel %vm456_vm1, %v4782_v16, -inf  ;;  %v846_v36 = vsel %vm456_vm1, %v4794_v3, 0.0  ;;  %v761_v54 = vpop.xlane.xlu1 %760 }
 0x232   : > { %1522 = vmax.xlane.f32.xlu1 %v1521_v62  ;;  %v1512_v17 = vsel %vm456_vm1, %v4784_v57, -inf  ;;  %3954 = vpow2.f32 %v815_v20  ;;  %v799_v1 = vsub.f32 %v4703_v4, %v761_v54 }
 0x233   : > { %1513 = vmax.xlane.f32.xlu2 %v1512_v17  ;;  %1519 = vmax.xlane.f32.xlu0 %v1518_v19 }
 0x234   : > { %v819_v62 = vmul.f32 1.442695, %v799_v1 }
 0x235   : > { %v758_v55 = vpop.xlane.xlu0 %757 }
 0x236   : > { %v798_v58 = vsub.f32 %v4711_v61, %v758_v55 }
 0x238   : > { %v4796_v23 = vpop.f32.mrf.mxu2  ;;  %v4806_v40 = vpop.eup %3954  ;;  %v817_v14 = vmul.f32 1.442695, %v798_v58 }
 0x239   : > { %v4798_v25 = vpop.f32.mrf.mxu3  ;;  %v1530_v28 = vsel %vm456_vm1, %v4796_v23, -inf  ;;  %v849_v50 = vsel %vm456_vm1, %v4806_v40, 0.0  ;;  %v764_v17 = vpop.xlane.xlu2 %763 }
 0x23a   : > { %1531 = vmax.xlane.f32.xlu1 %v1530_v28  ;;  %v1515_v52 = vsel %vm456_vm1, %v4798_v25, -inf  ;;  %3956 = vpow2.f32 %v817_v14  ;;  %v800_v61 = vsub.f32 %v4716_v15, %v764_v17 }
 0x23b   : > { %844 = vadd.xlane.f32.xlu2 %v843_v32  ;;  %847 = vadd.xlane.f32.xlu0 %v846_v36  ;;  %3958 = vpow2.f32 %v819_v62 }
 0x23c   : > { %v821_v28 = vmul.f32 1.442695, %v800_v61 }
 0x23e   : > { %3960 = vpow2.f32 %v821_v28 }
 0x240   : > { %v4822_v6 = vpop.f32.mrf.mxu2 }
 0x241   : > { %v4808_v43 = vpop.f32.mrf.mxu3  ;;  %v1533_v4 = vsel %vm456_vm1, %v4822_v6, -inf }
 0x242   : > { %850 = vadd.xlane.f32.xlu1 %v849_v50  ;;  %v1524_v2 = vsel %vm456_vm1, %v4808_v43, -inf  ;;  %v767_v32 = vpop.xlane.xlu0 %766  ;;  %v4833_v50 = vpop.eup %3956 }
 0x243   : > { %1516 = vmax.xlane.f32.xlu2 %v1515_v52  ;;  %v4835_v55 = vpop.eup %3958  ;;  %v801_v15 = vsub.f32 %v4723_v7, %v767_v32  ;;  %v852_v1 = vsel %vm456_vm1, %v4833_v50, 0.0 }
 0x244   : > { %v4847_v7 = vpop.eup %3960 }
 0x245   : > { %v823_v14 = vmul.f32 1.442695, %v801_v15 }
 0x247   : > { %3962 = vpow2.f32 %v823_v14 }
 0x248   : > { %v4831_v36 = vpop.f32.mrf.mxu2 }
 0x249   : > { %v4815_v60 = vpop.f32.mrf.mxu3 }
 0x24a   : > { %v1527_v5 = vsel %vm456_vm1, %v4815_v60, -inf  ;;  %v770_v52 = vpop.xlane.xlu1 %769 }
 0x24b   : > { %1525 = vmax.xlane.f32.xlu2 %v1524_v2  ;;  %1528 = vmax.xlane.f32.xlu0 %v1527_v5  ;;  %v802_v58 = vsub.f32 %v4730_v18, %v770_v52  ;;  %v855_v5 = vsel %vm456_vm1, %v4835_v55, 0.0 }
 0x24d   : > { %v825_v62 = vmul.f32 1.442695, %v802_v58  ;;  %v4860_v58 = vpop.eup %3962 }
 0x24f   : > { %3964 = vpow2.f32 %v825_v62 }
 0x250   : > { %v4849_v61 = vpop.f32.mrf.mxu2 }
 0x251   : > { %v4825_v19 = vpop.f32.mrf.mxu3  ;;  %v1545_v28 = vsel %vm456_vm1, %v4849_v61, -inf }
 0x252   : > { %v1536_v20 = vsel %vm456_vm1, %v4825_v19, -inf }
 0x253   : > { %1534 = vmax.xlane.f32.xlu2 %v1533_v4  ;;  %1537 = vmax.xlane.f32.xlu0 %v1536_v20  ;;  %v1542_v4 = vsel %vm456_vm1, %v4831_v36, -inf  ;;  %v858_v20 = vsel %vm456_vm1, %v4847_v7, 0.0 }
 0x259   : > { %v4838_v54 = vpop.f32.mrf.mxu3 }
 0x25a   : > { %v1539_v2 = vsel %vm456_vm1, %v4838_v54, -inf  ;;  %v773_v17 = vpop.xlane.xlu2 %772 }
 0x25b   : > { %853 = vadd.xlane.f32.xlu2 %v852_v1  ;;  %1540 = vmax.xlane.f32.xlu1 %v1539_v2  ;;  %v803_v18 = vsub.f32 %v4736_v22, %v773_v17  ;;  %v4862_v22 = vpop.eup %3964  ;;  %v861_v2 = vsel %vm456_vm1, %v4860_v58, 0.0 }
 0x25c   : > { %856 = vadd.xlane.f32.xlu0 %v855_v5  ;;  %v864_v14 = vsel %vm456_vm1, %v4862_v22, 0.0 }
 0x25d   : > { %v827_v32 = vmul.f32 1.442695, %v803_v18 }
 0x25f   : > { %3966 = vpow2.f32 %v827_v32 }
 0x261   : > { %v4858_v52 = vpop.f32.mrf.mxu3 }
 0x262   : > { %v776_v15 = vpop.xlane.xlu0 %775  ;;  %v1548_v5 = vsel %vm456_vm1, %v4858_v52, -inf }
 0x263   : > { %1543 = vmax.xlane.f32.xlu2 %v1542_v4  ;;  %859 = vadd.xlane.f32.xlu1 %v858_v20  ;;  %v804_v1 = vsub.f32 %v4741_v24, %v776_v15 }
 0x264   : > { %1546 = vmax.xlane.f32.xlu0 %v1545_v28 }
 0x265   : > { %v829_v62 = vmul.f32 1.442695, %v804_v1  ;;  %v4872_v4 = vpop.eup %3966 }
 0x266   : > { %v867_v28 = vsel %vm456_vm1, %v4872_v4, 0.0 }
 0x267   : > { %3968 = vpow2.f32 %v829_v62 }
 0x269   : > { %v4874_v20 = vpop.f32.mrf.mxu3 }
 0x26a   : > { %v1551_v32 = vsel %vm456_vm1, %v4874_v20, -inf }
 0x26b   : > { %862 = vadd.xlane.f32.xlu2 %v861_v2  ;;  %1549 = vmax.xlane.f32.xlu1 %v1548_v5 }
 0x26c   : > { %865 = vadd.xlane.f32.xlu0 %v864_v14 }
 0x26d   : > { %v779_v17 = vpop.xlane.xlu1 %778  ;;  %v4881_v2 = vpop.eup %3968 }
 0x26e   : > { %v805_v18 = vsub.f32 %v4745_v26, %v779_v17  ;;  %v870_v62 = vsel %vm456_vm1, %v4881_v2, 0.0 }
 0x270   : > { %v831_v24 = vmul.f32 1.442695, %v805_v18 }
 0x272   : > { %3970 = vpow2.f32 %v831_v24 }
 0x273   : > { %868 = vadd.xlane.f32.xlu1 %v867_v28  ;;  %1552 = vmax.xlane.f32.xlu2 %v1551_v32  ;;  %v256_v28 = vld [vmem:[%s6118_s1 + $0x78] sm:$0xff] }
 0x274   : > { %385 = vmatpush.msra.mxu1 %v256_v28  ;;  %v246_v28 = vld [vmem:[%s6118_s1 + $0x28] sm:$0xff] }
 0x275   : > { %v782_v15 = vpop.xlane.xlu2 %781 }
 0x276   : > { %v806_v1 = vsub.f32 %v4749_v30, %v782_v15  ;;  %v254_v15 = vld [vmem:[%s6118_s1 + $0x68] sm:$0xff] }
 0x277   : > { %386 = vmatpush.msra.mxu1 %v254_v15 }
 0x278   : > { %v4883_v26 = vpop.eup %3970  ;;  %v833_v5 = vmul.f32 1.442695, %v806_v1  ;;  %v250_v1 = vld [vmem:[%s6118_s1 + $0x48] sm:$0xff] }
 0x279   : > { %v873_v14 = vsel %vm456_vm1, %v4883_v26, 0.0 }
 0x27a   : > { %3972 = vpow2.f32 %v833_v5  ;;  %874 = vadd.xlane.f32.xlu0 %v873_v14 }
 0x27b   : > { %871 = vadd.xlane.f32.xlu2 %v870_v62 }
 0x27d   : > { %v785_v17 = vpop.xlane.xlu0 %784 }
 0x27e   : > { %v807_v18 = vsub.f32 %v4753_v34, %v785_v17  ;;  %v252_v34 = vld [vmem:[%s6118_s1 + $0x58] sm:$0xff] }
 0x27f   : > { %387 = vmatpush.msra.mxu1 %v252_v34 }
 0x280   : > { %v4890_v24 = vpop.eup %3972  ;;  %v835_v30 = vmul.f32 1.442695, %v807_v18  ;;  %v248_v18 = vld [vmem:[%s6118_s1 + $0x38] sm:$0xff] }
 0x281   : > { %v876_v32 = vsel %vm456_vm1, %v4890_v24, 0.0  ;;  %388 = vmatpush.msra.mxu1 %v250_v1 }
 0x282   : > { %3974 = vpow2.f32 %v835_v30  ;;  %877 = vadd.xlane.f32.xlu1 %v876_v32  ;;  %v242_v32 = vld [vmem:[%s6118_s1 + $0x8] sm:$0xff] }
 0x283   : > { %389 = vmatpush.msra.mxu1 %v248_v18 }
 0x285   : > { %v788_v5 = vpop.xlane.xlu1 %787  ;;  %390 = vmatpush.msra.mxu1 %v246_v28 }
 0x286   : > { %v808_v14 = vsub.f32 %v4757_v38, %v788_v5  ;;  %v244_v38 = vld [vmem:[%s6118_s1 + $0x18] sm:$0xff] }
 0x287   : > { %391 = vmatpush.msra.mxu1 %v244_v38 }
 0x288   : > { %v4907_v62 = vpop.eup %3974  ;;  %v837_v17 = vmul.f32 1.442695, %v808_v14 }
 0x289   : > { %v879_v30 = vsel %vm456_vm1, %v4907_v62, 0.0  ;;  %392 = vmatpush.msra.mxu1 %v242_v32 }
 0x28a   : > { %3976 = vpow2.f32 %v837_v17  ;;  %880 = vadd.xlane.f32.xlu2 %v879_v30  ;;  %3720 = vmatmul.msk.f32.vlgmr.msra.gmra.mxu1 %vm263_vm0, %v4400_v8 }
 0x28d   : > { %v1508_v15 = vpop.xlane.xlu0 %1507 }
 0x28e   : > { %v1554_v34 = vsub.f32 %v4761_v42, %v1508_v15 }
 0x290   : > { %v4924_v1 = vpop.eup %3976  ;;  %v1570_v5 = vmul.f32 1.442695, %v1554_v34 }
 0x291   : > { %v882_v14 = vsel %vm456_vm1, %v4924_v1, 0.0 }
 0x292   : > { %3978 = vpow2.f32 %v1570_v5  ;;  %883 = vadd.xlane.f32.xlu0 %v882_v14  ;;  %3721 = vmatmul.msk.f32.gmra.mxu1 %vm263_vm0, %v4405_v9 }
 0x295   : > { %v1511_v17 = vpop.xlane.xlu1 %1510 }
 0x296   : > { %v791_v18 = vpop.xlane.xlu2 %790  ;;  %v1555_v30 = vsub.f32 %v4765_v46, %v1511_v17  ;;  %v1010_v46 = vlaneseq }
 0x297   : > { %v809_v28 = vsub.f32 %v4767_v47, %v791_v18 }
 0x298   : > { %v4932_v38 = vpop.eup %3978  ;;  %v1572_v42 = vmul.f32 1.442695, %v1555_v30  ;;  %v4949_v18 = vshrl.u32 %v1010_v46, 7 }
 0x299   : > { %v839_v32 = vmul.f32 1.442695, %v809_v28  ;;  %v1602_v8 = vsel %vm456_vm1, %v4932_v38, 0.0 }
 0x29a   : > { %3980 = vpow2.f32 %v1572_v42  ;;  %1603 = vadd.xlane.f32.xlu1 %v1602_v8  ;;  %3722 = vmatmul.msk.f32.gmra.mxu1 %vm263_vm0, %v4410_v10 }
 0x29b   : > { %3982 = vpow2.f32 %v839_v32  ;;  %3919 = vset.pattern.permute.xlu2 %v4949_v18  ;;  %3921 = vset.pattern.permute.xlu1 %v4949_v18 }
 0x29e   : > { %v794_v15 = vpop.xlane.xlu0 %793 }
 0x29f   : > { %v810_v34 = vsub.f32 %v4777_v63, %v794_v15 }
 0x2a0   : > { %v4939_v5 = vpop.eup %3980 }
 0x2a1   : > { %v4943_v47 = vpop.eup %3982  ;;  %v841_v14 = vmul.f32 1.442695, %v810_v34  ;;  %v1605_v9 = vsel %vm456_vm1, %v4939_v5, 0.0 }
 0x2a2   : > { %v885_v17 = vsel %vm456_vm1, %v4943_v47, 0.0  ;;  %1606 = vadd.xlane.f32.xlu2 %v1605_v9  ;;  %3723 = vmatmul.msk.f32.gmra.mxu1 %vm263_vm0, %v4415_v11  ;;  %v4963_v11 = vadd.s32 8, %v4949_v18 }
 0x2a3   : > { %3984 = vpow2.f32 %v841_v14  ;;  %886 = vadd.xlane.f32.xlu1 %v885_v17 }
 0x2a4   : > { %3920 = vset.pattern.permute.xlu0 %v4963_v11 }
 0x2a5   : > { %v1523_v63 = vpop.xlane.xlu1 %1522 }
 0x2a6   : > { %v1514_v10 = vpop.xlane.xlu2 %1513  ;;  %v1520_v30 = vpop.xlane.xlu0 %1519  ;;  %v1559_v34 = vsub.f32 %v4782_v16, %v1523_v63 }
 0x2a7   : > { %v1556_v28 = vsub.f32 %v4784_v57, %v1514_v10  ;;  %v1558_v42 = vsub.f32 %v4774_v59, %v1520_v30  ;;  %v4286_v59 = vmov 16.0  }
 0x2a8   : > { %v1580_v14 = vmul.f32 1.442695, %v1559_v34 }
 0x2a9   : > { %v4957_v32 = vpop.eup %3984  ;;  %v1574_v8 = vmul.f32 1.442695, %v1556_v28  ;;  %v1578_v15 = vmul.f32 1.442695, %v1558_v42 }
 0x2aa   : > { %v888_v46 = vsel %vm456_vm1, %v4957_v32, 0.0  ;;  %3724 = vmatmul.msk.f32.gmra.mxu1 %vm263_vm0, %v4420_v12 }
 0x2ab   : > { %3986 = vpow2.f32 %v1574_v8  ;;  %889 = vadd.xlane.f32.xlu2 %v888_v46 }
 0x2ac   : > { %3988 = vpow2.f32 %v1578_v15 }
 0x2ad   : > { %v1532_v9 = vpop.xlane.xlu1 %1531  ;;  %3990 = vrcp.f32 %v4286_v59 }
 0x2ae   : > { %v845_v57 = vpop.xlane.xlu2 %844  ;;  %v848_v17 = vpop.xlane.xlu0 %847  ;;  %v1562_v63 = vsub.f32 %v4796_v23, %v1532_v9 }
 0x2af   : > { %3992 = vrcp.f32 %v845_v57 }
 0x2b0   : > { %3994 = vrcp.f32 %v848_v17  ;;  %v1586_v15 = vmul.f32 1.442695, %v1562_v63 }
 0x2b1   : > { %v4968_v16 = vpop.eup %3986  ;;  %3996 = vpow2.f32 %v1580_v14 }
 0x2b2   : > { %v4971_v10 = vpop.eup %3988  ;;  %v1608_v30 = vsel %vm456_vm1, %v4968_v16, 0.0  ;;  %3725 = vmatmul.msk.f32.gmra.mxu1 %vm263_vm0, %v4425_v13  ;;  %3998 = vpow2.f32 %v1586_v15  ;;  %v4208_v15 = vld [vmem:[%s4394_s7 + $0x30] sm:$0xff] }
 0x2b3   : > { %1609 = vadd.xlane.f32.xlu0 %v1608_v30  ;;  %v1614_v28 = vsel %vm456_vm1, %v4971_v10, 0.0  ;;  %v3991_v42 = vpop.eup %3990 }
 0x2b4   : > { %1615 = vadd.xlane.f32.xlu2 %v1614_v28  ;;  %v996_v57 = vmul.f32 16.0, %v3991_v42  ;;  %vm1000_vm2 = vweird.f32 %v3991_v42 }
 0x2b5   : > { %v3993_v8 = vpop.eup %3992 }
 0x2b6   : > { %v3995_v34 = vpop.eup %3994  ;;  %v907_v12 = vmul.f32 %v3993_v8, %v4792_v21  ;;  %v1517_v46 = vpop.xlane.xlu2 %1516 }
 0x2b7   : > { %v4978_v14 = vpop.eup %3996  ;;  %v908_v23 = vmul.f32 %v3995_v34, %v4794_v3  ;;  %v1557_v9 = vsub.f32 %v4798_v25, %v1517_v46  ;;  %v997_v3 = vsub.f32 1.0, %v996_v57 }
 0x2b8   : > { %v923_v17 = vsel %vm456_vm1, %v907_v12, 0.0  ;;  %v1617_v21 = vsel %vm456_vm1, %v4978_v14, 0.0  ;;  %v4988_v34 = vpop.eup %3998 }
 0x2b9   : > { %v924_v59 = vsel %vm456_vm1, %v908_v23, 0.0  ;;  %v1576_v63 = vmul.f32 1.442695, %v1557_v9  ;;  %v998_v46 = vmul.f32 %v3991_v42, %v997_v3 }
 0x2ba   : > { %v925_v30 = vadd.f32 %v924_v59, %v923_v17  ;;  %3726 = vmatmul.msk.f32.gmra.mxu1 %vm263_vm0, %v4208_v15  ;;  %v1626_v59 = vsel %vm456_vm1, %v4988_v34, 0.0  ;;  %v4209_v15 = vld [vmem:[%s4394_s7 + $0x38] sm:$0xff] }
 0x2bb   : > { %4000 = vpow2.f32 %v1576_v63  ;;  %1618 = vadd.xlane.f32.xlu0 %v1617_v21  ;;  %v851_v21 = vpop.xlane.xlu1 %850 }
 0x2bc   : > { %v926_v28 = vrot.slane %v925_v30, 4 }
 0x2be   : > { %v1526_v25 = vpop.xlane.xlu2 %1525  ;;  %v927_v8 = vadd.f32 %v926_v28, %v925_v30  ;;  %v4991_v13 = vpop.xlane.xlu0 %1528 }
 0x2bf   : > { %v1560_v12 = vsub.f32 %v4808_v43, %v1526_v25  ;;  %v999_v43 = vadd.f32 %v3991_v42, %v998_v46 }
 0x2c0   : > { %v928_v23 = vrot.slane %v927_v8, 2 }
 0x2c1   : > { %v4995_v9 = vpop.eup %4000  ;;  %v1582_v17 = vmul.f32 1.442695, %v1560_v12  ;;  %v5002_v12 = vsel %vm1000_vm2, %v3991_v42, %v999_v43  ;;  %v4210_v42 = vld [vmem:[%s4394_s7 + $0x40] sm:$0xff] }
 0x2c2   : > { %v1611_v57 = vsel %vm456_vm1, %v4995_v9, 0.0  ;;  %v929_v63 = vadd.f32 %v928_v23, %v927_v8  ;;  %3727 = vmatmul.msk.f32.gmra.mxu1 %vm263_vm0, %v4209_v15 }
 0x2c3   : > { %4002 = vpow2.f32 %v1582_v17  ;;  %1612 = vadd.xlane.f32.xlu1 %v1611_v57  ;;  %1627 = vadd.xlane.f32.xlu0 %v1626_v59 }
 0x2c4   : > { %v930_v30 = vrot.slane %v929_v63, 1 }
 0x2c6   : > { %v1535_v3 = vpop.xlane.xlu2 %1534  ;;  %v931_v28 = vadd.f32 %v930_v30, %v929_v63  ;;  %v1538_v23 = vpop.xlane.xlu0 %1537 }
 0x2c7   : > { %v1563_v25 = vsub.f32 %v4822_v6, %v1535_v3 }
 0x2c8   : > { %v1002_v17 = vmul.f32 %v5002_v12, %v931_v28 }
 0x2c9   : > { %v5006_v45 = vpop.eup %4002  ;;  %v1588_v8 = vmul.f32 1.442695, %v1563_v25 }
 0x2ca   : > { %v1620_v46 = vsel %vm456_vm1, %v5006_v45, 0.0  ;;  %3728 = vmatmul.msk.f32.gmra.mxu1 %vm263_vm0, %v4210_v42 }
 0x2cb   : > { %4004 = vpow2.f32 %v1588_v8  ;;  %1621 = vadd.xlane.f32.xlu1 %v1620_v46  ;;  %v4211_v8 = vld [vmem:[%s4394_s7 + $0x48] sm:$0xff] }
 0x2cc   : > { %1014 = vperm.xlu2 %3919, %v1002_v17  }
 0x2ce   : > { %v854_v57 = vpop.xlane.xlu2 %853  ;;  %v5011_v6 = vpop.xlane.xlu1 %1540 }
 0x2cf   : > { %4006 = vrcp.f32 %v854_v57  ;;  %v857_v43 = vpop.xlane.xlu0 %856 }
 0x2d0   : > { %4008 = vrcp.f32 %v851_v21 }
 0x2d1   : > { %v5015_v59 = vpop.eup %4004 }
 0x2d2   : > { %v1629_v63 = vsel %vm456_vm1, %v5015_v59, 0.0  ;;  %3729 = vmatmul.msk.f32.gmra.mxu1 %vm263_vm0, %v4211_v8 }
 0x2d3   : > { %1630 = vadd.xlane.f32.xlu1 %v1629_v63 }
 0x2d4   : > { %3922 = vset.pattern.permute.xlu2 %v4963_v11 }
 0x2d5   : > { %v4007_v30 = vpop.eup %4006 }
 0x2d6   : > { %v4009_v3 = vpop.eup %4008  ;;  %v1544_v28 = vpop.xlane.xlu2 %1543  ;;  %v910_v15 = vmul.f32 %v4007_v30, %v4833_v50 }
 0x2d7   : > { %v860_v25 = vpop.xlane.xlu1 %859  ;;  %v1566_v21 = vsub.f32 %v4831_v36, %v1544_v28  ;;  %1020 = vperm.xlu0 %3920, %v1002_v17   ;;  %v909_v46 = vmul.f32 %v4009_v3, %v4806_v40  ;;  %v5027_v56 = vpop.xlane.xlu0 %1546  ;;  %v4212_v17 = vld [vmem:[%s4394_s7 + $0x50] sm:$0xff] }
 0x2d8   : > { %4010 = vrcp.f32 %v860_v25  ;;  %v933_v42 = vsel %vm456_vm1, %v910_v15, 0.0  ;;  %v1561_v25 = vsub.f32 %v4815_v60, %v4991_v13  ;;  %v1564_v60 = vsub.f32 %v4825_v19, %v1538_v23 }
 0x2d9   : > { %4012 = vrcp.f32 %v857_v43  ;;  %v1594_v57 = vmul.f32 1.442695, %v1566_v21  ;;  %v932_v49 = vsel %vm456_vm1, %v909_v46, 0.0 }
 0x2da   : > { %v934_v36 = vadd.f32 %v933_v42, %v932_v49  ;;  %3730 = vmatmul.msk.f32.gmra.mxu1 %vm263_vm0, %v4212_v17  ;;  %v1584_v46 = vmul.f32 1.442695, %v1561_v25  ;;  %v1590_v17 = vmul.f32 1.442695, %v1564_v60 }
 0x2db   : > { %4014 = vpow2.f32 %v1594_v57 }
 0x2dc   : > { %v935_v28 = vrot.slane %v934_v36, 4  ;;  %4016 = vpow2.f32 %v1584_v46 }
 0x2de   : > { %v4011_v63 = vpop.eup %4010  ;;  %v936_v8 = vadd.f32 %v935_v28, %v934_v36  ;;  %v863_v25 = vpop.xlane.xlu2 %862 }
 0x2df   : > { %v4013_v50 = vpop.eup %4012  ;;  %v912_v30 = vmul.f32 %v4011_v63, %v4847_v7  ;;  %v1550_v49 = vpop.xlane.xlu1 %1549 }
 0x2e0   : > { %v911_v40 = vmul.f32 %v4013_v50, %v4835_v55  ;;  %v5041_v57 = vpop.xlane.xlu0 %865  ;;  %v4213_v55 = vld [vmem:[%s4394_s7 + $0x58] sm:$0xff]  ;;  %v937_v42 = vrot.slane %v936_v8, 2 }
 0x2e1   : > { %v5032_v43 = vpop.eup %4014  ;;  %v942_v15 = vsel %vm456_vm1, %v912_v30, 0.0 }
 0x2e2   : > { %v1638_v3 = vsel %vm456_vm1, %v5032_v43, 0.0  ;;  %v941_v7 = vsel %vm456_vm1, %v911_v40, 0.0  ;;  %3731 = vmatmul.msk.f32.gmra.mxu1 %vm263_vm0, %v4213_v55  ;;  %v938_v50 = vadd.f32 %v937_v42, %v936_v8  ;;  %v1565_v40 = vsub.f32 %v4838_v54, %v5011_v6  ;;  %v5052_v28 = vpop.eup %4016  ;;  %v4215_v55 = vld [vmem:[%s4394_s7 + $0x68] sm:$0xff] }
 0x2e3   : > { %1639 = vadd.xlane.f32.xlu1 %v1638_v3  ;;  %v943_v21 = vadd.f32 %v942_v15, %v941_v7  ;;  %v4214_v3 = vld [vmem:[%s4394_s7 + $0x60] sm:$0xff]  ;;  %v1623_v23 = vsel %vm456_vm1, %v5052_v28, 0.0  ;;  %v1568_v8 = vsub.f32 %v4858_v52, %v1550_v49 }
 0x2e4   : > { %v939_v15 = vrot.slane %v938_v50, 1  ;;  %v1592_v19 = vmul.f32 1.442695, %v1565_v40 }
 0x2e5   : > { %v944_v63 = vrot.slane %v943_v21, 4 }
 0x2e6   : > { %v940_v54 = vadd.f32 %v939_v15, %v938_v50  ;;  %v1553_v40 = vpop.xlane.xlu2 %1552 }
 0x2e7   : > { %v5046_v13 = vpop.xlane.xlu1 %868  ;;  %v945_v30 = vadd.f32 %v944_v63, %v943_v21 }
 0x2e8   : > { %v1003_v63 = vmul.f32 %v5002_v12, %v940_v54 }
 0x2e9   : > { %v946_v7 = vrot.slane %v945_v30, 2 }
 0x2ea   : > { %3732 = vmatmul.msk.f32.gmra.mxu1 %vm263_vm0, %v4214_v3 }
 0x2eb   : > { %v947_v6 = vadd.f32 %v946_v7, %v945_v30 }
 0x2ed   : > { %v875_v36 = vpop.xlane.xlu0 %874  ;;  %v948_v60 = vrot.slane %v947_v6, 1 }
 0x2ee   : > { %4018 = vrcp.f32 %v875_v36 }
 0x2ef   : > { %4020 = vpow2.f32 %v1590_v17  ;;  %v1598_v17 = vmul.f32 1.442695, %v1568_v8  ;;  %v949_v30 = vadd.f32 %v948_v60, %v947_v6  ;;  %v872_v6 = vpop.xlane.xlu2 %871 }
 0x2f2   : > { %3733 = vmatmul.msk.f32.gmra.mxu1 %vm263_vm0, %v4215_v55  ;;  %v4217_v55 = vld [vmem:[%s4394_s7 + $0x78] sm:$0xff] }
 0x2f4   : > { %v4019_v46 = vpop.eup %4018 }
 0x2f5   : > { %1624 = vadd.xlane.f32.xlu2 %v1623_v23  ;;  %v878_v21 = vpop.xlane.xlu1 %877  ;;  %v5059_v42 = vpop.eup %4020  ;;  %v917_v36 = vmul.f32 %v4019_v46, %v4883_v26  ;;  %v4216_v23 = vld [vmem:[%s4394_s7 + $0x70] sm:$0xff]  ;;  %s4287_s7 = smov 32  }
 0x2f6   : > { %4022 = vrcp.f32 %v878_v21  ;;  %v1632_v50 = vsel %vm456_vm1, %v5059_v42, 0.0  ;;  %v5075_v21 = vmul.f32 %v5002_v12, %v949_v30 }
 0x2f7   : > { %4024 = vpow2.f32 %v1592_v19  ;;  %v968_v15 = vsel %vm456_vm1, %v917_v36, 0.0 }
 0x2f8   : > { %4026 = vpow2.f32 %v1598_v17 }
 0x2fa   : > { %3734 = vmatmul.msk.f32.gmra.mxu1 %vm263_vm0, %v4216_v23  ;;  %v1569_v23 = vsub.f32 %v4874_v20, %v1553_v40 }
 0x2fc   : > { %v4023_v3 = vpop.eup %4022  ;;  %1026 = vperm.xlu1 %3921, %v1003_v63  }
 0x2fd   : > { %v5065_v52 = vpop.eup %4024  ;;  %v918_v49 = vmul.f32 %v4023_v3, %v4890_v24  ;;  %1633 = vadd.xlane.f32.xlu2 %v1632_v50  ;;  %v5085_v17 = vpop.xlane.xlu2 %880 }
 0x2fe   : > { %v1635_v26 = vsel %vm456_vm1, %v5065_v52, 0.0  ;;  %v5078_v54 = vpop.eup %4026 }
 0x2ff   : > { %v969_v7 = vsel %vm456_vm1, %v918_v49, 0.0  ;;  %v1644_v46 = vsel %vm456_vm1, %v5078_v54, 0.0 }
 0x300   : > { %v970_v19 = vadd.f32 %v969_v7, %v968_v15 }
 0x301   : > { %1636 = vadd.xlane.f32.xlu0 %v1635_v26 }
 0x302   : > { %v971_v24 = vrot.slane %v970_v19, 4  ;;  %3735 = vmatmul.msk.f32.gmra.mxu1 %vm263_vm0, %v4217_v55  ;;  %v1600_v55 = vmul.f32 1.442695, %v1569_v23 }
 0x304   : > { %1038 = vperm.xlu1 %3921, %v5075_v21   ;;  %v972_v8 = vadd.f32 %v971_v24, %v970_v19 }
 0x305   : > { %v5100_v20 = vpop.xlane.xlu0 %883 }
 0x306   : > { %v973_v60 = vrot.slane %v972_v8, 2 }
 0x308   : > { %v974_v3 = vadd.f32 %v973_v60, %v972_v8 }
 0x309   : > { %1645 = vadd.xlane.f32.xlu0 %v1644_v46 }
 0x30a   : > { %v975_v50 = vrot.slane %v974_v3, 1 }
 0x30c   : > { %3923 = vset.pattern.permute.xlu1 %v4963_v11  ;;  %v976_v30 = vadd.f32 %v975_v50, %v974_v3 }
 0x30d   : > { %v1604_v36 = vpop.xlane.xlu1 %1603 }
 0x30e   : > { %4028 = vrcp.f32 %v1604_v36  ;;  %v5090_v19 = vmul.f32 %v5002_v12, %v976_v30 }
 0x314   : > { %v4029_v15 = vpop.eup %4028 }
 0x315   : > { %1032 = vperm.xlu2 %3922, %v1003_v63   ;;  %v1607_v49 = vpop.xlane.xlu2 %1606  ;;  %v1666_v7 = vmul.f32 %v4029_v15, %v4932_v38 }
 0x316   : > { %4030 = vrcp.f32 %v1607_v49 }
 0x317   : > { %4032 = vrcp.f32 %v863_v25  ;;  %v1682_v46 = vsel %vm456_vm1, %v1666_v7, 0.0  ;;  %v1567_v7 = vsub.f32 %v4849_v61, %v5027_v56 }
 0x318   : > { %4034 = vrcp.f32 %v5041_v57 }
 0x319   : > { %4036 = vrcp.f32 %v872_v6 }
 0x31a   : > { %4038 = vrcp.f32 %v5046_v13 }
 0x31b   : > { %4040 = vpow2.f32 %v1600_v55 }
 0x31c   : > { %v4031_v26 = vpop.eup %4030 }
 0x31d   : > { %v1667_v24 = vmul.f32 %v4031_v26, %v4939_v5  ;;  %1080 = vperm.xlu0 %3920, %v5090_v19   ;;  %v4033_v63 = vpop.eup %4032 }
 0x31e   : > { %v4035_v8 = vpop.eup %4034  ;;  %v913_v38 = vmul.f32 %v4033_v63, %v4860_v58  ;;  %v5116_v55 = vpop.xlane.xlu2 %889 }
 0x31f   : > { %v1683_v25 = vsel %vm456_vm1, %v1667_v24, 0.0  ;;  %v914_v60 = vmul.f32 %v4035_v8, %v4862_v22  ;;  %v4037_v49 = vpop.eup %4036 }
 0x320   : > { %v1684_v57 = vadd.f32 %v1683_v25, %v1682_v46  ;;  %v950_v40 = vsel %vm456_vm1, %v913_v38, 0.0  ;;  %v4039_v30 = vpop.eup %4038  ;;  %v916_v22 = vmul.f32 %v4037_v49, %v4881_v2  ;;  %v5114_v25 = vpop.xlane.xlu1 %886 }
 0x321   : > { %v951_v3 = vsel %vm456_vm1, %v914_v60, 0.0  ;;  %v5105_v15 = vpop.eup %4040  ;;  %v915_v26 = vmul.f32 %v4039_v30, %v4872_v4 }
 0x322   : > { %v1685_v36 = vrot.slane %v1684_v57, 4  ;;  %v952_v58 = vadd.f32 %v951_v3, %v950_v40  ;;  %v1647_v63 = vsel %vm456_vm1, %v5105_v15, 0.0  ;;  %v960_v46 = vsel %vm456_vm1, %v916_v22, 0.0 }
 0x323   : > { %v959_v56 = vsel %vm456_vm1, %v915_v26, 0.0 }
 0x324   : > { %v1686_v5 = vadd.f32 %v1685_v36, %v1684_v57  ;;  %v953_v8 = vrot.slane %v952_v58, 4  ;;  %v1596_v57 = vmul.f32 1.442695, %v1567_v7  ;;  %v961_v61 = vadd.f32 %v960_v46, %v959_v56 }
 0x325   : > { %3925 = vset.pattern.permute.xlu0 %v4949_v18 }
 0x326   : > { %v1687_v50 = vrot.slane %v1686_v5, 2  ;;  %v1610_v23 = vpop.xlane.xlu0 %1609  ;;  %v954_v4 = vadd.f32 %v953_v8, %v952_v58  ;;  %4042 = vpow2.f32 %v1596_v57  ;;  %v962_v60 = vrot.slane %v961_v61, 4 }
 0x327   : > { %4044 = vrcp.f32 %v1610_v23  ;;  %v1616_v40 = vpop.xlane.xlu2 %1615 }
 0x328   : > { %v1688_v6 = vadd.f32 %v1687_v50, %v1686_v5  ;;  %v955_v38 = vrot.slane %v954_v4, 2  ;;  %v963_v49 = vadd.f32 %v962_v60, %v961_v61 }
 0x32a   : > { %v1689_v13 = vrot.slane %v1688_v6, 1  ;;  %v956_v50 = vadd.f32 %v955_v38, %v954_v4 }
 0x32c   : > { %v1690_v24 = vadd.f32 %v1689_v13, %v1688_v6  ;;  %v5124_v3 = vpop.eup %4042  ;;  %v957_v22 = vrot.slane %v956_v50, 1  ;;  %v964_v13 = vrot.slane %v963_v49, 2 }
 0x32d   : > { %v4045_v6 = vpop.eup %4044  ;;  %v1641_v58 = vsel %vm456_vm1, %v5124_v3, 0.0 }
 0x32e   : > { %1648 = vadd.xlane.f32.xlu1 %v1647_v63  ;;  %v5119_v2 = vmul.f32 %v1690_v24, %v5002_v12  ;;  %v1619_v36 = vpop.xlane.xlu0 %1618  ;;  %v1668_v30 = vmul.f32 %v4045_v6, %v4968_v16  ;;  %v958_v57 = vadd.f32 %v957_v22, %v956_v50  ;;  %v965_v56 = vadd.f32 %v964_v13, %v963_v49 }
 0x330   : > { %1766 = vperm.xlu0 %3925, %v5119_v2   ;;  %v1691_v8 = vsel %vm456_vm1, %v1668_v30, 0.0  ;;  %v5135_v38 = vmul.f32 %v5002_v12, %v958_v57  ;;  %v966_v60 = vrot.slane %v965_v56, 1 }
 0x332   : > { %v967_v49 = vadd.f32 %v966_v60, %v965_v56 }
 0x336   : > { %v1613_v5 = vpop.xlane.xlu1 %1612  ;;  %v1628_v6 = vpop.xlane.xlu0 %1627 }
 0x337   : > { %4046 = vrcp.f32 %v1613_v5 }
 0x338   : > { %3926 = vset.pattern.permute.xlu0 %v4963_v11  ;;  %4048 = vrcp.f32 %v1619_v36 }
 0x339   : > { %4050 = vrcp.f32 %v1616_v40 }
 0x33d   : > { %v4047_v7 = vpop.eup %4046 }
 0x33e   : > { %1642 = vadd.xlane.f32.xlu2 %v1641_v58  ;;  %v1622_v26 = vpop.xlane.xlu1 %1621  ;;  %v4049_v23 = vpop.eup %4048  ;;  %v1669_v24 = vmul.f32 %v4047_v7, %v4995_v9 }
 0x33f   : > { %v4051_v63 = vpop.eup %4050  ;;  %v1671_v16 = vmul.f32 %v4049_v23, %v4978_v14 }
 0x340   : > { %v1692_v46 = vsel %vm456_vm1, %v1669_v24, 0.0  ;;  %v1670_v4 = vmul.f32 %v4051_v63, %v4971_v10  ;;  %v1006_v10 = vmul.f32 %v5002_v12, %v967_v49 }
 0x341   : > { %v1693_v61 = vadd.f32 %v1692_v46, %v1691_v8  ;;  %v1701_v5 = vsel %vm456_vm1, %v1671_v16, 0.0 }
 0x342   : > { %v1700_v40 = vsel %vm456_vm1, %v1670_v4, 0.0 }
 0x343   : > { %v1694_v36 = vrot.slane %v1693_v61, 4  ;;  %v1702_v50 = vadd.f32 %v1701_v5, %v1700_v40 }
 0x345   : > { %v1695_v14 = vadd.f32 %v1694_v36, %v1693_v61  ;;  %v1703_v58 = vrot.slane %v1702_v50, 4 }
 0x346   : > { %v1631_v9 = vpop.xlane.xlu1 %1630 }
 0x347   : > { %1056 = vperm.xlu1 %3923, %v5135_v38   ;;  %4052 = vrcp.f32 %v1631_v9  ;;  %v1696_v30 = vrot.slane %v1695_v14, 2  ;;  %v1704_v23 = vadd.f32 %v1703_v58, %v1702_v50 }
 0x348   : > { %4054 = vrcp.f32 %v1628_v6 }
 0x349   : > { %v1697_v7 = vadd.f32 %v1696_v30, %v1695_v14  ;;  %v1705_v46 = vrot.slane %v1704_v23, 2  ;;  %4056 = vrcp.f32 %v1622_v26  ;;  %v5154_v49 = vpop.permute.xlu0 %1020 }
 0x34a   : > { %4058 = vrcp.f32 %v5100_v20 }
 0x34b   : > { %v1698_v8 = vrot.slane %v1697_v7, 1  ;;  %v1706_v4 = vadd.f32 %v1705_v46, %v1704_v23 }
 0x34d   : > { %v4053_v22 = vpop.eup %4052  ;;  %v1699_v61 = vadd.f32 %v1698_v8, %v1697_v7  ;;  %v1707_v36 = vrot.slane %v1706_v4, 1 }
 0x34e   : > { %v4055_v13 = vpop.eup %4054  ;;  %v1675_v24 = vmul.f32 %v4053_v22, %v5015_v59 }
 0x34f   : > { %1068 = vperm.xlu1 %3923, %v1006_v10   ;;  %v1674_v63 = vmul.f32 %v4055_v13, %v4988_v34  ;;  %v1755_v60 = vmul.f32 %v1699_v61, %v5002_v12  ;;  %v5149_v34 = vpop.permute.xlu2 %1014  ;;  %v1708_v59 = vadd.f32 %v1707_v36, %v1706_v4  ;;  %v4057_v50 = vpop.eup %4056 }
 0x350   : > { %v1719_v57 = vsel %vm456_vm1, %v1675_v24, 0.0  ;;  %v4059_v30 = vpop.eup %4058  ;;  %v1672_v58 = vmul.f32 %v4057_v50, %v5006_v45 }
 0x351   : > { %v1718_v56 = vsel %vm456_vm1, %v1674_v63, 0.0  ;;  %v920_v7 = vmul.f32 %v4059_v30, %v4924_v1 }
 0x352   : > { %v1720_v16 = vadd.f32 %v1719_v57, %v1718_v56 }
 0x354   : > { %v1721_v5 = vrot.slane %v1720_v16, 4 }
 0x356   : > { %1044 = vperm.xlu2 %3922, %v5075_v21   ;;  %v1722_v9 = vadd.f32 %v1721_v5, %v1720_v16  ;;  %v1756_v21 = vmul.f32 %v1708_v59, %v5002_v12 }
 0x357   : > { %1772 = vperm.xlu1 %3923, %v5119_v2  }
 0x358   : > { %v1723_v2 = vrot.slane %v1722_v9, 2 }
 0x35a   : > { %v1724_v6 = vadd.f32 %v1723_v2, %v1722_v9 }
 0x35c   : > { %v1725_v14 = vrot.slane %v1724_v6, 1 }
 0x35e   : > { %3924 = vset.pattern.permute.xlu2 %v4949_v18  ;;  %v1726_v13 = vadd.f32 %v1725_v14, %v1724_v6 }
 0x35f   : > { %1784 = vperm.xlu1 %3923, %v1755_v60  }
 0x366   : > { %1062 = vperm.xlu2 %3924, %v1006_v10  }
 0x367   : > { %1796 = vperm.xlu1 %3923, %v1756_v21  }
 0x368   : > { %v1625_v40 = vpop.xlane.xlu2 %1624 }
 0x369   : > { %4060 = vrcp.f32 %v1625_v40 }
 0x36a   : > { %4062 = vrcp.f32 %v5085_v17  ;;  %v1709_v17 = vsel %vm456_vm1, %v1672_v58, 0.0 }
 0x36e   : > { %1074 = vperm.xlu2 %3924, %v5090_v19   ;;  %v1758_v19 = vmul.f32 %v1726_v13, %v5002_v12 }
 0x36f   : > { %v4061_v26 = vpop.eup %4060  ;;  %3927 = vset.pattern.permute.xlu1 %v4949_v18 }
 0x370   : > { %v1673_v10 = vmul.f32 %v4061_v26, %v5052_v28  ;;  %v1634_v20 = vpop.xlane.xlu2 %1633  ;;  %v4063_v22 = vpop.eup %4062  ;;  %v978_v28 = vsel %vm456_vm1, %v920_v7, 0.0 }
 0x371   : > { %4064 = vrcp.f32 %v1634_v20  ;;  %v919_v45 = vmul.f32 %v4063_v22, %v4907_v62  ;;  %v1640_v26 = vpop.xlane.xlu1 %1639 }
 0x372   : > { %v1710_v23 = vsel %vm456_vm1, %v1673_v10, 0.0 }
 0x373   : > { %v1711_v24 = vadd.f32 %v1710_v23, %v1709_v17  ;;  %v977_v1 = vsel %vm456_vm1, %v919_v45, 0.0 }
 0x374   : > { %v1637_v63 = vpop.xlane.xlu0 %1636  ;;  %v979_v56 = vadd.f32 %v978_v28, %v977_v1 }
 0x375   : > { %4066 = vrcp.f32 %v1637_v63  ;;  %v1712_v8 = vrot.slane %v1711_v24, 4 }
 0x376   : > { %1778 = vperm.xlu2 %3924, %v1755_v60   ;;  %v980_v59 = vrot.slane %v979_v56, 4 }
 0x377   : > { %v4065_v46 = vpop.eup %4064  ;;  %1814 = vperm.xlu1 %3927, %v1758_v19   ;;  %v1713_v57 = vadd.f32 %v1712_v8, %v1711_v24 }
 0x378   : > { %v1676_v61 = vmul.f32 %v4065_v46, %v5059_v42  ;;  %v981_v14 = vadd.f32 %v980_v59, %v979_v56  ;;  %v5185_v56 = vpop.permute.xlu2 %1032 }
 0x379   : > { %v1714_v16 = vrot.slane %v1713_v57, 2  ;;  %v5175_v7 = vpop.permute.xlu1 %1026 }
 0x37a   : > { %v1727_v9 = vsel %vm456_vm1, %v1676_v61, 0.0  ;;  %v982_v58 = vrot.slane %v981_v14, 2 }
 0x37b   : > { %v4067_v4 = vpop.eup %4066  ;;  %v1715_v36 = vadd.f32 %v1714_v16, %v1713_v57 }
 0x37c   : > { %v1677_v62 = vmul.f32 %v4067_v4, %v5065_v52  ;;  %v983_v20 = vadd.f32 %v982_v58, %v981_v14  ;;  %v1646_v45 = vpop.xlane.xlu0 %1645 }
 0x37d   : > { %v1716_v5 = vrot.slane %v1715_v36, 1  ;;  %4068 = vrcp.f32 %v1646_v45 }
 0x37e   : > { %v1728_v2 = vsel %vm456_vm1, %v1677_v62, 0.0  ;;  %1790 = vperm.xlu2 %3924, %v1756_v21   ;;  %v984_v13 = vrot.slane %v983_v20, 1  ;;  %4070 = vrcp.f32 %v5116_v55 }
 0x37f   : > { %v1729_v60 = vadd.f32 %v1728_v2, %v1727_v9  ;;  %v1717_v40 = vadd.f32 %v1716_v5, %v1715_v36  ;;  %4072 = vrcp.f32 %v5114_v25  ;;  %v5194_v2 = vpop.f32.mrf.mxu1 }
 0x380   : > { %v985_v17 = vadd.f32 %v984_v13, %v983_v20 }
 0x381   : > { %v1757_v6 = vmul.f32 %v1717_v40, %v5002_v12  ;;  %v1730_v50 = vrot.slane %v1729_v60, 4  ;;  %v5178_v24 = vpop.permute.xlu1 %1038 }
 0x382   : > { %v1008_v23 = vmul.f32 %v5002_v12, %v985_v17 }
 0x383   : > { %1808 = vperm.xlu0 %3926, %v1757_v6   ;;  %v1731_v30 = vadd.f32 %v1730_v50, %v1729_v60  ;;  %v4069_v8 = vpop.eup %4068 }
 0x384   : > { %v4071_v28 = vpop.eup %4070 }
 0x385   : > { %v1732_v42 = vrot.slane %v1731_v30, 2  ;;  %v4073_v46 = vpop.eup %4072  ;;  %v922_v1 = vmul.f32 %v4071_v28, %v4957_v32 }
 0x386   : > { %1802 = vperm.xlu2 %3924, %v1757_v6   ;;  %v921_v55 = vmul.f32 %v4073_v46, %v4943_v47 }
 0x387   : > { %v1733_v52 = vadd.f32 %v1732_v42, %v1731_v30  ;;  %v987_v4 = vsel %vm456_vm1, %v922_v1, 0.0  ;;  %v5201_v20 = vpop.f32.mrf.mxu1 }
 0x388   : > { %v986_v62 = vsel %vm456_vm1, %v921_v55, 0.0 }
 0x389   : > { %v1734_v10 = vrot.slane %v1733_v52, 1  ;;  %v988_v32 = vadd.f32 %v987_v4, %v986_v62 }
 0x38b   : > { %v1735_v22 = vadd.f32 %v1734_v10, %v1733_v52  ;;  %3929 = vset.pattern.permute.xlu0 %v4949_v18  ;;  %v989_v9 = vrot.slane %v988_v32, 4 }
 0x38d   : > { %v1759_v21 = vmul.f32 %v1735_v22, %v5002_v12  ;;  %v990_v50 = vadd.f32 %v989_v9, %v988_v32 }
 0x38e   : > { %3928 = vset.pattern.permute.xlu2 %v4963_v11 }
 0x38f   : > { %1826 = vperm.xlu1 %3927, %v1759_v21   ;;  %v991_v10 = vrot.slane %v990_v50, 2 }
 0x391   : > { %v992_v13 = vadd.f32 %v991_v10, %v990_v50  ;;  %v5302_v10 = vpop.permute.xlu0 %1080 }
 0x396   : > { %1820 = vperm.xlu2 %3928, %v1758_v19   ;;  %v1680_v19 = vmul.f32 %v4069_v8, %v5078_v54 }
 0x397   : > { %1086 = vperm.xlu1 %3927, %v1008_v23  }
 0x398   : > { %v1745_v61 = vsel %vm456_vm1, %v1680_v19, 0.0 }
 0x39e   : > { %1832 = vperm.xlu2 %3928, %v1759_v21  }
 0x39f   : > { %3930 = vset.pattern.permute.xlu1 %v4963_v11 }
 0x3a1   : > { %v1649_v63 = vpop.xlane.xlu1 %1648 }
 0x3a2   : > { %4074 = vrcp.f32 %v1649_v63 }
 0x3a3   : > { %4076 = vrcp.f32 %v1640_v26 }
 0x3a6   : > { %1092 = vperm.xlu2 %3928, %v1008_v23   ;;  %v993_v23 = vrot.slane %v992_v13, 1 }
 0x3a8   : > { %v4075_v57 = vpop.eup %4074  ;;  %v994_v8 = vadd.f32 %v993_v23, %v992_v13 }
 0x3a9   : > { %v1681_v16 = vmul.f32 %v4075_v57, %v5105_v15  ;;  %v4077_v47 = vpop.eup %4076 }
 0x3aa   : > { %v1678_v6 = vmul.f32 %v4077_v47, %v5032_v43  ;;  %v1009_v57 = vmul.f32 %v5002_v12, %v994_v8 }
 0x3ab   : > { %v1746_v25 = vsel %vm456_vm1, %v1681_v16, 0.0 }
 0x3ac   : > { %v1747_v36 = vadd.f32 %v1746_v25, %v1745_v61  ;;  %v1736_v26 = vsel %vm456_vm1, %v1678_v6, 0.0 }
 0x3ae   : > { %v1748_v54 = vrot.slane %v1747_v36, 4  ;;  %3931 = vset.pattern.permute.xlu2 %v4949_v18 }
 0x3b0   : > { %v1749_v5 = vadd.f32 %v1748_v54, %v1747_v36 }
 0x3b1   : > { %v1643_v59 = vpop.xlane.xlu2 %1642 }
 0x3b2   : > { %4078 = vrcp.f32 %v1643_v59  ;;  %v1750_v15 = vrot.slane %v1749_v5, 2 }
 0x3b4   : > { %v1751_v60 = vadd.f32 %v1750_v15, %v1749_v5 }
 0x3b6   : > { %v1752_v40 = vrot.slane %v1751_v60, 1 }
 0x3b8   : > { %v4079_v14 = vpop.eup %4078  ;;  %v1753_v30 = vadd.f32 %v1752_v40, %v1751_v60  ;;  %v443_v60 = vld [vmem:[%s6120_s3 + $0x8] sm:$0xff]  ;;  %v442_v40 = vld [vmem:[%s6120_s3] sm:$0xff] }
 0x3b9   : > { %v1679_v42 = vmul.f32 %v4079_v14, %v5124_v3  ;;  %v5204_v3 = vpop.f32.mrf.mxu1  ;;  %v5206_v46 = vpop.permute.xlu2 %1044  ;;  %2024 = vmatpush.msra.mxu3 %v443_v60 }
 0x3ba   : > { %v1761_v58 = vmul.f32 %v1753_v30, %v5002_v12  ;;  %v5243_v62 = vpop.permute.xlu1 %1056  ;;  %v4218_v30 = vld [vmem:[%s6119_s2] sm:$0x3] }
 0x3bb   : > { %v1737_v52 = vsel %vm456_vm1, %v1679_v42, 0.0  ;;  %2025 = vmatpush.msra.mxu3 %v442_v40  ;;  %v5290_v42 = vperm.slane %v4218_v30, 1 }
 0x3bc   : > { %v1738_v22 = vadd.f32 %v1737_v52, %v1736_v26  ;;  %1850 = vperm.xlu2 %3931, %v1761_v58  }
 0x3bd   : > { %v5296_v26 = vadd.f32 %v5201_v20, %v5290_v42  ;;  %v5300_v52 = vadd.f32 %v5194_v2, %v5290_v42  ;;  %v5320_v23 = vadd.f32 %v5204_v3, %v5290_v42 }
 0x3be   : > { %v1739_v21 = vrot.slane %v1738_v22, 4 }
 0x3bf   : > { %v1106_v20 = vmul.f32 %v5149_v34, %v5300_v52  ;;  %6172 = vst [vmem:[#allocation14_spill] sm:$0xff] %v5320_v23 }
 0x3c0   : > { %v1740_v17 = vadd.f32 %v1739_v21, %v1738_v22  ;;  %v1107_v21 = vmul.f32 %v5154_v49, %v5296_v26 }
 0x3c1   : > { %v403_v1 = vpop.f32.mrf.mxu1  ;;  %v5210_v16 = vpop.permute.xlu2 %1062  ;;  %v1122_v49 = vsel %vm456_vm1, %v1106_v20, 0.0 }
 0x3c2   : > { %v1741_v43 = vrot.slane %v1740_v17, 2  ;;  %v5259_v5 = vpop.permute.xlu1 %1068  ;;  %v5315_v2 = vadd.f32 %v403_v1, %v5290_v42 }
 0x3c4   : > { %3933 = vset.pattern.permute.xlu2 %v4963_v11  ;;  %v1742_v45 = vadd.f32 %v1741_v43, %v1740_v17  ;;  %6171 = vst [vmem:[#allocation13_spill] sm:$0xff] %v5315_v2  ;;  %v1123_v43 = vsel %vm456_vm1, %v1107_v21, 0.0  ;;  %v1109_v8 = vmul.f32 %v5185_v56, %v5315_v2 }
 0x3c6   : > { %v1743_v63 = vrot.slane %v1742_v45, 1  ;;  %v1132_v60 = vsel %vm456_vm1, %v1109_v8, 0.0 }
 0x3c8   : > { %v1744_v28 = vadd.f32 %v1743_v63, %v1742_v45  ;;  %v1767_v45 = vpop.permute.xlu0 %1766  ;;  %v1124_v63 = vadd.f32 %v1123_v43, %v1122_v49 }
 0x3c9   : > { %v5216_v55 = vpop.f32.mrf.mxu1  ;;  %v5221_v61 = vpop.permute.xlu2 %1074 }
 0x3ca   : > { %v1760_v19 = vmul.f32 %v1744_v28, %v5002_v12  ;;  %v1773_v9 = vpop.permute.xlu1 %1772  ;;  %v6173_v28 = vld [vmem:[#allocation12_spill] sm:$0xff]  ;;  %v1125_v3 = vrot.slane %v1124_v63, 4  ;;  %v5339_v56 = vadd.f32 %v5216_v55, %v5290_v42 }
 0x3cc   : > { %1844 = vperm.xlu1 %3930, %v1760_v19   ;;  %1838 = vperm.xlu0 %3929, %v1760_v19   ;;  %v6174_v19 = vld [vmem:[#allocation10_spill] sm:$0xff]  ;;  %6175 = vst [vmem:[#allocation12_spill] sm:$0xff] %v5339_v56 }
 0x3cd   : > { %1104 = vperm.xlu2 %3933, %v1009_v57  }
 0x3d1   : > { %v5231_v25 = vpop.permute.xlu2 %1778 }
 0x3d2   : > { %v1785_v50 = vpop.permute.xlu1 %1784  ;;  %v1860_v55 = vmul.f32 %v5231_v25, %v5320_v23 }
 0x3d4   : > { %1050 = vperm.xlu0 %3929, %v5135_v38   ;;  %1856 = vperm.xlu1 %3930, %v1761_v58   ;;  %v5225_v38 = vpop.f32.mrf.mxu1 }
 0x3d5   : > { %2153 = vrot.lane.b32.xlu2 %v4514_v41, %s4287_s7  ;;  %v5343_v21 = vadd.f32 %v5225_v38, %v5290_v42  ;;  %v1861_v38 = vmul.f32 %v1785_v50, %v5315_v2 }
 0x3d6   : > { %3934 = vset.pattern.permute.xlu2 %v4949_v18 }
 0x3d7   : > { %6176 = vst [vmem:[#allocation10_spill] sm:$0xff] %v5343_v21 }
 0x3d9   : > { %v5241_v36 = vpop.permute.xlu2 %1790 }
 0x3da   : > { %v1797_v22 = vpop.permute.xlu1 %1796 }
 0x3dc   : > { %2036 = vrot.lane.b32.xlu0 %v4464_v29, %s4287_s7  ;;  %3932 = vset.pattern.permute.xlu1 %v4949_v18  ;;  %v5239_v4 = vpop.f32.mrf.mxu1 }
 0x3dd   : > { %2075 = vrot.lane.b32.xlu2 %v4478_v33, %s4287_s7  ;;  %v5347_v49 = vadd.f32 %v5239_v4, %v5290_v42  ;;  %v1863_v4 = vmul.f32 %v1797_v22, %v5343_v21  ;;  %v1885_v22 = vsel %vm1874_vm3, %v1861_v38, 0.0 }
 0x3e1   : > { %v5251_v32 = vpop.permute.xlu2 %1802 }
 0x3e2   : > { %v1864_v50 = vmul.f32 %v5251_v32, %v5347_v49 }
 0x3e4   : > { %2151 = vrot.lane.b32.xlu0 %v4505_v39, %s4287_s7  ;;  %1098 = vperm.xlu1 %3932, %v1009_v57   ;;  %v415_v54 = vpop.f32.mrf.mxu1  ;;  %v1108_v57 = vmul.f32 %v5175_v7, %v5320_v23  ;;  %v1126_v7 = vadd.f32 %v1125_v3, %v1124_v63  ;;  %v1862_v63 = vmul.f32 %v5241_v36, %v5339_v56  ;;  %v1884_v36 = vsel %vm1874_vm3, %v1860_v55, 0.0 }
 0x3e5   : > { %2034 = vrot.lane.b32.xlu2 %v4455_v27, %s4287_s7  ;;  %v5350_v8 = vadd.f32 %v415_v54, %v5290_v42  ;;  %v1858_v3 = vmul.f32 %v1767_v45, %v5300_v52 }
 0x3e6   : > { %v1131_v30 = vsel %vm456_vm1, %v1108_v57, 0.0  ;;  %v1859_v57 = vmul.f32 %v1773_v9, %v5296_v26  ;;  %v1893_v45 = vsel %vm1874_vm3, %v1862_v63, 0.0 }
 0x3e7   : > { %v1133_v20 = vadd.f32 %v1132_v60, %v1131_v30  ;;  %6177 = vst [vmem:[#allocation15_spill] sm:$0xff] %v5350_v8  ;;  %v1127_v30 = vrot.slane %v1126_v7, 2  ;;  %v1875_v32 = vsel %vm1874_vm3, %v1858_v3, 0.0  ;;  %v1111_v3 = vmul.f32 %v5206_v46, %v5343_v21 }
 0x3e8   : > { %v1876_v25 = vsel %vm1874_vm3, %v1859_v57, 0.0 }
 0x3e9   : > { %v1815_v34 = vpop.permute.xlu1 %1814  ;;  %v1134_v60 = vrot.slane %v1133_v20, 4  ;;  %v1877_v63 = vadd.f32 %v1876_v25, %v1875_v32 }
 0x3eb   : > { %v1135_v55 = vadd.f32 %v1134_v60, %v1133_v20 }
 0x3ec   : > { %2147 = vrot.lane.b32.xlu0 %v4505_v39, %s4288_s17  ;;  %2114 = vrot.lane.b32.xlu1 %v4496_v37, %s4287_s7  ;;  %v5261_v59 = vpop.f32.mrf.mxu1 }
 0x3ed   : > { %2030 = vrot.lane.b32.xlu2 %v4455_v27, %s4288_s17  ;;  %v1136_v25 = vrot.slane %v1135_v55, 2 }
 0x3f0   : > { %v5263_v15 = vpop.permute.xlu2 %1820 }
 0x3f4   : > { %2069 = vrot.lane.b32.xlu0 %v4471_v31, %s4288_s17  ;;  %2112 = vrot.lane.b32.xlu1 %v4487_v35, %s4287_s7  ;;  %v5269_v47 = vpop.f32.mrf.mxu1 }
 0x3f5   : > { %2149 = vrot.lane.b32.xlu2 %v4514_v41, %s4288_s17  ;;  %v1809_v43 = vpop.permute.xlu0 %1808 }
 0x3f6   : > { %v1865_v54 = vmul.f32 %v1809_v43, %v5350_v8  ;;  %v1894_v43 = vsel %vm1874_vm3, %v1863_v4, 0.0 }
 0x3f7   : > { %v1895_v2 = vadd.f32 %v1894_v43, %v1893_v45 }
 0x3f8   : > { %v5279_v6 = vpop.permute.xlu2 %1832  ;;  %v1903_v57 = vsel %vm1874_vm3, %v1865_v54, 0.0 }
 0x3f9   : > { %v1896_v46 = vrot.slane %v1895_v2, 4 }
 0x3fc   : > { %2270 = vrot.lane.b32.xlu0 %v4558_v53, %s4287_s7  ;;  %2108 = vrot.lane.b32.xlu1 %v4487_v35, %s4288_s17  ;;  %v424_v14 = vpop.f32.mrf.mxu1  ;;  %v5376_v35 = vadd.f32 %v5261_v59, %v5290_v42  ;;  %v1902_v59 = vsel %vm1874_vm3, %v1864_v50, 0.0  ;;  %v1878_v50 = vrot.slane %v1877_v63, 4 }
 0x3fd   : > { %2032 = vrot.lane.b32.xlu2 %v4464_v29, %s4288_s17  ;;  %v5364_v39 = vadd.f32 %v424_v14, %v5290_v42  ;;  %v5380_v14 = vadd.f32 %v5269_v47, %v5290_v42  ;;  %v1904_v20 = vadd.f32 %v1903_v57, %v1902_v59 }
 0x3fe   : > { %6179 = vst [vmem:[#allocation17_spill] sm:$0xff] %v5376_v35  ;;  %v1866_v54 = vmul.f32 %v1815_v34, %v5376_v35 }
 0x3ff   : > { %6178 = vst [vmem:[#allocation16_spill] sm:$0xff] %v5364_v39  ;;  %v1867_v47 = vmul.f32 %v5263_v15, %v5380_v14 }
 0x400   : > { %v5292_v58 = vpop.permute.xlu2 %1092  ;;  %6180 = vst [vmem:[#allocation18_spill] sm:$0xff] %v5380_v14  ;;  %v1911_v57 = vsel %vm1874_vm3, %v1866_v54, 0.0 }
 0x401   : > { %v1912_v43 = vsel %vm1874_vm3, %v1867_v47, 0.0 }
 0x402   : > { %v1913_v47 = vadd.f32 %v1912_v43, %v1911_v57 }
 0x404   : > { %2073 = vrot.lane.b32.xlu1 %v4471_v31, %s4287_s7  ;;  %v427_v17 = vpop.f32.mrf.mxu1 }
 0x405   : > { %2268 = vrot.lane.b32.xlu2 %v4553_v51, %s4287_s7  ;;  %v5385_v38 = vadd.f32 %v427_v17, %v5290_v42 }
 0x407   : > { %6181 = vst [vmem:[#allocation19_spill] sm:$0xff] %v5385_v38  ;;  %v1869_v17 = vmul.f32 %v5279_v6, %v5385_v38  ;;  %v1141_v6 = vsel %vm456_vm1, %v1111_v3, 0.0  ;;  %v445_v3 = vld [vmem:[%s6120_s3 + $0x18] sm:$0xff] }
 0x408   : > { %1987 = vmatpush.msra.mxu2 %v445_v3 }
 0x409   : > { %v1921_v34 = vsel %vm1874_vm3, %v1869_v17, 0.0 }
 0x40c   : > { %2110 = vrot.lane.b32.xlu1 %v4496_v37, %s4288_s17  ;;  %v5334_v40 = vpop.f32.mrf.mxu1  ;;  %v1886_v37 = vadd.f32 %v1885_v22, %v1884_v36  ;;  %v5403_v22 = vadd.f32 %v1127_v30, %v1126_v7  ;;  %v1117_v7 = vmul.f32 %v5302_v10, %v5385_v38  ;;  %v1879_v30 = vadd.f32 %v1878_v50, %v1877_v63 }
 0x40d   : > { %2264 = vrot.lane.b32.xlu2 %v4553_v51, %s4288_s17  ;;  %v1827_v51 = vpop.permute.xlu1 %1826  ;;  %v5425_v10 = vadd.f32 %v5334_v40, %v5290_v42 }
 0x40e   : > { %v1868_v4 = vmul.f32 %v1827_v51, %v5364_v39  ;;  %v1110_v51 = vmul.f32 %v5178_v24, %v5339_v56  ;;  %v1887_v45 = vrot.slane %v1886_v37, 4  ;;  %v1905_v24 = vrot.slane %v1904_v20, 4 }
 0x40f   : > { %v5411_v56 = vadd.f32 %v1136_v25, %v1135_v55  ;;  %v1113_v55 = vmul.f32 %v5243_v62, %v5350_v8  ;;  %6182 = vst [vmem:[#allocation20_spill] sm:$0xff] %v5425_v10  ;;  %v1115_v25 = vmul.f32 %v5259_v5, %v5380_v14  ;;  %v1116_v62 = vmul.f32 %v5221_v61, %v5364_v39 }
 0x410   : > { %v1920_v15 = vsel %vm1874_vm3, %v1868_v4, 0.0  ;;  %v1140_v32 = vsel %vm456_vm1, %v1110_v51, 0.0  ;;  %v1888_v21 = vadd.f32 %v1887_v45, %v1886_v37  ;;  %v1897_v51 = vadd.f32 %v1896_v46, %v1895_v2  ;;  %v444_v37 = vld [vmem:[%s6120_s3 + $0x10] sm:$0xff] }
 0x411   : > { %v1922_v59 = vadd.f32 %v1921_v34, %v1920_v15  ;;  %v1142_v17 = vadd.f32 %v1141_v6, %v1140_v32  ;;  %v1906_v54 = vadd.f32 %v1905_v24, %v1904_v20  ;;  %v1114_v2 = vmul.f32 %v5210_v16, %v5376_v35  ;;  %1988 = vmatpush.msra.mxu2 %v444_v37 }
 0x412   : > { %v1880_v15 = vrot.slane %v1879_v30, 2  ;;  %v1168_v16 = vsel %vm456_vm1, %v1117_v7, 0.0  ;;  %v1889_v24 = vrot.slane %v1888_v21, 2  ;;  %v1898_v5 = vrot.slane %v1897_v51, 2 }
 0x413   : > { %v1923_v20 = vrot.slane %v1922_v59, 4  ;;  %v1143_v6 = vrot.slane %v1142_v17, 4  ;;  %v1907_v34 = vrot.slane %v1906_v54, 2  ;;  %v1158_v3 = vsel %vm456_vm1, %v1114_v2, 0.0 }
 0x414   : > { %2309 = vrot.lane.b32.xlu1 %v4591_v0, %s4287_s7  ;;  %v1159_v37 = vsel %vm456_vm1, %v1115_v25, 0.0  ;;  %v1150_v7 = vsel %vm456_vm1, %v1113_v55, 0.0  ;;  %v1881_v38 = vadd.f32 %v1880_v15, %v1879_v30  ;;  %v1899_v8 = vadd.f32 %v1898_v5, %v1897_v51 }
 0x415   : > { %2229 = vrot.lane.b32.xlu2 %v4541_v48, %s4287_s7  ;;  %v5400_v60 = vpop.permute.xlu1 %1086  ;;  %v1144_v39 = vadd.f32 %v1143_v6, %v1142_v17  ;;  %v1908_v23 = vadd.f32 %v1907_v34, %v1906_v54 }
 0x416   : > { %v5312_v13 = vpop.permute.xlu2 %1850  ;;  %v1118_v55 = vmul.f32 %v5400_v60, %v5425_v10  ;;  %v1900_v15 = vrot.slane %v1899_v8, 1 }
 0x417   : > { %v1145_v34 = vrot.slane %v1144_v39, 2 }
 0x418   : > { %v1176_v6 = vsel %vm456_vm1, %v1118_v55, 0.0 }
 0x41c   : > { %2192 = vrot.lane.b32.xlu1 %v4527_v44, %s4287_s7 }
 0x41d   : > { %2266 = vrot.lane.b32.xlu2 %v4558_v53, %s4288_s17 }
 0x424   : > { %2307 = vrot.lane.b32.xlu1 %v6173_v28, %s4287_s7 }
 0x425   : > { %2227 = vrot.lane.b32.xlu2 %v6174_v19, %s4288_s17 }
 0x427   : > { %v5331_v1 = vpop.permute.xlu2 %1104 }
 0x42c   : > { %2303 = vrot.lane.b32.xlu1 %v6173_v28, %s4288_s17 }
 0x42f   : > { %v2154_v9 = vpop.permute.xlu2 %2153 }
 0x430   : > { %3814 = vmatpush.xpose.msk.msrb.mxu3 %vm456_vm1, %v2154_v9  ;;  %v433_v9 = vpop.f32.mrf.mxu1 }
 0x431   : > { %v5428_v63 = vadd.f32 %v433_v9, %v5290_v42  ;;  %v1914_v9 = vrot.slane %v1913_v47, 4 }
 0x433   : > { %6183 = vst [vmem:[#allocation21_spill] sm:$0xff] %v5428_v63  ;;  %v1915_v35 = vadd.f32 %v1914_v9, %v1913_v47  ;;  %v1909_v9 = vrot.slane %v1908_v23, 1 }
 0x434   : > { %2225 = vrot.lane.b32.xlu1 %v4541_v48, %s4288_s17 }
 0x435   : > { %v1916_v17 = vrot.slane %v1915_v35, 2 }
 0x437   : > { %v2076_v36 = vpop.permute.xlu2 %2075 }
 0x438   : > { %3806 = vmatpush.xpose.msk.msrb.mxu1 %vm456_vm1, %v2076_v36  ;;  %v436_v4 = vpop.f32.mrf.mxu1 }
 0x439   : > { %v5445_v61 = vadd.f32 %v436_v4, %v5290_v42  ;;  %v1890_v4 = vadd.f32 %v1889_v24, %v1888_v21  ;;  %v1882_v21 = vrot.slane %v1881_v38, 1 }
 0x43b   : > { %v1872_v2 = vmul.f32 %v5312_v13, %v5445_v61  ;;  %v1891_v13 = vrot.slane %v1890_v4, 1 }
 0x43c   : > { %2188 = vrot.lane.b32.xlu1 %v4527_v44, %s4288_s17  ;;  %v1167_v44 = vsel %vm456_vm1, %v1116_v62, 0.0 }
 0x43d   : > { %v1938_v60 = vsel %vm1874_vm3, %v1872_v2, 0.0 }
 0x43e   : > { %v1839_v50 = vpop.permute.xlu0 %1838  ;;  %v1845_v40 = vpop.permute.xlu1 %1844 }
 0x43f   : > { %v1870_v45 = vmul.f32 %v1839_v50, %v5425_v10  ;;  %v1871_v46 = vmul.f32 %v1845_v40, %v5428_v63  ;;  %v5441_v43 = vpop.permute.xlu2 %2034  ;;  %v1924_v50 = vadd.f32 %v1923_v20, %v1922_v59  ;;  %v1169_v59 = vadd.f32 %v1168_v16, %v1167_v44 }
 0x440   : > { %v439_v40 = vpop.f32.mrf.mxu1  ;;  %v1119_v44 = vmul.f32 %v5292_v58, %v5428_v63 }
 0x441   : > { %v1929_v32 = vsel %vm1874_vm3, %v1870_v45, 0.0  ;;  %v1930_v57 = vsel %vm1874_vm3, %v1871_v46, 0.0  ;;  %v1160_v45 = vadd.f32 %v1159_v37, %v1158_v3  ;;  %v5456_v25 = vadd.f32 %v439_v40, %v5290_v42 }
 0x442   : > { %v1931_v36 = vadd.f32 %v1930_v57, %v1929_v32  ;;  %v1925_v20 = vrot.slane %v1924_v50, 2  ;;  %v1917_v57 = vadd.f32 %v1916_v17, %v1915_v35  ;;  %v1892_v37 = vadd.f32 %v1891_v13, %v1890_v4 }
 0x443   : > { %v1161_v32 = vrot.slane %v1160_v45, 4  ;;  %v1177_v58 = vsel %vm456_vm1, %v1119_v44, 0.0  ;;  %v1170_v2 = vrot.slane %v1169_v59, 4  ;;  %v1146_v4 = vadd.f32 %v1145_v34, %v1144_v39 }
 0x444   : > { %v1932_v14 = vrot.slane %v1931_v36, 4  ;;  %v1926_v16 = vadd.f32 %v1925_v20, %v1924_v50  ;;  %v1178_v63 = vadd.f32 %v1177_v58, %v1176_v6 }
 0x445   : > { %v1171_v44 = vadd.f32 %v1170_v2, %v1169_v59  ;;  %v1138_v59 = vrot.slane %v5411_v56, 1 }
 0x446   : > { %v1933_v62 = vadd.f32 %v1932_v14, %v1931_v36  ;;  %v1051_v30 = vpop.permute.xlu0 %1050  ;;  %v1857_v47 = vpop.permute.xlu1 %1856  ;;  %v1927_v10 = vrot.slane %v1926_v16, 1 }
 0x447   : > { %v1112_v51 = vmul.f32 %v1051_v30, %v5347_v49  ;;  %v1873_v54 = vmul.f32 %v1857_v47, %v5456_v25  ;;  %v2031_v46 = vpop.permute.xlu2 %2030  ;;  %v1883_v47 = vadd.f32 %v1882_v21, %v1881_v38  ;;  %v1179_v38 = vrot.slane %v1178_v63, 4 }
 0x448   : > { %v1934_v42 = vrot.slane %v1933_v62, 2  ;;  %v1928_v21 = vadd.f32 %v1927_v10, %v1926_v16  ;;  %v1121_v10 = vmul.f32 %v5331_v1, %v5456_v25  ;;  %v1139_v1 = vadd.f32 %v1138_v59, %v5411_v56 }
 0x449   : > { %v1149_v14 = vsel %vm456_vm1, %v1112_v51, 0.0  ;;  %v1939_v36 = vsel %vm1874_vm3, %v1873_v54, 0.0  ;;  %v1901_v51 = vadd.f32 %v1900_v15, %v1899_v8  ;;  %v1910_v54 = vadd.f32 %v1909_v9, %v1908_v23 }
 0x44a   : > { %v1151_v24 = vadd.f32 %v1150_v7, %v1149_v14  ;;  %v1940_v5 = vadd.f32 %v1939_v36, %v1938_v60  ;;  %v1935_v3 = vadd.f32 %v1934_v42, %v1933_v62  ;;  %v1162_v7 = vadd.f32 %v1161_v32, %v1160_v45 }
 0x44b   : > { %v1918_v60 = vrot.slane %v1917_v57, 1  ;;  %v1956_v13 = vsel %vm1955_vm4, %v1892_v37, %v1883_v47  ;;  %v1147_v36 = vrot.slane %v1146_v4, 1  ;;  %v1186_v47 = vsel %vm456_vm1, %v1121_v10, 0.0 }
 0x44c   : > { %v1152_v40 = vrot.slane %v1151_v24, 4  ;;  %v1941_v30 = vrot.slane %v1940_v5, 4  ;;  %v1936_v35 = vrot.slane %v1935_v3, 1  ;;  %v1958_v8 = vsel %vm1957_vm5, %v1901_v51, %v1956_v13 }
 0x44d   : > { %v1960_v45 = vsel %vm1959_vm6, %v1910_v54, %v1958_v8  ;;  %v1163_v42 = vrot.slane %v1162_v7, 2  ;;  %v1919_v9 = vadd.f32 %v1918_v60, %v1917_v57  ;;  %v6184_v51 = vrot.slane %v5403_v22, 1 }
 0x44e   : > { %v1153_v50 = vadd.f32 %v1152_v40, %v1151_v24  ;;  %v1942_v20 = vadd.f32 %v1941_v30, %v1940_v5  ;;  %v2037_v55 = vpop.permute.xlu0 %2036  ;;  %v1937_v39 = vadd.f32 %v1936_v35, %v1935_v3  ;;  %v1180_v24 = vadd.f32 %v1179_v38, %v1178_v63 }
 0x44f   : > { %3802 = vmatpush.xpose.msk.msrb.mxu0 %vm456_vm1, %v2037_v55  ;;  %v5473_v14 = vpop.permute.xlu2 %2149  ;;  %v1962_v16 = vsel %vm1961_vm7, %v1919_v9, %v1960_v45  ;;  %v1172_v5 = vrot.slane %v1171_v44, 2  ;;  %v1164_v37 = vadd.f32 %v1163_v42, %v1162_v7  ;;  %v1148_v30 = vadd.f32 %v1147_v36, %v1146_v4 }
 0x450   : > { %v1154_v62 = vrot.slane %v1153_v50, 2  ;;  %v1943_v17 = vrot.slane %v1942_v20, 2  ;;  %v1964_v3 = vsel %vm1963_vm8, %v1928_v21, %v1962_v16  ;;  %v1181_v2 = vrot.slane %v1180_v24, 2 }
 0x451   : > { %v1966_v63 = vsel %vm1965_vm9, %v1937_v39, %v1964_v3  ;;  %v1130_v54 = vadd.f32 %v6184_v51, %v5403_v22  ;;  %v1165_v7 = vrot.slane %v1164_v37, 1 }
 0x452   : > { %v1155_v23 = vadd.f32 %v1154_v62, %v1153_v50  ;;  %v1944_v15 = vadd.f32 %v1943_v17, %v1942_v20  ;;  %v1173_v50 = vadd.f32 %v1172_v5, %v1171_v44  ;;  %v1182_v4 = vadd.f32 %v1181_v2, %v1180_v24  ;;  %v6185_v5 = vld [vmem:[#allocation9_spill] sm:$0xff] }
 0x453   : > { %3803 = vmatpush.xpose.msk.msrb.mxu0 %vm456_vm1, %v5441_v43  ;;  %v2001_v56 = vsel %vm1955_vm4, %v1139_v1, %v1130_v54  ;;  %v1166_v21 = vadd.f32 %v1165_v7, %v1164_v37 }
 0x454   : > { %v1945_v6 = vrot.slane %v1944_v15, 1  ;;  %v1156_v34 = vrot.slane %v1155_v23, 1  ;;  %v2002_v35 = vsel %vm1957_vm5, %v1148_v30, %v2001_v56  ;;  %v1174_v17 = vrot.slane %v1173_v50, 1 }
 0x455   : > { %v1183_v44 = vrot.slane %v1182_v4, 1 }
 0x456   : > { %v2152_v32 = vpop.permute.xlu0 %2151  ;;  %3804 = vmatmul.msk.f32.vlgmr.msrb.gmra.mxu0 %vm456_vm1, %v2031_v46  ;;  %v1099_v43 = vpop.permute.xlu1 %1098  ;;  %v1946_v57 = vadd.f32 %v1945_v6, %v1944_v15  ;;  %v1157_v20 = vadd.f32 %v1156_v34, %v1155_v23  ;;  %v1175_v15 = vadd.f32 %v1174_v17, %v1173_v50 }
 0x457   : > { %v1120_v58 = vmul.f32 %v1099_v43, %v5445_v61  ;;  %3815 = vmatpush.xpose.msk.msrb.mxu3 %vm456_vm1, %v2152_v32  ;;  %v2033_v62 = vpop.permute.xlu2 %2032  ;;  %v1184_v39 = vadd.f32 %v1183_v44, %v1182_v4 }
 0x458   : > { %v1968_v40 = vsel %vm1967_vm10, %v1946_v57, %v1966_v63  ;;  %v2003_v8 = vsel %vm1959_vm6, %v1157_v20, %v2002_v35 }
 0x459   : > { %v1185_v46 = vsel %vm456_vm1, %v1120_v58, 0.0  ;;  %1969 = vrot.lane.b32.xlu0 %v1968_v40, %s4283_s12  ;;  %v2004_v23 = vsel %vm1961_vm7, %v1166_v21, %v2003_v8  ;;  %s4289_s12 = smov 16  }
 0x45a   : > { %v1187_v55 = vadd.f32 %v1186_v47, %v1185_v46  ;;  %v2005_v9 = vsel %vm1963_vm8, %v1175_v15, %v2004_v23 }
 0x45b   : > { %v2006_v6 = vsel %vm1965_vm9, %v1184_v39, %v2005_v9 }
 0x45c   : > { %v1188_v60 = vrot.slane %v1187_v55, 4 }
 0x45e   : > { %v1189_v13 = vadd.f32 %v1188_v60, %v1187_v55  ;;  %3805 = vmatmul.msk.f32.gmra.mxu0 %vm456_vm1, %v2033_v62  ;;  %v2115_v38 = vpop.permute.xlu1 %2114  ;;  %v2148_v16 = vpop.permute.xlu0 %2147 }
 0x45f   : > { %3810 = vmatpush.xpose.msk.msrb.mxu2 %vm456_vm1, %v2115_v38  ;;  %v2269_v63 = vpop.permute.xlu2 %2268 }
 0x460   : > { %v1190_v22 = vrot.slane %v1189_v13, 2 }
 0x461   : > { %2071 = vrot.lane.b32.xlu0 %v4478_v33, %s4288_s17 }
 0x462   : > { %v1191_v45 = vadd.f32 %v1190_v22, %v1189_v13 }
 0x464   : > { %v1192_v42 = vrot.slane %v1191_v45, 1 }
 0x466   : > { %v2113_v59 = vpop.permute.xlu1 %2112  ;;  %v1193_v36 = vadd.f32 %v1192_v42, %v1191_v45  ;;  %v2070_v32 = vpop.permute.xlu0 %2069 }
 0x467   : > { %3811 = vmatpush.xpose.msk.msrb.mxu2 %vm456_vm1, %v2113_v59  ;;  %v2265_v40 = vpop.permute.xlu2 %2264 }
 0x468   : > { %v2007_v24 = vsel %vm1967_vm10, %v1193_v36, %v2006_v6 }
 0x469   : > { %2231 = vrot.lane.b32.xlu0 %v6174_v19, %s4287_s7  ;;  %3801 = vmatmul.msk.f32.vlgmr.msra.gmra.mxu3 %vm456_vm1, %v2007_v24 }
 0x46e   : > { %v2109_v10 = vpop.permute.xlu1 %2108 }
 0x46f   : > { %v2230_v46 = vpop.permute.xlu2 %2229 }
 0x471   : > { %2190 = vrot.lane.b32.xlu0 %v6185_v5, %s4287_s7  ;;  %3816 = vmatmul.msk.f32.vlgmr.msrb.gmra.mxu3 %vm456_vm1, %v2148_v16  ;;  %s3635_s7 = sshll.u32 %s218_s16, 4  ;;  %s3636_s7 = int_to_ptr.vmem [resolvable:$true] %s3635_s7 }
 0x476   : > { %v2074_v34 = vpop.permute.xlu1 %2073 }
 0x477   : > { %3807 = vmatpush.xpose.msk.msrb.mxu1 %vm456_vm1, %v2074_v34  ;;  %v2267_v20 = vpop.permute.xlu2 %2266 }
 0x479   : > { %2186 = vrot.lane.b32.xlu0 %v6185_v5, %s4288_s17  ;;  %3817 = vmatmul.msk.f32.gmra.mxu3 %vm456_vm1, %v5473_v14  ;;  %v2271_v14 = vpop.permute.xlu0 %2270 }
 0x47a   : > { %3808 = vmatmul.msk.f32.vlgmr.msrb.gmra.mxu1 %vm456_vm1, %v2070_v32 }
 0x47e   : > { %v2111_v43 = vpop.permute.xlu1 %2110 }
 0x47f   : > { %v2228_v56 = vpop.permute.xlu2 %2227 }
 0x481   : > { %2305 = vrot.lane.b32.xlu0 %v4591_v0, %s4288_s17 }
 0x486   : > { %v2310_v57 = vpop.permute.xlu1 %2309 }
 0x487   : > { %3830 = vmatpush.xpose.msk.msra.mxu3 %vm456_vm1, %v2310_v57 }
 0x48e   : > { %v2193_v3 = vpop.permute.xlu1 %2192 }
 0x48f   : > { %3818 = vmatpush.xpose.msk.msra.mxu0 %vm456_vm1, %v2193_v3 }
 0x496   : > { %v2308_v37 = vpop.permute.xlu1 %2307 }
 0x497   : > { %3831 = vmatpush.xpose.msk.msra.mxu3 %vm456_vm1, %v2308_v37 }
 0x49e   : > { %v2304_v58 = vpop.permute.xlu1 %2303 }
 0x49f   : > { %3832 = vmatmul.msk.f32.vlgmr.msra.gmra.mxu3 %vm456_vm1, %v2304_v58 }
 0x4a6   : > { %v2226_v55 = vpop.permute.xlu1 %2225 }
 0x4ae   : > { %v2189_v35 = vpop.permute.xlu1 %2188 }
 0x4cb   : > { %v1970_v1 = vpop.permute.xlu0 %1969 }
 0x4cc   : > { %3800 = vmatmul.msk.f32.vlgmr.msra.gmra.mxu2 %vm456_vm1, %v1970_v1 }
 0x4cd   : > { %3826 = vmatpush.xpose.msk.msra.mxu2 %vm456_vm1, %v2271_v14 }
 0x4d1   : > { %3827 = vmatpush.xpose.msk.msra.mxu2 %vm456_vm1, %v2269_v63 }
 0x4d3   : > { %v2063_v30 = vpop.f32.mrf.mxu0  ;;  %v2072_v2 = vpop.permute.xlu0 %2071 }
 0x4d4   : > { %3809 = vmatmul.msk.f32.gmra.mxu1 %vm456_vm1, %v2072_v2  ;;  %3812 = vmatmul.msk.f32.vlgmr.msrb.gmra.mxu2 %vm456_vm1, %v2109_v10  ;;  %v2342_v47 = vsel %vm456_vm1, %v2063_v30, -inf }
 0x4d5   : > { %2343 = vmax.xlane.f32.xlu0 %v2342_v47 }
 0x4db   : > { %v2066_v51 = vpop.f32.mrf.mxu0  ;;  %v2232_v54 = vpop.permute.xlu0 %2231 }
 0x4dc   : > { %3813 = vmatmul.msk.f32.gmra.mxu2 %vm456_vm1, %v2111_v43  ;;  %3822 = vmatpush.xpose.msk.msra.mxu1 %vm456_vm1, %v2232_v54  ;;  %v2345_v50 = vsel %vm456_vm1, %v2066_v51, -inf }
 0x4dd   : > { %2346 = vmax.xlane.f32.xlu1 %v2345_v50 }
 0x4e0   : > { %3823 = vmatpush.xpose.msk.msra.mxu1 %vm456_vm1, %v2230_v46 }
 0x4e3   : > { %v2191_v7 = vpop.permute.xlu0 %2190  ;;  %3824 = vmatmul.msk.f32.vlgmr.msra.gmra.mxu1 %vm456_vm1, %v2226_v55 }
 0x4e4   : > { %3819 = vmatpush.xpose.msk.msra.mxu0 %vm456_vm1, %v2191_v7  ;;  %3828 = vmatmul.msk.f32.vlgmr.msra.gmra.mxu2 %vm456_vm1, %v2265_v40 }
 0x4eb   : > { %v2187_v60 = vpop.permute.xlu0 %2186  ;;  %3825 = vmatmul.msk.f32.gmra.mxu1 %vm456_vm1, %v2228_v56 }
 0x4ec   : > { %3820 = vmatmul.msk.f32.vlgmr.msra.gmra.mxu0 %vm456_vm1, %v2187_v60  ;;  %3829 = vmatmul.msk.f32.gmra.mxu2 %vm456_vm1, %v2267_v20  ;;  %v5544_v22 = vpop.f32.mrf.mxu3 }
 0x4f3   : > { %v2306_v4 = vpop.permute.xlu0 %2305 }
 0x4f4   : > { %3821 = vmatmul.msk.f32.gmra.mxu0 %vm456_vm1, %v2189_v35  ;;  %3833 = vmatmul.msk.f32.gmra.mxu3 %vm456_vm1, %v2306_v4  ;;  %v5550_v45 = vpop.f32.mrf.mxu3 }
 0x4f5   : > { %v2360_v1 = vsel %vm456_vm1, %v5550_v45, -inf }
 0x4f7   : > { %v2102_v62 = vpop.f32.mrf.mxu1 }
 0x4f8   : > { %v2348_v17 = vsel %vm456_vm1, %v2102_v62, -inf }
 0x4f9   : > { %2349 = vmax.xlane.f32.xlu2 %v2348_v17 }
 0x4fc   : > { %v2183_v16 = vpop.f32.mrf.mxu3 }
 0x4fd   : > { %v2363_v43 = vsel %vm456_vm1, %v2183_v16, -inf }
 0x522   : > { %v5569_v63 = vpop.f32.mrf.mxu3 }
 0x523   : > { %v2384_v54 = vsel %vm456_vm1, %v5569_v63, -inf }
 0x548   : > { %v2344_v8 = vpop.xlane.xlu0 %2343 }
 0x549   : > { %v2390_v21 = vsub.f32 %v2063_v30, %v2344_v8 }
 0x54b   : > { %v2406_v44 = vmul.f32 1.442695, %v2390_v21 }
 0x54d   : > { %4080 = vpow2.f32 %v2406_v44 }
 0x54f   : > { %v5554_v39 = vpop.f32.mrf.mxu2 }
 0x550   : > { %v2347_v9 = vpop.xlane.xlu1 %2346 }
 0x551   : > { %v2105_v13 = vpop.f32.mrf.mxu1  ;;  %v2391_v59 = vsub.f32 %v2066_v51, %v2347_v9 }
 0x552   : > { %v2351_v38 = vsel %vm456_vm1, %v2105_v13, -inf }
 0x553   : > { %2352 = vmax.xlane.f32.xlu0 %v2351_v38  ;;  %v5552_v42 = vpop.eup %4080  ;;  %v2408_v10 = vmul.f32 1.442695, %v2391_v59 }
 0x554   : > { %v2438_v6 = vsel %vm456_vm1, %v5552_v42, 0.0 }
 0x555   : > { %4082 = vpow2.f32 %v2408_v10 }
 0x557   : > { %v5565_v37 = vpop.f32.mrf.mxu2 }
 0x558   : > { %v2354_v14 = vsel %vm456_vm1, %v5565_v37, -inf }
 0x55b   : > { %v5567_v58 = vpop.eup %4082 }
 0x55c   : > { %v2441_v40 = vsel %vm456_vm1, %v5567_v58, 0.0 }
 0x55f   : > { %v5577_v30 = vpop.f32.mrf.mxu2 }
 0x560   : > { %v5546_v23 = vpop.f32.mrf.mxu1  ;;  %v2357_v7 = vsel %vm456_vm1, %v5577_v30, -inf }
 0x561   : > { %v2372_v15 = vsel %vm456_vm1, %v5546_v23, -inf }
 0x562   : > { %2373 = vmax.xlane.f32.xlu1 %v2372_v15 }
 0x567   : > { %v5585_v20 = vpop.f32.mrf.mxu2 }
 0x568   : > { %v2261_v34 = vpop.f32.mrf.mxu1  ;;  %v2378_v55 = vsel %vm456_vm1, %v5585_v20, -inf }
 0x569   : > { %v2219_v36 = vpop.f32.mrf.mxu0  ;;  %v2375_v57 = vsel %vm456_vm1, %v2261_v34, -inf }
 0x56a   : > { %2439 = vadd.xlane.f32.xlu1 %v2438_v6  ;;  %v2366_v24 = vsel %vm456_vm1, %v2219_v36, -inf }
 0x56b   : > { %2367 = vmax.xlane.f32.xlu2 %v2366_v24 }
 0x56c   : > { %v2350_v2 = vpop.xlane.xlu2 %2349 }
 0x56d   : > { %v2392_v46 = vsub.f32 %v2102_v62, %v2350_v2 }
 0x56f   : > { %v2410_v50 = vmul.f32 1.442695, %v2392_v46 }
 0x571   : > { %v5559_v32 = vpop.f32.mrf.mxu0  ;;  %4084 = vpow2.f32 %v2410_v50 }
 0x572   : > { %2364 = vmax.xlane.f32.xlu1 %v2363_v43  ;;  %v2369_v3 = vsel %vm456_vm1, %v5559_v32, -inf }
 0x573   : > { %2376 = vmax.xlane.f32.xlu2 %v2375_v57  ;;  %2370 = vmax.xlane.f32.xlu0 %v2369_v3 }
 0x577   : > { %v5579_v47 = vpop.f32.mrf.mxu3  ;;  %v5591_v56 = vpop.eup %4084 }
 0x578   : > { %v2387_v51 = vsel %vm456_vm1, %v5579_v47, -inf  ;;  %v2444_v60 = vsel %vm456_vm1, %v5591_v56, 0.0 }
 0x57a   : > { %2355 = vmax.xlane.f32.xlu1 %v2354_v14 }
 0x57b   : > { %2361 = vmax.xlane.f32.xlu0 %v2360_v1  ;;  %2442 = vadd.xlane.f32.xlu2 %v2441_v40 }
 0x583   : > { %2388 = vmax.xlane.f32.xlu0 %v2387_v51  ;;  %2385 = vmax.xlane.f32.xlu2 %v2384_v54 }
 0x58b   : > { %2379 = vmax.xlane.f32.xlu0 %v2378_v55  ;;  %2358 = vmax.xlane.f32.xlu2 %v2357_v7 }
 0x593   : > { %2445 = vadd.xlane.f32.xlu0 %v2444_v60 }
 0x5c6   : > { %v2353_v35 = vpop.xlane.xlu0 %2352 }
 0x5c7   : > { %v2393_v4 = vsub.f32 %v2105_v13, %v2353_v35 }
 0x5c9   : > { %v2412_v62 = vmul.f32 1.442695, %v2393_v4 }
 0x5cb   : > { %4086 = vpow2.f32 %v2412_v62 }
 0x5d1   : > { %v5595_v17 = vpop.eup %4086 }
 0x5d2   : > { %v2447_v38 = vsel %vm456_vm1, %v5595_v17, 0.0 }
 0x5d3   : > { %2448 = vadd.xlane.f32.xlu1 %v2447_v38 }
 0x5d5   : > { %v2374_v8 = vpop.xlane.xlu1 %2373 }
 0x5d6   : > { %v2400_v6 = vsub.f32 %v5546_v23, %v2374_v8 }
 0x5d8   : > { %v2426_v1 = vmul.f32 1.442695, %v2400_v6 }
 0x5dd   : > { %v2440_v21 = vpop.xlane.xlu1 %2439 }
 0x5de   : > { %v2368_v44 = vpop.xlane.xlu2 %2367 }
 0x5df   : > { %v2398_v15 = vsub.f32 %v2219_v36, %v2368_v44 }
 0x5e1   : > { %v2422_v9 = vmul.f32 1.442695, %v2398_v15 }
 0x5e3   : > { %4088 = vpow2.f32 %v2422_v9 }
 0x5e4   : > { %4090 = vrcp.f32 %v2440_v21 }
 0x5e5   : > { %v2365_v59 = vpop.xlane.xlu1 %2364 }
 0x5e6   : > { %v2397_v24 = vsub.f32 %v2183_v16, %v2365_v59  ;;  %v2377_v10 = vpop.xlane.xlu2 %2376  ;;  %v2371_v13 = vpop.xlane.xlu0 %2370 }
 0x5e7   : > { %v2401_v43 = vsub.f32 %v2261_v34, %v2377_v10  ;;  %v2399_v51 = vsub.f32 %v5559_v32, %v2371_v13 }
 0x5e8   : > { %v2420_v57 = vmul.f32 1.442695, %v2397_v24 }
 0x5e9   : > { %v5600_v3 = vpop.eup %4088  ;;  %v2428_v14 = vmul.f32 1.442695, %v2401_v43  ;;  %v2424_v35 = vmul.f32 1.442695, %v2399_v51 }
 0x5ea   : > { %4092 = vpow2.f32 %v2420_v57  ;;  %v2462_v40 = vsel %vm456_vm1, %v5600_v3, 0.0  ;;  %v4091_v23 = vpop.eup %4090 }
 0x5eb   : > { %4094 = vpow2.f32 %v2428_v14  ;;  %2463 = vadd.xlane.f32.xlu0 %v2462_v40 }
 0x5ec   : > { %4096 = vpow2.f32 %v2426_v1 }
 0x5ee   : > { %v2362_v36 = vpop.xlane.xlu0 %2361  ;;  %v2443_v2 = vpop.xlane.xlu2 %2442 }
 0x5ef   : > { %v2396_v16 = vsub.f32 %v5550_v45, %v2362_v36  ;;  %4098 = vrcp.f32 %v2443_v2  ;;  %v2502_v45 = vmul.f32 %v4091_v23, %v5552_v42 }
 0x5f0   : > { %v5605_v34 = vpop.eup %4092 }
 0x5f1   : > { %v5607_v46 = vpop.eup %4094  ;;  %v2418_v54 = vmul.f32 1.442695, %v2396_v16  ;;  %v2459_v50 = vsel %vm456_vm1, %v5605_v34, 0.0  ;;  %v2518_v8 = vsel %vm456_vm1, %v2502_v45, 0.0 }
 0x5f2   : > { %2460 = vadd.xlane.f32.xlu2 %v2459_v50  ;;  %v2471_v55 = vsel %vm456_vm1, %v5607_v46, 0.0  ;;  %v5614_v7 = vpop.eup %4096  ;;  %v5645_v50 = vpop.f32.mrf.mxu2 }
 0x5f3   : > { %4100 = vpow2.f32 %v2418_v54  ;;  %2472 = vadd.xlane.f32.xlu0 %v2471_v55  ;;  %v2468_v44 = vsel %vm456_vm1, %v5614_v7, 0.0  ;;  %v2381_v45 = vsel %vm456_vm1, %v5645_v50, -inf }
 0x5f4   : > { %4102 = vpow2.f32 %v2424_v35 }
 0x5f5   : > { %v4099_v60 = vpop.eup %4098 }
 0x5f6   : > { %v2503_v4 = vmul.f32 %v4099_v60, %v5567_v58  ;;  %v2389_v62 = vpop.xlane.xlu0 %2388  ;;  %v2386_v32 = vpop.xlane.xlu2 %2385 }
 0x5f7   : > { %v2404_v38 = vsub.f32 %v5569_v63, %v2386_v32  ;;  %v2405_v42 = vsub.f32 %v5579_v47, %v2389_v62  ;;  %v2356_v60 = vpop.xlane.xlu1 %2355 }
 0x5f8   : > { %v2519_v21 = vsel %vm456_vm1, %v2503_v4, 0.0  ;;  %v2394_v35 = vsub.f32 %v5565_v37, %v2356_v60 }
 0x5f9   : > { %v5623_v15 = vpop.eup %4100  ;;  %v2520_v9 = vadd.f32 %v2519_v21, %v2518_v8  ;;  %v2434_v59 = vmul.f32 1.442695, %v2404_v38  ;;  %v2436_v24 = vmul.f32 1.442695, %v2405_v42 }
 0x5fa   : > { %2469 = vadd.xlane.f32.xlu2 %v2468_v44  ;;  %v2456_v58 = vsel %vm456_vm1, %v5623_v15, 0.0  ;;  %v5628_v13 = vpop.eup %4102  ;;  %v2414_v4 = vmul.f32 1.442695, %v2394_v35 }
 0x5fb   : > { %v2521_v6 = vrot.slane %v2520_v9, 4  ;;  %2457 = vadd.xlane.f32.xlu1 %v2456_v58  ;;  %4104 = vpow2.f32 %v2434_v59  ;;  %v2465_v47 = vsel %vm456_vm1, %v5628_v13, 0.0 }
 0x5fc   : > { %4106 = vpow2.f32 %v2436_v24 }
 0x5fd   : > { %v2522_v63 = vadd.f32 %v2521_v6, %v2520_v9 }
 0x5fe   : > { %v2359_v10 = vpop.xlane.xlu2 %2358  ;;  %v2380_v62 = vpop.xlane.xlu0 %2379 }
 0x5ff   : > { %v2395_v43 = vsub.f32 %v5577_v30, %v2359_v10  ;;  %v2523_v57 = vrot.slane %v2522_v63, 2 }
 0x601   : > { %v2416_v14 = vmul.f32 1.442695, %v2395_v43  ;;  %v5631_v1 = vpop.eup %4104  ;;  %v2524_v36 = vadd.f32 %v2523_v57, %v2522_v63 }
 0x602   : > { %v2480_v40 = vsel %vm456_vm1, %v5631_v1, 0.0  ;;  %v5637_v2 = vpop.eup %4106 }
 0x603   : > { %2466 = vadd.xlane.f32.xlu1 %v2465_v47  ;;  %4108 = vpow2.f32 %v2416_v14  ;;  %2481 = vadd.xlane.f32.xlu0 %v2480_v40  ;;  %v2525_v23 = vrot.slane %v2524_v36, 1  ;;  %v2483_v30 = vsel %vm456_vm1, %v5637_v2, 0.0 }
 0x604   : > { %4110 = vpow2.f32 %v2414_v4  ;;  %v2402_v4 = vsub.f32 %v5585_v20, %v2380_v62 }
 0x605   : > { %v2526_v54 = vadd.f32 %v2525_v23, %v2524_v36 }
 0x606   : > { %v2446_v8 = vpop.xlane.xlu0 %2445 }
 0x607   : > { %v5648_v55 = vmul.f32 %v2526_v54, %v5002_v12  ;;  %4112 = vrcp.f32 %v2446_v8 }
 0x609   : > { %v5639_v16 = vpop.eup %4108 }
 0x60a   : > { %v2453_v51 = vsel %vm456_vm1, %v5639_v16, 0.0  ;;  %v5655_v32 = vpop.eup %4110 }
 0x60b   : > { %2484 = vadd.xlane.f32.xlu1 %v2483_v30  ;;  %2454 = vadd.xlane.f32.xlu0 %v2453_v51  ;;  %v2450_v38 = vsel %vm456_vm1, %v5655_v32, 0.0 }
 0x60d   : > { %v4113_v44 = vpop.eup %4112 }
 0x60e   : > { %v2504_v9 = vmul.f32 %v4113_v44, %v5591_v56 }
 0x610   : > { %v2527_v37 = vsel %vm456_vm1, %v2504_v9, 0.0  ;;  %v2430_v9 = vmul.f32 1.442695, %v2402_v4 }
 0x612   : > { %2602 = vperm.xlu2 %3934, %v5648_v55  }
 0x613   : > { %2382 = vmax.xlane.f32.xlu1 %v2381_v45 }
 0x61a   : > { %3936 = vset.pattern.permute.xlu2 %v4963_v11 }
 0x63b   : > { %2451 = vadd.xlane.f32.xlu2 %v2450_v38 }
 0x646   : > { %v2449_v21 = vpop.xlane.xlu1 %2448 }
 0x647   : > { %4114 = vrcp.f32 %v2449_v21 }
 0x64d   : > { %v4115_v42 = vpop.eup %4114 }
 0x64e   : > { %v2505_v59 = vmul.f32 %v4115_v42, %v5595_v17 }
 0x650   : > { %v2528_v58 = vsel %vm456_vm1, %v2505_v59, 0.0 }
 0x651   : > { %v2529_v6 = vadd.f32 %v2528_v58, %v2527_v37 }
 0x653   : > { %v2530_v63 = vrot.slane %v2529_v6, 4 }
 0x655   : > { %v2531_v24 = vadd.f32 %v2530_v63, %v2529_v6 }
 0x657   : > { %v2532_v10 = vrot.slane %v2531_v24, 2 }
 0x659   : > { %v2533_v43 = vadd.f32 %v2532_v10, %v2531_v24 }
 0x65b   : > { %v2534_v57 = vrot.slane %v2533_v43, 1 }
 0x65d   : > { %v2535_v14 = vadd.f32 %v2534_v57, %v2533_v43 }
 0x65e   : > { %v2464_v17 = vpop.xlane.xlu0 %2463 }
 0x65f   : > { %v5664_v47 = vmul.f32 %v2535_v14, %v5002_v12 }
 0x661   : > { %2614 = vperm.xlu1 %3932, %v5664_v47  }
 0x665   : > { %v2461_v56 = vpop.xlane.xlu2 %2460 }
 0x666   : > { %4116 = vrcp.f32 %v2461_v56  ;;  %v2473_v8 = vpop.xlane.xlu0 %2472 }
 0x66c   : > { %v4117_v36 = vpop.eup %4116 }
 0x66d   : > { %v2509_v23 = vmul.f32 %v4117_v36, %v5605_v34  ;;  %v2470_v60 = vpop.xlane.xlu2 %2469 }
 0x66e   : > { %v2458_v40 = vpop.xlane.xlu1 %2457 }
 0x66f   : > { %4118 = vrcp.f32 %v2458_v40  ;;  %v2546_v45 = vsel %vm456_vm1, %v2509_v23, 0.0 }
 0x675   : > { %v4119_v30 = vpop.eup %4118 }
 0x676   : > { %v2508_v51 = vmul.f32 %v4119_v30, %v5623_v15  ;;  %v2467_v54 = vpop.xlane.xlu1 %2466 }
 0x677   : > { %4120 = vrcp.f32 %v2467_v54 }
 0x678   : > { %4122 = vrcp.f32 %v2464_v17  ;;  %v2545_v35 = vsel %vm456_vm1, %v2508_v51, 0.0 }
 0x679   : > { %v2547_v38 = vadd.f32 %v2546_v45, %v2545_v35  ;;  %4124 = vrcp.f32 %v2470_v60 }
 0x67a   : > { %4126 = vrcp.f32 %v2473_v8  ;;  %v2482_v8 = vpop.xlane.xlu0 %2481 }
 0x67b   : > { %v2548_v21 = vrot.slane %v2547_v38, 4  ;;  %4128 = vpow2.f32 %v2430_v9 }
 0x67d   : > { %v4121_v44 = vpop.eup %4120  ;;  %v2549_v34 = vadd.f32 %v2548_v21, %v2547_v38 }
 0x67e   : > { %v4123_v42 = vpop.eup %4122  ;;  %v2511_v15 = vmul.f32 %v4121_v44, %v5628_v13  ;;  %v2485_v54 = vpop.xlane.xlu1 %2484 }
 0x67f   : > { %v2550_v59 = vrot.slane %v2549_v34, 2  ;;  %v4125_v37 = vpop.eup %4124  ;;  %v2510_v58 = vmul.f32 %v4123_v42, %v5600_v3 }
 0x680   : > { %v4127_v63 = vpop.eup %4126  ;;  %v2555_v20 = vsel %vm456_vm1, %v2511_v15, 0.0  ;;  %v2512_v24 = vmul.f32 %v4125_v37, %v5614_v7 }
 0x681   : > { %v2551_v6 = vadd.f32 %v2550_v59, %v2549_v34  ;;  %v2554_v10 = vsel %vm456_vm1, %v2510_v58, 0.0  ;;  %v2513_v57 = vmul.f32 %v4127_v63, %v5607_v46  ;;  %v5678_v56 = vpop.eup %4128  ;;  %v2603_v59 = vpop.permute.xlu2 %2602 }
 0x682   : > { %v2556_v14 = vadd.f32 %v2555_v20, %v2554_v10  ;;  %v2563_v40 = vsel %vm456_vm1, %v2512_v24, 0.0  ;;  %v2474_v7 = vsel %vm456_vm1, %v5678_v56, 0.0  ;;  %v2455_v58 = vpop.xlane.xlu0 %2454 }
 0x683   : > { %v2552_v62 = vrot.slane %v2551_v6, 1  ;;  %v2564_v3 = vsel %vm456_vm1, %v2513_v57, 0.0 }
 0x684   : > { %v2557_v17 = vrot.slane %v2556_v14, 4  ;;  %v2565_v36 = vadd.f32 %v2564_v3, %v2563_v40 }
 0x685   : > { %v2553_v43 = vadd.f32 %v2552_v62, %v2551_v6 }
 0x686   : > { %v2558_v23 = vadd.f32 %v2557_v17, %v2556_v14  ;;  %v2566_v30 = vrot.slane %v2565_v36, 4  ;;  %v2383_v38 = vpop.xlane.xlu1 %2382 }
 0x687   : > { %v2593_v13 = vmul.f32 %v2553_v43, %v5002_v12  ;;  %v2403_v9 = vsub.f32 %v5645_v50, %v2383_v38  ;;  %v2694_v38 = vmul.f32 %v2603_v59, %v5300_v52 }
 0x688   : > { %v2559_v46 = vrot.slane %v2558_v23, 2  ;;  %v2567_v51 = vadd.f32 %v2566_v30, %v2565_v36 }
 0x689   : > { %2644 = vperm.xlu2 %3936, %v2593_v13   ;;  %2638 = vperm.xlu0 %3929, %v2593_v13   ;;  %v2432_v15 = vmul.f32 1.442695, %v2403_v9 }
 0x68a   : > { %v2560_v45 = vadd.f32 %v2559_v46, %v2558_v23  ;;  %v2568_v60 = vrot.slane %v2567_v51, 2 }
 0x68b   : > { %2475 = vadd.xlane.f32.xlu1 %v2474_v7  ;;  %4130 = vpow2.f32 %v2432_v15 }
 0x68c   : > { %v2561_v35 = vrot.slane %v2560_v45, 1  ;;  %v2569_v4 = vadd.f32 %v2568_v60, %v2567_v51  ;;  %4132 = vrcp.f32 %v2455_v58 }
 0x68d   : > { %4134 = vrcp.f32 %v2485_v54 }
 0x68e   : > { %v2562_v21 = vadd.f32 %v2561_v35, %v2560_v45  ;;  %v2570_v44 = vrot.slane %v2569_v4, 1  ;;  %4136 = vrcp.f32 %v2482_v8 }
 0x690   : > { %v2594_v34 = vmul.f32 %v2562_v21, %v5002_v12  ;;  %v2571_v42 = vadd.f32 %v2570_v44, %v2569_v4  ;;  %v2711_v44 = vsel %vm2710_vm11, %v2694_v38, 0.0 }
 0x691   : > { %3935 = vset.pattern.permute.xlu0 %v4963_v11 }
 0x692   : > { %v2595_v37 = vmul.f32 %v2571_v42, %v5002_v12 }
 0x699   : > { %2608 = vperm.xlu0 %3935, %v5648_v55   ;;  %v5691_v55 = vpop.eup %4130 }
 0x69a   : > { %v2477_v6 = vsel %vm456_vm1, %v5691_v55, 0.0 }
 0x6a1   : > { %2620 = vperm.xlu0 %3935, %v5664_v47   ;;  %v4133_v47 = vpop.eup %4132 }
 0x6a2   : > { %v4135_v63 = vpop.eup %4134  ;;  %v2507_v62 = vmul.f32 %v4133_v47, %v5639_v16 }
 0x6a3   : > { %v4137_v20 = vpop.eup %4136  ;;  %v2517_v10 = vmul.f32 %v4135_v63, %v5637_v2 }
 0x6a4   : > { %2650 = vperm.xlu1 %3932, %v2594_v34   ;;  %v2516_v57 = vmul.f32 %v4137_v20, %v5631_v1  ;;  %v2537_v14 = vsel %vm456_vm1, %v2507_v62, 0.0 }
 0x6a5   : > { %v2582_v40 = vsel %vm456_vm1, %v2517_v10, 0.0 }
 0x6a6   : > { %v2581_v16 = vsel %vm456_vm1, %v2516_v57, 0.0 }
 0x6a7   : > { %v2583_v7 = vadd.f32 %v2582_v40, %v2581_v16 }
 0x6a9   : > { %2668 = vperm.xlu0 %3935, %v2595_v37   ;;  %v2584_v23 = vrot.slane %v2583_v7, 4 }
 0x6ab   : > { %v2585_v30 = vadd.f32 %v2584_v23, %v2583_v7 }
 0x6ac   : > { %2662 = vperm.xlu1 %3932, %v2595_v37   ;;  %v6186_v37 = vld [vmem:[#allocation14_spill] sm:$0xff] }
 0x6ad   : > { %v2586_v54 = vrot.slane %v2585_v30, 2 }
 0x6ae   : > { %v2452_v50 = vpop.xlane.xlu2 %2451 }
 0x6af   : > { %4138 = vrcp.f32 %v2452_v50  ;;  %v2587_v45 = vadd.f32 %v2586_v54, %v2585_v30 }
 0x6b1   : > { %2868 = vrot.lane.b32.xlu0 %v4478_v33, %s4289_s12  ;;  %v2588_v60 = vrot.slane %v2587_v45, 1 }
 0x6b2   : > { %2478 = vadd.xlane.f32.xlu2 %v2477_v6  ;;  %v6187_v6 = vld [vmem:[#allocation13_spill] sm:$0xff] }
 0x6b3   : > { %v2589_v35 = vadd.f32 %v2588_v60, %v2587_v45 }
 0x6b4   : > { %3938 = vset.pattern.permute.xlu1 %v4963_v11 }
 0x6b5   : > { %v4139_v24 = vpop.eup %4138  ;;  %v5717_v4 = vmul.f32 %v2589_v35, %v5002_v12 }
 0x6b6   : > { %v2506_v43 = vmul.f32 %v4139_v24, %v5655_v32 }
 0x6b8   : > { %v2536_v13 = vsel %vm456_vm1, %v2506_v43, 0.0 }
 0x6b9   : > { %v2538_v3 = vadd.f32 %v2537_v14, %v2536_v13  ;;  %2829 = vrot.lane.b32.xlu0 %v4464_v29, %s4289_s12 }
 0x6bb   : > { %v2539_v17 = vrot.slane %v2538_v3, 4 }
 0x6bd   : > { %v2540_v36 = vadd.f32 %v2539_v17, %v2538_v3 }
 0x6bf   : > { %v2541_v2 = vrot.slane %v2540_v36, 2 }
 0x6c1   : > { %2862 = vrot.lane.b32.xlu0 %v4471_v31, %s4290_s14  ;;  %v2542_v1 = vadd.f32 %v2541_v2, %v2540_v36 }
 0x6c3   : > { %v2543_v32 = vrot.slane %v2542_v1, 1 }
 0x6c5   : > { %v2544_v46 = vadd.f32 %v2543_v32, %v2542_v1 }
 0x6c7   : > { %v2592_v51 = vmul.f32 %v2544_v46, %v5002_v12 }
 0x6c9   : > { %2827 = vrot.lane.b32.xlu0 %v4455_v27, %s4289_s12  ;;  %2632 = vperm.xlu1 %3938, %v2592_v51  }
 0x6ca   : > { %2656 = vperm.xlu2 %3936, %v2594_v34  }
 0x6d1   : > { %2864 = vrot.lane.b32.xlu0 %v4478_v33, %s4290_s14 }
 0x6d2   : > { %3937 = vset.pattern.permute.xlu2 %v4949_v18 }
 0x6d3   : > { %v2615_v34 = vpop.permute.xlu1 %2614 }
 0x6d4   : > { %v2696_v58 = vmul.f32 %v2615_v34, %v6186_v37  ;;  %v6188_v34 = vld [vmem:[#allocation18_spill] sm:$0xff] }
 0x6d6   : > { %v2720_v20 = vsel %vm2710_vm11, %v2696_v58, 0.0 }
 0x6d9   : > { %3024 = vrot.lane.b32.xlu0 %v6174_v19, %s4289_s12 }
 0x6da   : > { %2686 = vperm.xlu2 %3937, %v5717_v4  }
 0x6e1   : > { %3022 = vrot.lane.b32.xlu0 %v4541_v48, %s4289_s12 }
 0x6e2   : > { %2626 = vperm.xlu2 %3937, %v2592_v51  }
 0x6e3   : > { %v2645_v40 = vpop.permute.xlu2 %2644 }
 0x6e9   : > { %2942 = vrot.lane.b32.xlu0 %v4514_v41, %s4290_s14 }
 0x6f1   : > { %3102 = vrot.lane.b32.xlu0 %v4591_v0, %s4289_s12 }
 0x6f9   : > { %3100 = vrot.lane.b32.xlu0 %v6173_v28, %s4289_s12 }
 0x6fb   : > { %v2639_v33 = vpop.permute.xlu0 %2638 }
 0x6fe   : > { %v2476_v13 = vpop.xlane.xlu1 %2475 }
 0x6ff   : > { %4140 = vrcp.f32 %v2476_v13 }
 0x701   : > { %3059 = vrot.lane.b32.xlu0 %v4558_v53, %s4290_s14 }
 0x705   : > { %v4141_v46 = vpop.eup %4140 }
 0x706   : > { %v2514_v51 = vmul.f32 %v4141_v46, %v5678_v56  ;;  %v6190_v56 = vld [vmem:[#allocation16_spill] sm:$0xff] }
 0x70b   : > { %v2609_v8 = vpop.permute.xlu0 %2608 }
 0x70c   : > { %v2695_v21 = vmul.f32 %v2609_v8, %v5296_v26  ;;  %v2700_v8 = vmul.f32 %v2639_v33, %v5347_v49 }
 0x70e   : > { %v2712_v9 = vsel %vm2710_vm11, %v2695_v21, 0.0  ;;  %v2572_v21 = vsel %vm456_vm1, %v2514_v51, 0.0 }
 0x70f   : > { %v2713_v42 = vadd.f32 %v2712_v9, %v2711_v44 }
 0x711   : > { %v2714_v15 = vrot.slane %v2713_v42, 4 }
 0x713   : > { %v2715_v50 = vadd.f32 %v2714_v15, %v2713_v42  ;;  %v2621_v47 = vpop.permute.xlu0 %2620  ;;  %v6189_v15 = vld [vmem:[#allocation15_spill] sm:$0xff] }
 0x714   : > { %v2697_v63 = vmul.f32 %v2621_v47, %v6187_v6  ;;  %v2701_v58 = vmul.f32 %v2645_v40, %v6189_v15  ;;  %v6191_v47 = vld [vmem:[#allocation17_spill] sm:$0xff] }
 0x715   : > { %v2716_v62 = vrot.slane %v2715_v50, 2 }
 0x716   : > { %v2721_v59 = vsel %vm2710_vm11, %v2697_v63, 0.0  ;;  %v2651_v1 = vpop.permute.xlu1 %2650 }
 0x717   : > { %v2722_v24 = vadd.f32 %v2721_v59, %v2720_v20  ;;  %v2717_v43 = vadd.f32 %v2716_v62, %v2715_v50  ;;  %v2702_v63 = vmul.f32 %v2651_v1, %v6191_v47  ;;  %v6192_v59 = vld [vmem:[#allocation19_spill] sm:$0xff] }
 0x719   : > { %v2723_v10 = vrot.slane %v2722_v24, 4  ;;  %v2718_v16 = vrot.slane %v2717_v43, 1 }
 0x71b   : > { %v2724_v57 = vadd.f32 %v2723_v10, %v2722_v24  ;;  %v2669_v14 = vpop.permute.xlu0 %2668  ;;  %v2719_v36 = vadd.f32 %v2718_v16, %v2717_v43  ;;  %v2739_v43 = vsel %vm2710_vm11, %v2701_v58, 0.0 }
 0x71c   : > { %v2705_v62 = vmul.f32 %v2669_v14, %v6192_v59 }
 0x71d   : > { %v2725_v3 = vrot.slane %v2724_v57, 2 }
 0x71e   : > { %v2663_v38 = vpop.permute.xlu1 %2662 }
 0x71f   : > { %v2726_v17 = vadd.f32 %v2725_v3, %v2724_v57  ;;  %v2704_v50 = vmul.f32 %v2663_v38, %v6190_v56  ;;  %v2747_v3 = vsel %vm2710_vm11, %v2702_v63, 0.0 }
 0x721   : > { %v2727_v7 = vrot.slane %v2726_v17, 1  ;;  %v2756_v57 = vsel %vm2710_vm11, %v2704_v50, 0.0 }
 0x723   : > { %v2728_v2 = vadd.f32 %v2727_v7, %v2726_v17  ;;  %v2869_v23 = vpop.permute.xlu0 %2868  ;;  %v2757_v17 = vsel %vm2710_vm11, %v2705_v62, 0.0 }
 0x724   : > { %3839 = vmatpush.xpose.msk.msrb.mxu2 %vm456_vm1, %v2869_v23 }
 0x725   : > { %v5742_v32 = vsel %vm1955_vm4, %v2728_v2, %v2719_v36  ;;  %v2479_v30 = vpop.xlane.xlu2 %2478  ;;  %v2758_v36 = vadd.f32 %v2757_v17, %v2756_v57 }
 0x726   : > { %4142 = vrcp.f32 %v2479_v30 }
 0x727   : > { %v2759_v51 = vrot.slane %v2758_v36, 4 }
 0x72b   : > { %v2830_v54 = vpop.permute.xlu0 %2829 }
 0x72c   : > { %v4143_v45 = vpop.eup %4142  ;;  %3835 = vmatpush.xpose.msk.msrb.mxu1 %vm456_vm1, %v2830_v54  ;;  %v6193_v54 = vld [vmem:[#allocation10_spill] sm:$0xff] }
 0x72d   : > { %v2515_v60 = vmul.f32 %v4143_v45, %v5691_v55  ;;  %v2657_v35 = vpop.permute.xlu2 %2656  ;;  %v2738_v55 = vsel %vm2710_vm11, %v2700_v8, 0.0  ;;  %v6194_v8 = vld [vmem:[#allocation12_spill] sm:$0xff] }
 0x72e   : > { %v2703_v42 = vmul.f32 %v2657_v35, %v6188_v34  ;;  %v2740_v40 = vadd.f32 %v2739_v43, %v2738_v55 }
 0x72f   : > { %v2573_v44 = vsel %vm456_vm1, %v2515_v60, 0.0 }
 0x730   : > { %v2574_v9 = vadd.f32 %v2573_v44, %v2572_v21  ;;  %v2748_v10 = vsel %vm2710_vm11, %v2703_v42, 0.0  ;;  %v2741_v2 = vrot.slane %v2740_v40, 4  ;;  %v2760_v42 = vadd.f32 %v2759_v51, %v2758_v36 }
 0x731   : > { %v2749_v7 = vadd.f32 %v2748_v10, %v2747_v3 }
 0x732   : > { %v2575_v20 = vrot.slane %v2574_v9, 4  ;;  %v2742_v38 = vadd.f32 %v2741_v2, %v2740_v40 }
 0x733   : > { %v5756_v24 = vpop.permute.xlu0 %2862  ;;  %v2750_v1 = vrot.slane %v2749_v7, 4 }
 0x734   : > { %v2576_v33 = vadd.f32 %v2575_v20, %v2574_v9  ;;  %v2743_v20 = vrot.slane %v2742_v38, 2 }
 0x735   : > { %v5761_v13 = vpop.permute.xlu2 %2686  ;;  %v2751_v9 = vadd.f32 %v2750_v1, %v2749_v7 }
 0x736   : > { %v2577_v16 = vrot.slane %v2576_v33, 2  ;;  %v2744_v43 = vadd.f32 %v2743_v20, %v2742_v38 }
 0x737   : > { %v2752_v55 = vrot.slane %v2751_v9, 2 }
 0x738   : > { %v2578_v14 = vadd.f32 %v2577_v16, %v2576_v33  ;;  %v2761_v33 = vrot.slane %v2760_v42, 2  ;;  %v6195_v16 = vld [vmem:[#allocation6_spill] sm:$0xff]  ;;  %v2745_v7 = vrot.slane %v2744_v43, 1 }
 0x739   : > { %v2753_v57 = vadd.f32 %v2752_v55, %v2751_v9 }
 0x73a   : > { %v2579_v23 = vrot.slane %v2578_v14, 1  ;;  %v2762_v3 = vadd.f32 %v2761_v33, %v2760_v42  ;;  %v2746_v1 = vadd.f32 %v2745_v7, %v2744_v43  ;;  %v2708_v33 = vmul.f32 %v5761_v13, %v5445_v61 }
 0x73b   : > { %v2828_v30 = vpop.permute.xlu0 %2827  ;;  %v2633_v46 = vpop.permute.xlu1 %2632  ;;  %v2754_v36 = vrot.slane %v2753_v57, 1 }
 0x73c   : > { %v2699_v45 = vmul.f32 %v2633_v46, %v6193_v54  ;;  %3836 = vmatpush.xpose.msk.msrb.mxu1 %vm456_vm1, %v2828_v30  ;;  %v2580_v60 = vadd.f32 %v2579_v23, %v2578_v14  ;;  %v2763_v2 = vrot.slane %v2762_v3, 1 }
 0x73d   : > { %v2627_v35 = vpop.permute.xlu2 %2626  ;;  %v2755_v30 = vadd.f32 %v2754_v36, %v2753_v57 }
 0x73e   : > { %v2698_v21 = vmul.f32 %v2627_v35, %v6194_v8  ;;  %v2596_v44 = vmul.f32 %v2580_v60, %v5002_v12  ;;  %v2730_v58 = vsel %vm2710_vm11, %v2699_v45, 0.0  ;;  %v2764_v51 = vadd.f32 %v2763_v2, %v2762_v3 }
 0x740   : > { %v2729_v50 = vsel %vm2710_vm11, %v2698_v21, 0.0  ;;  %2680 = vperm.xlu1 %3938, %v2596_v44   ;;  %2674 = vperm.xlu2 %3937, %v2596_v44  }
 0x741   : > { %v2731_v63 = vadd.f32 %v2730_v58, %v2729_v50  ;;  %v6201_v58 = vld [vmem:[#allocation21_spill] sm:$0xff] }
 0x743   : > { %v2732_v62 = vrot.slane %v2731_v63, 4  ;;  %v2865_v42 = vpop.permute.xlu0 %2864 }
 0x745   : > { %v2733_v10 = vadd.f32 %v2732_v62, %v2731_v63 }
 0x747   : > { %v2734_v40 = vrot.slane %v2733_v10, 2 }
 0x748   : > { %2692 = vperm.xlu1 %3938, %v5717_v4   ;;  %2907 = vrot.lane.b32.xlu2 %v6195_v16, %s4289_s12  ;;  %v6196_v4 = vld [vmem:[#allocation5_spill] sm:$0xff] }
 0x749   : > { %v2735_v17 = vadd.f32 %v2734_v40, %v2733_v10 }
 0x74b   : > { %v2736_v14 = vrot.slane %v2735_v17, 1 }
 0x74d   : > { %v2737_v23 = vadd.f32 %v2736_v14, %v2735_v17  ;;  %v3025_v17 = vpop.permute.xlu0 %3024 }
 0x74f   : > { %v2792_v46 = vsel %vm1957_vm5, %v2737_v23, %v5742_v32  ;;  %v6199_v32 = vld [vmem:[#allocation8_spill] sm:$0xff] }
 0x750   : > { %2866 = vrot.lane.b32.xlu1 %v4471_v31, %s4289_s12  ;;  %2905 = vrot.lane.b32.xlu2 %v6196_v4, %s4289_s12  ;;  %v2793_v45 = vsel %vm1959_vm6, %v2746_v1, %v2792_v46  ;;  %v6197_v31 = vld [vmem:[#allocation7_spill] sm:$0xff] }
 0x751   : > { %v2794_v60 = vsel %vm1961_vm7, %v2755_v30, %v2793_v45  ;;  %3939 = vset.pattern.permute.xlu1 %v4949_v18 }
 0x752   : > { %v5784_v35 = vsel %vm1963_vm8, %v2764_v51, %v2794_v60 }
 0x758   : > { %2946 = vrot.lane.b32.xlu1 %v4514_v41, %s4289_s12  ;;  %2901 = vrot.lane.b32.xlu2 %v6196_v4, %s4290_s14  ;;  %v6198_v41 = vld [vmem:[#allocation11_spill] sm:$0xff]  ;;  %v3023_v4 = vpop.permute.xlu0 %3022 }
 0x760   : > { %2944 = vrot.lane.b32.xlu1 %v6197_v31, %s4289_s12  ;;  %2823 = vrot.lane.b32.xlu2 %v4455_v27, %s4290_s14 }
 0x768   : > { %2903 = vrot.lane.b32.xlu1 %v6195_v16, %s4290_s14  ;;  %2940 = vrot.lane.b32.xlu2 %v6197_v31, %s4290_s14  ;;  %v2774_v16 = vsel %vm2710_vm11, %v2708_v33, 0.0 }
 0x770   : > { %2825 = vrot.lane.b32.xlu1 %v4464_v29, %s4290_s14  ;;  %3063 = vrot.lane.b32.xlu2 %v4558_v53, %s4289_s12  ;;  %v447_v53 = vld [vmem:[%s6120_s3 + $0x28] sm:$0xff] }
 0x771   : > { %2816 = vmatpush.msrb.mxu0 %v447_v53 }
 0x778   : > { %3061 = vrot.lane.b32.xlu1 %v6198_v41, %s4289_s12  ;;  %2985 = vrot.lane.b32.xlu2 %v6199_v32, %s4289_s12 }
 0x780   : > { %3018 = vrot.lane.b32.xlu2 %v4541_v48, %s4290_s14  ;;  %v446_v48 = vld [vmem:[%s6120_s3 + $0x20] sm:$0xff] }
 0x781   : > { %2817 = vmatpush.msrb.mxu0 %v446_v48 }
 0x788   : > { %2983 = vrot.lane.b32.xlu2 %v6185_v5, %s4289_s12 }
 0x790   : > { %3020 = vrot.lane.b32.xlu2 %v6174_v19, %s4290_s14  ;;  %v6200_v19 = vld [vmem:[#allocation20_spill] sm:$0xff] }
 0x798   : > { %2981 = vrot.lane.b32.xlu2 %v6199_v32, %s4290_s14 }
 0x79a   : > { %v2675_v27 = vpop.permute.xlu2 %2674 }
 0x79b   : > { %v2706_v21 = vmul.f32 %v2675_v27, %v6200_v19 }
 0x79d   : > { %v2765_v63 = vsel %vm2710_vm11, %v2706_v21, 0.0 }
 0x7a2   : > { %v2908_v29 = vpop.permute.xlu2 %2907 }
 0x7a3   : > { %3843 = vmatpush.xpose.msk.msrb.mxu3 %vm456_vm1, %v2908_v29 }
 0x7aa   : > { %v2906_v38 = vpop.permute.xlu2 %2905 }
 0x7ab   : > { %3844 = vmatpush.xpose.msk.msrb.mxu3 %vm456_vm1, %v2906_v38 }
 0x7b2   : > { %v2902_v44 = vpop.permute.xlu2 %2901  ;;  %v2681_v9 = vpop.permute.xlu1 %2680 }
 0x7b3   : > { %v2707_v50 = vmul.f32 %v2681_v9, %v6201_v58  ;;  %3845 = vmatmul.msk.f32.vlgmr.msrb.gmra.mxu3 %vm456_vm1, %v2902_v44 }
 0x7b5   : > { %v2766_v20 = vsel %vm2710_vm11, %v2707_v50, 0.0 }
 0x7b6   : > { %v2767_v55 = vadd.f32 %v2766_v20, %v2765_v63 }
 0x7b8   : > { %v2768_v62 = vrot.slane %v2767_v55, 4 }
 0x7ba   : > { %v2769_v10 = vadd.f32 %v2768_v62, %v2767_v55  ;;  %v2824_v43 = vpop.permute.xlu2 %2823  ;;  %v2693_v57 = vpop.permute.xlu1 %2692 }
 0x7bb   : > { %v2709_v40 = vmul.f32 %v2693_v57, %v5456_v25  ;;  %3837 = vmatmul.msk.f32.vlgmr.msrb.gmra.mxu1 %vm456_vm1, %v2824_v43 }
 0x7bc   : > { %v2770_v3 = vrot.slane %v2769_v10, 2 }
 0x7bd   : > { %v2775_v7 = vsel %vm2710_vm11, %v2709_v40, 0.0 }
 0x7be   : > { %v2776_v36 = vadd.f32 %v2775_v7, %v2774_v16  ;;  %v2771_v14 = vadd.f32 %v2770_v3, %v2769_v10 }
 0x7c0   : > { %v2777_v2 = vrot.slane %v2776_v36, 4  ;;  %v2772_v13 = vrot.slane %v2771_v14, 1 }
 0x7c2   : > { %v2778_v23 = vadd.f32 %v2777_v2, %v2776_v36  ;;  %v2941_v1 = vpop.permute.xlu2 %2940  ;;  %v2867_v30 = vpop.permute.xlu1 %2866  ;;  %v2773_v45 = vadd.f32 %v2772_v13, %v2771_v14  ;;  %v2028_v13 = vadd.f32 %v5544_v22, %v5554_v39 }
 0x7c3   : > { %3840 = vmatpush.xpose.msk.msrb.mxu2 %vm456_vm1, %v2867_v30 }
 0x7c4   : > { %v2779_v46 = vrot.slane %v2778_v23, 2  ;;  %v2796_v29 = vsel %vm1965_vm9, %v2773_v45, %v5784_v35 }
 0x7c6   : > { %v2780_v51 = vadd.f32 %v2779_v46, %v2778_v23  ;;  %3841 = vmatmul.msk.f32.vlgmr.msrb.gmra.mxu2 %vm456_vm1, %v5756_v24 }
 0x7c7   : > { %3855 = vmatpush.xpose.msk.msra.mxu2 %vm456_vm1, %v3025_v17 }
 0x7c8   : > { %v2781_v60 = vrot.slane %v2780_v51, 1 }
 0x7ca   : > { %v3064_v31 = vpop.permute.xlu2 %3063  ;;  %v2947_v32 = vpop.permute.xlu1 %2946  ;;  %v2782_v27 = vadd.f32 %v2781_v60, %v2780_v51 }
 0x7cb   : > { %3856 = vmatpush.xpose.msk.msra.mxu2 %vm456_vm1, %v3023_v4  ;;  %3847 = vmatpush.xpose.msk.msra.mxu0 %vm456_vm1, %v2947_v32 }
 0x7cc   : > { %3859 = vmatpush.xpose.msk.msra.mxu3 %vm456_vm1, %v3064_v31  ;;  %v2797_v53 = vsel %vm1967_vm10, %v2782_v27, %v2796_v29 }
 0x7cd   : > { %2798 = vrot.lane.b32.xlu1 %v2797_v53, %s4288_s17 }
 0x7ce   : > { %3842 = vmatmul.msk.f32.gmra.mxu2 %vm456_vm1, %v2865_v42  ;;  %v2943_v42 = vpop.permute.xlu0 %2942 }
 0x7d2   : > { %v2986_v24 = vpop.permute.xlu2 %2985  ;;  %v2945_v48 = vpop.permute.xlu1 %2944 }
 0x7d3   : > { %3848 = vmatpush.xpose.msk.msra.mxu0 %vm456_vm1, %v2945_v48  ;;  %3851 = vmatpush.xpose.msk.msra.mxu1 %vm456_vm1, %v2986_v24 }
 0x7d5   : > { %3057 = vrot.lane.b32.xlu1 %v6198_v41, %s4290_s14 }
 0x7d6   : > { %v3103_v63 = vpop.permute.xlu0 %3102 }
 0x7da   : > { %v3019_v38 = vpop.permute.xlu2 %3018  ;;  %v2904_v21 = vpop.permute.xlu1 %2903 }
 0x7db   : > { %3846 = vmatmul.msk.f32.gmra.mxu3 %vm456_vm1, %v2904_v21  ;;  %3857 = vmatmul.msk.f32.vlgmr.msra.gmra.mxu2 %vm456_vm1, %v3019_v38 }
 0x7dd   : > { %2979 = vrot.lane.b32.xlu1 %v6185_v5, %s4290_s14 }
 0x7e2   : > { %v2984_v35 = vpop.permute.xlu2 %2983  ;;  %v2826_v44 = vpop.permute.xlu1 %2825 }
 0x7e3   : > { %3838 = vmatmul.msk.f32.gmra.mxu1 %vm456_vm1, %v2826_v44 }
 0x7e4   : > { %3852 = vmatpush.xpose.msk.msra.mxu1 %vm456_vm1, %v2984_v35 }
 0x7e5   : > { %3096 = vrot.lane.b32.xlu1 %v6173_v28, %s4290_s14  ;;  %v3101_v28 = vpop.permute.xlu0 %3100 }
 0x7ea   : > { %v3021_v9 = vpop.permute.xlu2 %3020  ;;  %v3062_v41 = vpop.permute.xlu1 %3061 }
 0x7eb   : > { %3858 = vmatmul.msk.f32.gmra.mxu2 %vm456_vm1, %v3021_v9  ;;  %3860 = vmatpush.xpose.msk.msra.mxu3 %vm456_vm1, %v3062_v41 }
 0x7ed   : > { %3098 = vrot.lane.b32.xlu1 %v4591_v0, %s4290_s14  ;;  %v3060_v10 = vpop.permute.xlu0 %3059 }
 0x7f2   : > { %v2982_v3 = vpop.permute.xlu2 %2981 }
 0x836   : > { %v2934_v40 = vpop.f32.mrf.mxu3 }
 0x837   : > { %v3147_v23 = vsel %vm456_vm1, %v2934_v40, -inf }
 0x838   : > { %v2856_v5 = vpop.f32.mrf.mxu1 }
 0x839   : > { %v3135_v50 = vsel %vm456_vm1, %v2856_v5, -inf }
 0x83a   : > { %3136 = vmax.xlane.f32.xlu0 %v3135_v50 }
 0x83f   : > { %v2799_v20 = vpop.permute.xlu1 %2798 }
 0x840   : > { %3834 = vmatmul.msk.f32.vlgmr.msrb.gmra.mxu0 %vm456_vm1, %v2799_v20 }
 0x841   : > { %3863 = vmatpush.xpose.msk.msrb.mxu0 %vm456_vm1, %v3103_v63 }
 0x845   : > { %3864 = vmatpush.xpose.msk.msrb.mxu0 %vm456_vm1, %v3101_v28 }
 0x847   : > { %v3058_v55 = vpop.permute.xlu1 %3057 }
 0x848   : > { %3849 = vmatmul.msk.f32.vlgmr.msra.gmra.mxu0 %vm456_vm1, %v2941_v1  ;;  %3861 = vmatmul.msk.f32.vlgmr.msra.gmra.mxu3 %vm456_vm1, %v3058_v55 }
 0x849   : > { %v2895_v0 = vpop.f32.mrf.mxu2 }
 0x84a   : > { %v3141_v62 = vsel %vm456_vm1, %v2895_v0, -inf }
 0x84b   : > { %3142 = vmax.xlane.f32.xlu1 %v3141_v62 }
 0x84f   : > { %v2980_v33 = vpop.permute.xlu1 %2979 }
 0x850   : > { %3850 = vmatmul.msk.f32.gmra.mxu0 %vm456_vm1, %v2943_v42  ;;  %3853 = vmatmul.msk.f32.vlgmr.msra.gmra.mxu1 %vm456_vm1, %v2980_v33 }
 0x851   : > { %3862 = vmatmul.msk.f32.gmra.mxu3 %vm456_vm1, %v3060_v10  ;;  %v2898_v43 = vpop.f32.mrf.mxu2 }
 0x852   : > { %v3144_v57 = vsel %vm456_vm1, %v2898_v43, -inf }
 0x853   : > { %3145 = vmax.xlane.f32.xlu0 %v3144_v57 }
 0x857   : > { %v3097_v16 = vpop.permute.xlu1 %3096 }
 0x858   : > { %3854 = vmatmul.msk.f32.gmra.mxu1 %vm456_vm1, %v2982_v3  ;;  %3865 = vmatmul.msk.f32.vlgmr.msrb.gmra.mxu0 %vm456_vm1, %v3097_v16 }
 0x85e   : > { %v2937_v17 = vpop.f32.mrf.mxu3  ;;  %v3051_v1 = vpop.f32.mrf.mxu2 }
 0x85f   : > { %v3099_v7 = vpop.permute.xlu1 %3098  ;;  %v3150_v36 = vsel %vm456_vm1, %v2937_v17, -inf  ;;  %v3165_v30 = vsel %vm456_vm1, %v3051_v1, -inf }
 0x860   : > { %3151 = vmax.xlane.f32.xlu1 %v3150_v36  ;;  %v2859_v14 = vpop.f32.mrf.mxu1  ;;  %3866 = vmatmul.msk.f32.gmra.mxu0 %vm456_vm1, %v3099_v7 }
 0x861   : > { %v3138_v2 = vsel %vm456_vm1, %v2859_v14, -inf }
 0x862   : > { %3139 = vmax.xlane.f32.xlu2 %v3138_v2 }
 0x86a   : > { %3148 = vmax.xlane.f32.xlu2 %v3147_v23 }
 0x86e   : > { %v5889_v24 = vpop.f32.mrf.mxu2 }
 0x86f   : > { %v3168_v44 = vsel %vm456_vm1, %v5889_v24, -inf }
 0x872   : > { %3166 = vmax.xlane.f32.xlu2 %v3165_v30 }
 0x8ad   : > { %v3137_v4 = vpop.xlane.xlu0 %3136 }
 0x8ae   : > { %v3183_v60 = vsub.f32 %v2856_v5, %v3137_v4 }
 0x8b0   : > { %v3199_v27 = vmul.f32 1.442695, %v3183_v60 }
 0x8b2   : > { %4144 = vpow2.f32 %v3199_v27 }
 0x8b8   : > { %v5898_v63 = vpop.eup %4144 }
 0x8bd   : > { %v2819_v46 = vpop.f32.mrf.mxu0 }
 0x8be   : > { %v5881_v51 = vadd.f32 %v2819_v46, %v2028_v13  ;;  %v3143_v53 = vpop.xlane.xlu1 %3142 }
 0x8bf   : > { %v3185_v48 = vsub.f32 %v2895_v0, %v3143_v53  ;;  %v3231_v0 = vsel %vm456_vm1, %v5898_v63, 0.0 }
 0x8c1   : > { %v3203_v50 = vmul.f32 1.442695, %v3185_v48 }
 0x8c6   : > { %v3146_v29 = vpop.xlane.xlu0 %3145 }
 0x8c7   : > { %v3186_v22 = vsub.f32 %v2898_v43, %v3146_v29  ;;  %v5929_v29 = vpop.f32.mrf.mxu0 }
 0x8c9   : > { %v3205_v42 = vmul.f32 1.442695, %v3186_v22 }
 0x8cb   : > { %v5883_v45 = vpop.f32.mrf.mxu3 }
 0x8cc   : > { %v3171_v33 = vsel %vm456_vm1, %v5883_v45, -inf }
 0x8cd   : > { %v5885_v31 = vpop.f32.mrf.mxu1 }
 0x8ce   : > { %v3159_v32 = vsel %vm456_vm1, %v5885_v31, -inf }
 0x8cf   : > { %3160 = vmax.xlane.f32.xlu1 %v3159_v32 }
 0x8d3   : > { %v3152_v20 = vpop.xlane.xlu1 %3151 }
 0x8d4   : > { %v5891_v39 = vpop.f32.mrf.mxu3  ;;  %v3188_v28 = vsub.f32 %v2937_v17, %v3152_v20 }
 0x8d5   : > { %v3174_v38 = vsel %vm456_vm1, %v5891_v39, -inf  ;;  %v3140_v21 = vpop.xlane.xlu2 %3139  ;;  %v3015_v35 = vpop.f32.mrf.mxu1 }
 0x8d6   : > { %v3184_v9 = vsub.f32 %v2859_v14, %v3140_v21  ;;  %3175 = vmax.xlane.f32.xlu2 %v3174_v38  ;;  %v3162_v41 = vsel %vm456_vm1, %v3015_v35, -inf  ;;  %v3209_v57 = vmul.f32 1.442695, %v3188_v28 }
 0x8d7   : > { %3169 = vmax.xlane.f32.xlu1 %v3168_v44  ;;  %3163 = vmax.xlane.f32.xlu0 %v3162_v41 }
 0x8d8   : > { %v3201_v5 = vmul.f32 1.442695, %v3184_v9 }
 0x8da   : > { %4146 = vpow2.f32 %v3201_v5 }
 0x8db   : > { %4148 = vpow2.f32 %v3205_v42 }
 0x8dc   : > { %4150 = vpow2.f32 %v3203_v50  ;;  %v5937_v50 = vpop.f32.mrf.mxu0 }
 0x8dd   : > { %v3149_v55 = vpop.xlane.xlu2 %3148 }
 0x8de   : > { %v3187_v62 = vsub.f32 %v2934_v40, %v3149_v55  ;;  %3232 = vadd.xlane.f32.xlu2 %v3231_v0 }
 0x8df   : > { %3172 = vmax.xlane.f32.xlu0 %v3171_v33 }
 0x8e0   : > { %v5904_v10 = vpop.eup %4146  ;;  %v3207_v43 = vmul.f32 1.442695, %v3187_v62 }
 0x8e1   : > { %v3234_v3 = vsel %vm456_vm1, %v5904_v10, 0.0  ;;  %v5908_v16 = vpop.eup %4148 }
 0x8e2   : > { %4152 = vpow2.f32 %v3207_v43  ;;  %3235 = vadd.xlane.f32.xlu1 %v3234_v3  ;;  %v5910_v17 = vpop.eup %4150  ;;  %v3240_v7 = vsel %vm456_vm1, %v5908_v16, 0.0 }
 0x8e3   : > { %4154 = vpow2.f32 %v3209_v57  ;;  %v3237_v14 = vsel %vm456_vm1, %v5910_v17, 0.0 }
 0x8e5   : > { %v3167_v40 = vpop.xlane.xlu2 %3166 }
 0x8e6   : > { %v3193_v36 = vsub.f32 %v3051_v1, %v3167_v40  ;;  %3241 = vadd.xlane.f32.xlu2 %v3240_v7  ;;  %v3129_v40 = vpop.f32.mrf.mxu0 }
 0x8e7   : > { %3238 = vadd.xlane.f32.xlu0 %v3237_v14 }
 0x8e8   : > { %v5916_v2 = vpop.eup %4152  ;;  %v3219_v23 = vmul.f32 1.442695, %v3193_v36 }
 0x8e9   : > { %v3243_v30 = vsel %vm456_vm1, %v5916_v2, 0.0  ;;  %v5920_v13 = vpop.eup %4154 }
 0x8ea   : > { %4156 = vpow2.f32 %v3219_v23  ;;  %3244 = vadd.xlane.f32.xlu1 %v3243_v30  ;;  %v3246_v46 = vsel %vm456_vm1, %v5920_v13, 0.0 }
 0x8ef   : > { %3247 = vadd.xlane.f32.xlu0 %v3246_v46  ;;  %v3177_v46 = vsel %vm456_vm1, %v3129_v40, -inf }
 0x8f0   : > { %v5924_v1 = vpop.eup %4156 }
 0x8f1   : > { %v3261_v4 = vsel %vm456_vm1, %v5924_v1, 0.0 }
 0x8f2   : > { %3262 = vadd.xlane.f32.xlu1 %v3261_v4 }
 0x942   : > { %v3161_v60 = vpop.xlane.xlu1 %3160 }
 0x943   : > { %v3191_v32 = vsub.f32 %v5885_v31, %v3161_v60 }
 0x945   : > { %v3215_v27 = vmul.f32 1.442695, %v3191_v32 }
 0x947   : > { %4158 = vpow2.f32 %v3215_v27 }
 0x949   : > { %v3176_v53 = vpop.xlane.xlu2 %3175 }
 0x94a   : > { %v3196_v22 = vsub.f32 %v5891_v39, %v3176_v53  ;;  %v3164_v48 = vpop.xlane.xlu0 %3163  ;;  %v3170_v38 = vpop.xlane.xlu1 %3169 }
 0x94b   : > { %v3192_v21 = vsub.f32 %v3015_v35, %v3164_v48  ;;  %v3194_v44 = vsub.f32 %v5889_v24, %v3170_v38 }
 0x94c   : > { %v3225_v9 = vmul.f32 1.442695, %v3196_v22 }
 0x94d   : > { %v5933_v41 = vpop.eup %4158  ;;  %v3217_v42 = vmul.f32 1.442695, %v3192_v21  ;;  %v3221_v5 = vmul.f32 1.442695, %v3194_v44  ;;  %v3132_v21 = vpop.f32.mrf.mxu0 }
 0x94e   : > { %4160 = vpow2.f32 %v3225_v9  ;;  %v3255_v31 = vsel %vm456_vm1, %v5933_v41, 0.0 }
 0x94f   : > { %4162 = vpow2.f32 %v3217_v42  ;;  %3256 = vadd.xlane.f32.xlu0 %v3255_v31  ;;  %v3156_v31 = vsel %vm456_vm1, %v5937_v50, -inf }
 0x950   : > { %4164 = vpow2.f32 %v3221_v5 }
 0x951   : > { %v3233_v39 = vpop.xlane.xlu2 %3232 }
 0x952   : > { %4166 = vrcp.f32 %v3233_v39  ;;  %v3173_v20 = vpop.xlane.xlu0 %3172 }
 0x953   : > { %v3195_v35 = vsub.f32 %v5883_v45, %v3173_v20  ;;  %v3180_v20 = vsel %vm456_vm1, %v3132_v21, -inf }
 0x954   : > { %v5940_v24 = vpop.eup %4160 }
 0x955   : > { %v5942_v28 = vpop.eup %4162  ;;  %v3223_v55 = vmul.f32 1.442695, %v3195_v35  ;;  %v3270_v0 = vsel %vm456_vm1, %v5940_v24, 0.0  ;;  %v3236_v62 = vpop.xlane.xlu1 %3235 }
 0x956   : > { %v5946_v33 = vpop.eup %4164  ;;  %3271 = vadd.xlane.f32.xlu1 %v3270_v0  ;;  %4168 = vrcp.f32 %v3236_v62  ;;  %v3258_v43 = vsel %vm456_vm1, %v5942_v28, 0.0 }
 0x957   : > { %4170 = vpow2.f32 %v3223_v55  ;;  %3259 = vadd.xlane.f32.xlu2 %v3258_v43  ;;  %v3264_v45 = vsel %vm456_vm1, %v5946_v33, 0.0 }
 0x958   : > { %v4167_v57 = vpop.eup %4166  ;;  %3265 = vadd.xlane.f32.xlu0 %v3264_v45 }
 0x959   : > { %v3242_v3 = vpop.xlane.xlu2 %3241  ;;  %v3295_v36 = vmul.f32 %v4167_v57, %v5898_v63  ;;  %v3153_v63 = vsel %vm456_vm1, %v5929_v29, -inf }
 0x95a   : > { %4172 = vrcp.f32 %v3242_v3  ;;  %v3239_v7 = vpop.xlane.xlu0 %3238 }
 0x95b   : > { %4174 = vrcp.f32 %v3239_v7  ;;  %v3311_v60 = vsel %vm456_vm1, %v3295_v36, 0.0 }
 0x95c   : > { %v4169_v14 = vpop.eup %4168 }
 0x95d   : > { %v5953_v23 = vpop.eup %4170  ;;  %v3296_v30 = vmul.f32 %v4169_v14, %v5904_v10  ;;  %v3245_v36 = vpop.xlane.xlu1 %3244 }
 0x95e   : > { %3178 = vmax.xlane.f32.xlu1 %v3177_v46  ;;  %v3267_v4 = vsel %vm456_vm1, %v5953_v23, 0.0 }
 0x95f   : > { %v3312_v32 = vsel %vm456_vm1, %v3296_v30, 0.0  ;;  %3268 = vadd.xlane.f32.xlu2 %v3267_v4 }
 0x960   : > { %v4173_v27 = vpop.eup %4172  ;;  %v3313_v53 = vadd.f32 %v3312_v32, %v3311_v60  ;;  %3154 = vmax.xlane.f32.xlu0 %v3153_v63 }
 0x961   : > { %v4175_v22 = vpop.eup %4174  ;;  %v3298_v10 = vmul.f32 %v4173_v27, %v5908_v16 }
 0x962   : > { %v3314_v48 = vrot.slane %v3313_v53, 4  ;;  %v3297_v38 = vmul.f32 %v4175_v22, %v5910_v17  ;;  %v3248_v14 = vpop.xlane.xlu0 %3247 }
 0x963   : > { %v3321_v9 = vsel %vm456_vm1, %v3298_v10, 0.0  ;;  %4176 = vrcp.f32 %v3248_v14 }
 0x964   : > { %v3315_v44 = vadd.f32 %v3314_v48, %v3313_v53  ;;  %v3320_v42 = vsel %vm456_vm1, %v3297_v38, 0.0  ;;  %4178 = vrcp.f32 %v3245_v36 }
 0x965   : > { %v3322_v5 = vadd.f32 %v3321_v9, %v3320_v42  ;;  %v3263_v30 = vpop.xlane.xlu1 %3262 }
 0x966   : > { %v3316_v39 = vrot.slane %v3315_v44, 2 }
 0x967   : > { %v3323_v35 = vrot.slane %v3322_v5, 4  ;;  %3157 = vmax.xlane.f32.xlu2 %v3156_v31 }
 0x968   : > { %3181 = vmax.xlane.f32.xlu0 %v3180_v20  ;;  %v3317_v55 = vadd.f32 %v3316_v39, %v3315_v44 }
 0x969   : > { %v3324_v16 = vadd.f32 %v3323_v35, %v3322_v5  ;;  %v4177_v44 = vpop.eup %4176 }
 0x96a   : > { %v3318_v0 = vrot.slane %v3317_v55, 1  ;;  %v4179_v9 = vpop.eup %4178  ;;  %v3300_v5 = vmul.f32 %v4177_v44, %v5920_v13 }
 0x96b   : > { %v3325_v17 = vrot.slane %v3324_v16, 2  ;;  %v3299_v35 = vmul.f32 %v4179_v9, %v5916_v2 }
 0x96c   : > { %v3319_v62 = vadd.f32 %v3318_v0, %v3317_v55 }
 0x96d   : > { %v3326_v43 = vadd.f32 %v3325_v17, %v3324_v16  ;;  %v3330_v17 = vsel %vm456_vm1, %v3300_v5, 0.0 }
 0x96e   : > { %v3383_v45 = vmul.f32 %v3319_v62, %v5002_v12 }
 0x96f   : > { %v3327_v57 = vrot.slane %v3326_v43, 1 }
 0x971   : > { %v3328_v3 = vadd.f32 %v3327_v57, %v3326_v43 }
 0x973   : > { %v5972_v7 = vmul.f32 %v3328_v3, %v5002_v12 }
 0x977   : > { %3395 = vperm.xlu1 %3939, %v3383_v45  }
 0x97c   : > { %3401 = vperm.xlu0 %3935, %v3383_v45  }
 0x97f   : > { %3407 = vperm.xlu2 %3937, %v5972_v7  }
 0x987   : > { %3940 = vset.pattern.permute.xlu2 %v4963_v11 }
 0x9c2   : > { %v3257_v46 = vpop.xlane.xlu0 %3256 }
 0x9c9   : > { %v3272_v4 = vpop.xlane.xlu1 %3271 }
 0x9ca   : > { %v3260_v60 = vpop.xlane.xlu2 %3259 }
 0x9cb   : > { %v3266_v32 = vpop.xlane.xlu0 %3265 }
 0x9d1   : > { %v3179_v63 = vpop.xlane.xlu1 %3178 }
 0x9d2   : > { %v3197_v27 = vsub.f32 %v3129_v40, %v3179_v63  ;;  %v3269_v53 = vpop.xlane.xlu2 %3268 }
 0x9d3   : > { %v3155_v22 = vpop.xlane.xlu0 %3154 }
 0x9d4   : > { %v3227_v10 = vmul.f32 1.442695, %v3197_v27  ;;  %v3189_v48 = vsub.f32 %v5929_v29, %v3155_v22 }
 0x9d6   : > { %4180 = vpow2.f32 %v3227_v10  ;;  %v3211_v38 = vmul.f32 1.442695, %v3189_v48 }
 0x9d8   : > { %4182 = vpow2.f32 %v3211_v38 }
 0x9da   : > { %v3158_v42 = vpop.xlane.xlu2 %3157 }
 0x9db   : > { %v3190_v31 = vsub.f32 %v5937_v50, %v3158_v42  ;;  %v3182_v39 = vpop.xlane.xlu0 %3181  ;;  %v3329_v50 = vsel %vm456_vm1, %v3299_v35, 0.0 }
 0x9dc   : > { %v5979_v20 = vpop.eup %4180  ;;  %v3198_v40 = vsub.f32 %v3132_v21, %v3182_v39  ;;  %v3331_v21 = vadd.f32 %v3330_v17, %v3329_v50 }
 0x9dd   : > { %v3213_v16 = vmul.f32 1.442695, %v3190_v31  ;;  %v3273_v29 = vsel %vm456_vm1, %v5979_v20, 0.0 }
 0x9de   : > { %v5984_v55 = vpop.eup %4182  ;;  %v3229_v0 = vmul.f32 1.442695, %v3198_v40  ;;  %3274 = vadd.xlane.f32.xlu0 %v3273_v29  ;;  %v3332_v43 = vrot.slane %v3331_v21, 4 }
 0x9df   : > { %4184 = vpow2.f32 %v3213_v16  ;;  %v3249_v13 = vsel %vm456_vm1, %v5984_v55, 0.0 }
 0x9e0   : > { %4186 = vpow2.f32 %v3229_v0  ;;  %3250 = vadd.xlane.f32.xlu2 %v3249_v13  ;;  %v3333_v14 = vadd.f32 %v3332_v43, %v3331_v21 }
 0x9e1   : > { %4188 = vrcp.f32 %v3260_v60 }
 0x9e2   : > { %4190 = vrcp.f32 %v3257_v46  ;;  %v3334_v63 = vrot.slane %v3333_v14, 2 }
 0x9e3   : > { %4192 = vrcp.f32 %v3266_v32 }
 0x9e4   : > { %4194 = vrcp.f32 %v3263_v30  ;;  %v3335_v44 = vadd.f32 %v3334_v63, %v3333_v14 }
 0x9e5   : > { %v5990_v2 = vpop.eup %4184  ;;  %4196 = vrcp.f32 %v3269_v53 }
 0x9e6   : > { %v5992_v62 = vpop.eup %4186  ;;  %v3252_v45 = vsel %vm456_vm1, %v5990_v2, 0.0  ;;  %4198 = vrcp.f32 %v3272_v4  ;;  %v3336_v32 = vrot.slane %v3335_v44, 1 }
 0x9e7   : > { %v3276_v57 = vsel %vm456_vm1, %v5992_v62, 0.0  ;;  %3253 = vadd.xlane.f32.xlu1 %v3252_v45  ;;  %v4189_v3 = vpop.eup %4188 }
 0x9e8   : > { %3277 = vadd.xlane.f32.xlu2 %v3276_v57  ;;  %v4191_v36 = vpop.eup %4190  ;;  %v3304_v60 = vmul.f32 %v4189_v3, %v5942_v28  ;;  %v3337_v35 = vadd.f32 %v3336_v32, %v3335_v44 }
 0x9e9   : > { %v3303_v46 = vmul.f32 %v4191_v36, %v5933_v41  ;;  %v4193_v22 = vpop.eup %4192 }
 0x9ea   : > { %v3348_v27 = vsel %vm456_vm1, %v3304_v60, 0.0  ;;  %v4195_v48 = vpop.eup %4194  ;;  %v3306_v9 = vmul.f32 %v4193_v22, %v5946_v33 }
 0x9eb   : > { %v3347_v10 = vsel %vm456_vm1, %v3303_v46, 0.0  ;;  %v3305_v28 = vmul.f32 %v4195_v48, %v5924_v1  ;;  %v4197_v42 = vpop.eup %4196  ;;  %v3385_v1 = vmul.f32 %v3337_v35, %v5002_v12 }
 0x9ec   : > { %v3349_v38 = vadd.f32 %v3348_v27, %v3347_v10  ;;  %v3357_v41 = vsel %vm456_vm1, %v3306_v9, 0.0  ;;  %v4199_v31 = vpop.eup %4198  ;;  %v3408_v10 = vpop.permute.xlu2 %3407 }
 0x9ed   : > { %v3356_v5 = vsel %vm456_vm1, %v3305_v28, 0.0  ;;  %v3308_v33 = vmul.f32 %v4199_v31, %v5940_v24 }
 0x9ee   : > { %v3350_v30 = vrot.slane %v3349_v38, 4  ;;  %v3358_v40 = vadd.f32 %v3357_v41, %v3356_v5  ;;  %v3402_v48 = vpop.permute.xlu0 %3401 }
 0x9ef   : > { %v3366_v29 = vsel %vm456_vm1, %v3308_v33, 0.0 }
 0x9f0   : > { %v3351_v39 = vadd.f32 %v3350_v30, %v3349_v38  ;;  %v3359_v4 = vrot.slane %v3358_v40, 4  ;;  %v3396_v38 = vpop.permute.xlu1 %3395 }
 0x9f2   : > { %3413 = vperm.xlu0 %3935, %v5972_v7   ;;  %v3307_v7 = vmul.f32 %v4197_v42, %v5953_v23  ;;  %v3352_v53 = vrot.slane %v3351_v39, 2  ;;  %v3360_v0 = vadd.f32 %v3359_v4, %v3358_v40 }
 0x9f4   : > { %v3365_v16 = vsel %vm456_vm1, %v3307_v7, 0.0  ;;  %v3353_v13 = vadd.f32 %v3352_v53, %v3351_v39  ;;  %v3361_v43 = vrot.slane %v3360_v0, 2 }
 0x9f5   : > { %v3367_v17 = vadd.f32 %v3366_v29, %v3365_v16 }
 0x9f6   : > { %v3354_v21 = vrot.slane %v3353_v13, 1  ;;  %v3362_v45 = vadd.f32 %v3361_v43, %v3360_v0 }
 0x9f7   : > { %v3368_v50 = vrot.slane %v3367_v17, 4 }
 0x9f8   : > { %v3355_v23 = vadd.f32 %v3354_v21, %v3353_v13  ;;  %v3363_v3 = vrot.slane %v3362_v45, 1 }
 0x9f9   : > { %v3369_v24 = vadd.f32 %v3368_v50, %v3367_v17 }
 0x9fa   : > { %3943 = vset.pattern.permute.xlu0 %v4949_v18  ;;  %v3387_v57 = vmul.f32 %v3355_v23, %v5002_v12  ;;  %v3364_v14 = vadd.f32 %v3363_v3, %v3362_v45 }
 0x9fb   : > { %v3370_v36 = vrot.slane %v3369_v24, 2 }
 0x9fc   : > { %v3388_v46 = vmul.f32 %v3364_v14, %v5002_v12 }
 0x9fd   : > { %v3371_v60 = vadd.f32 %v3370_v36, %v3369_v24 }
 0x9ff   : > { %v3372_v63 = vrot.slane %v3371_v60, 1 }
 0xa00   : > { %3425 = vperm.xlu2 %3940, %v3385_v1   ;;  %3419 = vperm.xlu1 %3939, %v3385_v1  }
 0xa01   : > { %v3373_v27 = vadd.f32 %v3372_v63, %v3371_v60 }
 0xa03   : > { %v3389_v22 = vmul.f32 %v3373_v27, %v5002_v12 }
 0xa08   : > { %3941 = vset.pattern.permute.xlu2 %v4949_v18  ;;  %3942 = vset.pattern.permute.xlu1 %v4963_v11 }
 0xa10   : > { %3443 = vperm.xlu2 %3941, %v3387_v57   ;;  %3449 = vperm.xlu1 %3942, %v3387_v57  }
 0xa18   : > { %3455 = vperm.xlu2 %3941, %v3388_v46   ;;  %3945 = vset.pattern.permute.xlu1 %v4949_v18 }
 0xa20   : > { %3946 = vset.pattern.permute.xlu2 %v4963_v11  ;;  %3467 = vperm.xlu1 %3945, %v3389_v22  }
 0xa28   : > { %3473 = vperm.xlu2 %3946, %v3389_v22   ;;  %3947 = vset.pattern.permute.xlu1 %v4963_v11 }
 0xa51   : > { %v3275_v9 = vpop.xlane.xlu0 %3274 }
 0xa53   : > { %v3251_v44 = vpop.xlane.xlu2 %3250 }
 0xa54   : > { %4200 = vrcp.f32 %v3251_v44  ;;  %v3489_v44 = vmul.f32 %v3408_v10, %v6186_v37 }
 0xa55   : > { %4202 = vrcp.f32 %v3275_v9  ;;  %v3488_v9 = vmul.f32 %v3402_v48, %v5296_v26 }
 0xa5a   : > { %v3254_v28 = vpop.xlane.xlu1 %3253  ;;  %v4201_v32 = vpop.eup %4200 }
 0xa5b   : > { %v3278_v30 = vpop.xlane.xlu2 %3277  ;;  %4204 = vrcp.f32 %v3254_v28  ;;  %v4203_v41 = vpop.eup %4202  ;;  %v3301_v42 = vmul.f32 %v4201_v32, %v5984_v55 }
 0xa5c   : > { %4206 = vrcp.f32 %v3278_v30  ;;  %v3309_v31 = vmul.f32 %v4203_v41, %v5979_v20  ;;  %v3513_v30 = vsel %vm3503_vm12, %v3489_v44, 0.0 }
 0xa5d   : > { %v3338_v7 = vsel %vm456_vm1, %v3301_v42, 0.0 }
 0xa5e   : > { %v3374_v4 = vsel %vm456_vm1, %v3309_v31, 0.0 }
 0xa61   : > { %v4205_v5 = vpop.eup %4204 }
 0xa62   : > { %v4207_v39 = vpop.eup %4206  ;;  %v3302_v40 = vmul.f32 %v4205_v5, %v5990_v2 }
 0xa63   : > { %v3310_v35 = vmul.f32 %v4207_v39, %v5992_v62  ;;  %v3426_v57 = vpop.permute.xlu2 %3425 }
 0xa64   : > { %v3339_v33 = vsel %vm456_vm1, %v3302_v40, 0.0  ;;  %v3414_v60 = vpop.permute.xlu0 %3413 }
 0xa65   : > { %v3375_v1 = vsel %vm456_vm1, %v3310_v35, 0.0  ;;  %v3340_v53 = vadd.f32 %v3339_v33, %v3338_v7  ;;  %v3490_v27 = vmul.f32 %v3414_v60, %v6187_v6  ;;  %v3505_v6 = vsel %vm3503_vm12, %v3488_v9, 0.0 }
 0xa66   : > { %v3376_v16 = vadd.f32 %v3375_v1, %v3374_v4 }
 0xa67   : > { %v3341_v29 = vrot.slane %v3340_v53, 4 }
 0xa68   : > { %v3377_v55 = vrot.slane %v3376_v16, 4 }
 0xa69   : > { %v3342_v0 = vadd.f32 %v3341_v29, %v3340_v53 }
 0xa6a   : > { %v3378_v17 = vadd.f32 %v3377_v55, %v3376_v16 }
 0xa6b   : > { %v3343_v20 = vrot.slane %v3342_v0, 2  ;;  %v3444_v36 = vpop.permute.xlu2 %3443 }
 0xa6c   : > { %v3379_v13 = vrot.slane %v3378_v17, 2  ;;  %v3495_v5 = vmul.f32 %v3444_v36, %v6191_v47 }
 0xa6d   : > { %v3344_v50 = vadd.f32 %v3343_v20, %v3342_v0 }
 0xa6e   : > { %v3380_v2 = vadd.f32 %v3379_v13, %v3378_v17 }
 0xa6f   : > { %v3345_v21 = vrot.slane %v3344_v50, 1 }
 0xa70   : > { %v3381_v62 = vrot.slane %v3380_v2, 1 }
 0xa71   : > { %v3346_v43 = vadd.f32 %v3345_v21, %v3344_v50 }
 0xa72   : > { %v3382_v24 = vadd.f32 %v3381_v62, %v3380_v2  ;;  %v3420_v3 = vpop.permute.xlu1 %3419 }
 0xa73   : > { %v3386_v23 = vmul.f32 %v3346_v43, %v5002_v12  ;;  %v3456_v22 = vpop.permute.xlu2 %3455 }
 0xa74   : > { %v3390_v45 = vmul.f32 %v3382_v24, %v5002_v12  ;;  %v3491_v12 = vmul.f32 %v3420_v3, %v6194_v8  ;;  %v3497_v24 = vmul.f32 %v3456_v22, %v6190_v56 }
 0xa75   : > { %3437 = vperm.xlu1 %3947, %v3386_v23   ;;  %3431 = vperm.xlu0 %3943, %v3386_v23  }
 0xa76   : > { %3485 = vperm.xlu2 %3946, %v3390_v45   ;;  %v3522_v28 = vsel %vm3503_vm12, %v3491_v12, 0.0  ;;  %v3549_v9 = vsel %vm3503_vm12, %v3497_v24, 0.0 }
 0xa7d   : > { %3948 = vset.pattern.permute.xlu1 %v4949_v18  ;;  %3944 = vset.pattern.permute.xlu0 %v4963_v11  ;;  %v3492_v18 = vmul.f32 %v3426_v57, %v6193_v54  ;;  %v3487_v11 = vmul.f32 %v3396_v38, %v5300_v52 }
 0xa7f   : > { %v3523_v32 = vsel %vm3503_vm12, %v3492_v18, 0.0  ;;  %v3504_v48 = vsel %vm3503_vm12, %v3487_v11, 0.0 }
 0xa80   : > { %v3524_v54 = vadd.f32 %v3523_v32, %v3522_v28  ;;  %v3506_v42 = vadd.f32 %v3505_v6, %v3504_v48 }
 0xa82   : > { %v3450_v14 = vpop.permute.xlu1 %3449  ;;  %v3474_v41 = vpop.permute.xlu2 %3473  ;;  %v3525_v4 = vrot.slane %v3524_v54, 4  ;;  %v3507_v47 = vrot.slane %v3506_v42, 4 }
 0xa83   : > { %v3496_v37 = vmul.f32 %v3450_v14, %v6188_v34  ;;  %v3500_v35 = vmul.f32 %v3474_v41, %v6201_v58 }
 0xa84   : > { %v3526_v55 = vadd.f32 %v3525_v4, %v3524_v54  ;;  %v3508_v17 = vadd.f32 %v3507_v47, %v3506_v42 }
 0xa85   : > { %3479 = vperm.xlu1 %3948, %v3390_v45   ;;  %3461 = vperm.xlu0 %3944, %v3388_v46   ;;  %v3514_v46 = vsel %vm3503_vm12, %v3490_v27, 0.0  ;;  %v3541_v7 = vsel %vm3503_vm12, %v3496_v37, 0.0  ;;  %v3559_v29 = vsel %vm3503_vm12, %v3500_v35, 0.0 }
 0xa86   : > { %v3515_v8 = vadd.f32 %v3514_v46, %v3513_v30  ;;  %v3527_v21 = vrot.slane %v3526_v55, 2  ;;  %v3509_v43 = vrot.slane %v3508_v17, 2 }
 0xa88   : > { %v3516_v34 = vrot.slane %v3515_v8, 4  ;;  %v3528_v60 = vadd.f32 %v3527_v21, %v3526_v55  ;;  %v3510_v44 = vadd.f32 %v3509_v43, %v3508_v17  ;;  %v3949_v17 = vld [vmem:[%s6121_s4] ss:$0 sm:$0xff] }
 0xa8a   : > { %v3517_v16 = vadd.f32 %v3516_v34, %v3515_v8  ;;  %v3529_v6 = vrot.slane %v3528_v60, 1  ;;  %v3511_v8 = vrot.slane %v3510_v44, 1 }
 0xa8c   : > { %v3518_v50 = vrot.slane %v3517_v16, 2  ;;  %v3530_v41 = vadd.f32 %v3529_v6, %v3528_v60 }
 0xa8e   : > { %v3519_v3 = vadd.f32 %v3518_v50, %v3517_v16 }
 0xa90   : > { %v3520_v46 = vrot.slane %v3519_v3, 1 }
 0xa92   : > { %v3468_v63 = vpop.permute.xlu1 %3467 }
 0xa93   : > { %v3499_v31 = vmul.f32 %v3468_v63, %v6200_v19  ;;  %v3540_v19 = vsel %vm3503_vm12, %v3495_v5, 0.0 }
 0xa94   : > { %v3542_v58 = vadd.f32 %v3541_v7, %v3540_v19 }
 0xa95   : > { %v3558_v1 = vsel %vm3503_vm12, %v3499_v31, 0.0 }
 0xa96   : > { %v3560_v0 = vadd.f32 %v3559_v29, %v3558_v1  ;;  %v3543_v13 = vrot.slane %v3542_v58, 4 }
 0xa98   : > { %v3561_v62 = vrot.slane %v3560_v0, 4  ;;  %v3544_v45 = vadd.f32 %v3543_v13, %v3542_v58 }
 0xa9a   : > { %v3562_v63 = vadd.f32 %v3561_v62, %v3560_v0  ;;  %v3545_v11 = vrot.slane %v3544_v45, 2 }
 0xa9c   : > { %v3563_v32 = vrot.slane %v3562_v63, 2 }
 0xad0   : > { %v3486_v2 = vpop.permute.xlu2 %3485 }
 0xad1   : > { %v3502_v57 = vmul.f32 %v3486_v2, %v5456_v25 }
 0xad3   : > { %v3568_v56 = vsel %vm3503_vm12, %v3502_v57, 0.0 }
 0xae7   : > { %v3432_v10 = vpop.permute.xlu0 %3431  ;;  %v3438_v26 = vpop.permute.xlu1 %3437 }
 0xae8   : > { %v3493_v52 = vmul.f32 %v3432_v10, %v5347_v49  ;;  %v3494_v38 = vmul.f32 %v3438_v26, %v6189_v15  ;;  %v449_v49 = vld [vmem:[%s6120_s3 + $0x38] sm:$0xff]  ;;  %v448_v15 = vld [vmem:[%s6120_s3 + $0x30] sm:$0xff]  ;;  %v3546_v10 = vadd.f32 %v3545_v11, %v3544_v45  ;;  %v3521_v26 = vadd.f32 %v3520_v46, %v3519_v3 }
 0xae9   : > { %3609 = vmatpush.msrb.mxu1 %v449_v49 }
 0xaea   : > { %v3531_v39 = vsel %vm3503_vm12, %v3493_v52, 0.0  ;;  %v3532_v40 = vsel %vm3503_vm12, %v3494_v38, 0.0  ;;  %v3564_v52 = vadd.f32 %v3563_v32, %v3562_v63  ;;  %v3512_v38 = vadd.f32 %v3511_v8, %v3510_v44 }
 0xaeb   : > { %v3533_v33 = vadd.f32 %v3532_v40, %v3531_v39  ;;  %3610 = vmatpush.msrb.mxu1 %v448_v15  ;;  %v3547_v39 = vrot.slane %v3546_v10, 1 }
 0xaec   : > { %v3584_v40 = vsel %vm1955_vm4, %v3521_v26, %v3512_v38 }
 0xaed   : > { %v3534_v53 = vrot.slane %v3533_v33, 4  ;;  %v3585_v7 = vsel %vm1957_vm5, %v3530_v41, %v3584_v40  ;;  %v3548_v47 = vadd.f32 %v3547_v39, %v3546_v10 }
 0xaef   : > { %v3535_v20 = vadd.f32 %v3534_v53, %v3533_v33  ;;  %v3565_v33 = vrot.slane %v3564_v52, 1 }
 0xaf1   : > { %v3536_v23 = vrot.slane %v3535_v20, 2  ;;  %v3566_v1 = vadd.f32 %v3565_v33, %v3564_v52 }
 0xaf3   : > { %v3537_v18 = vadd.f32 %v3536_v23, %v3535_v20 }
 0xaf7   : > { %v3462_v36 = vpop.permute.xlu0 %3461  ;;  %v3480_v14 = vpop.permute.xlu1 %3479 }
 0xaf8   : > { %v3498_v27 = vmul.f32 %v3462_v36, %v6192_v59  ;;  %v3501_v12 = vmul.f32 %v3480_v14, %v5445_v61  ;;  %v3538_v59 = vrot.slane %v3537_v18, 1 }
 0xafa   : > { %v3550_v22 = vsel %vm3503_vm12, %v3498_v27, 0.0  ;;  %v3567_v25 = vsel %vm3503_vm12, %v3501_v12, 0.0  ;;  %v3539_v42 = vadd.f32 %v3538_v59, %v3537_v18 }
 0xafb   : > { %v3551_v28 = vadd.f32 %v3550_v22, %v3549_v9  ;;  %v3569_v30 = vadd.f32 %v3568_v56, %v3567_v25 }
 0xafc   : > { %v3586_v15 = vsel %vm1959_vm6, %v3539_v42, %v3585_v7 }
 0xafd   : > { %v3552_v37 = vrot.slane %v3551_v28, 4  ;;  %v3570_v61 = vrot.slane %v3569_v30, 4  ;;  %v3587_v53 = vsel %vm1961_vm7, %v3548_v47, %v3586_v15 }
 0xaff   : > { %v3553_v48 = vadd.f32 %v3552_v37, %v3551_v28  ;;  %v3571_v54 = vadd.f32 %v3570_v61, %v3569_v30 }
 0xb01   : > { %v3554_v5 = vrot.slane %v3553_v48, 2  ;;  %v3572_v31 = vrot.slane %v3571_v54, 2 }
 0xb03   : > { %v3555_v34 = vadd.f32 %v3554_v5, %v3553_v48  ;;  %v3573_v35 = vadd.f32 %v3572_v31, %v3571_v54 }
 0xb05   : > { %v3556_v4 = vrot.slane %v3555_v34, 1  ;;  %v3574_v49 = vrot.slane %v3573_v35, 1 }
 0xb07   : > { %v3557_v19 = vadd.f32 %v3556_v4, %v3555_v34  ;;  %v3575_v58 = vadd.f32 %v3574_v49, %v3573_v35 }
 0xb09   : > { %v3588_v16 = vsel %vm1963_vm8, %v3557_v19, %v3587_v53 }
 0xb0a   : > { %v3589_v29 = vsel %vm1965_vm9, %v3566_v1, %v3588_v16 }
 0xb0b   : > { %v3590_v55 = vsel %vm1967_vm10, %v3575_v58, %v3589_v29 }
 0xb0c   : > { %3591 = vrot.lane.b32.xlu0 %v3590_v55, %s4290_s14  ;;  %s4233_s14 = sshra.s32 %s3638_s23, 4  ;;  %s4234_s14 = int_to_ptr.hbm [resolvable:$true] %s4233_s14 }
 0xb0d   : > { %s4235_s17 = scalar_lea.hbm %s4234_s14, 8  ;;  %p4240_p0 = scmp.lt.s32.totalorder %s4234_s14, %s6122_s5 }
 0xb0e   : > { %p4236_p11 = scmp.ne.s32.totalorder %s4234_s14, %s4235_s17  ;;  %p4241_p1 = scmp.lt.s32.totalorder %s4239_s30, %s4235_s17 }
 0xb10   : > { %p4237_p12 = pnand %p4236_p11, %p4359_p5  ;;  %p4242_p2 = por %p4241_p1, %p4240_p0 }
 0xb12   : > { %p4238_p13 = pneg %p4237_p12 }
 0xb14   : > { %p4243_p3 = pnand %p4242_p2, %p4238_p13 }
 0xb7e   : > { %v3592_v0 = vpop.permute.xlu0 %3591 }
 0xb7f   : > { %3867 = vmatmul.msk.f32.vlgmr.msrb.gmra.mxu1 %vm456_vm1, %v3592_v0 }
 0xbfc   : > { %v3612_v20 = vpop.f32.mrf.mxu1 }
 0xbfd   : > { %v3615_v13 = vadd.f32 %v3612_v20, %v5881_v51 }
 0xbff   : > { %v3620_v50 = vadd.f32 %v3949_v17, %v3615_v13 }
 0xc01   : > { %3621 = vst.msk [vmem:[%s218_s16] sm:$0xff] %vm263_vm0, %v3620_v50 }
 0xc02   : > { %4246 = shalt.err (!%p4243_p3)
}
 0xc03   : > { %3872 = dma.vmem_to_hbm [thread:$0]  (%p4359_p5), %s3636_s7, 128, %s3638_s23, %s3623_s22  }
 0xc04 PF: > { %p3878_p4 = scmp.ge.s32.totalorder %s4281_s21, 2  ;;  %s3649_s6 = sand.u32 1, %s4269_s18  }
 0xc05   : > { %s3650_s10 = scalar_lea.sflag [#allocation3], %s3649_s6 }
 0xc06   : > { %p3875_p7 = pnand %p3878_p4, %p4363_p6 }
 0xc08   : > { %p3876_p8 = pneg %p3875_p7 }
 0xc0a   : > { %4264 = dma.done.wait (%p3876_p8), %s3650_s10, 128  }
 0xc0b   : > { %4266 = vsyncadd (%p3876_p8), %s3650_s10, 4294967168  ;;  %p15_p9 = scmp.ge.s32.totalorder %s4346_s24, 4   ;;  %s6202_s18 = smov %s4273_s19 }
 0xc0c   : > { %s6203_s19 = smov %s4277_s20  ;;  %s6204_s20 = smov %s4357_s27 }
 0xc0d   : > { %s6205_s21 = smov %s4346_s24  ;;  %17 = sbr.rel (!%p15_p9) target bundleno = 3 (0x3), region = 75 }
 0xc12   :  { %3656 = vsyncpa [#allocation3], 1 }
 0xc13   :  { %3658 = vsyncpa [#allocation3 + $0x1], 1 }

</bundles_post_ra>
